<compile_context>
chip_gen: v7x
topology: tpu7x:2x2x1
jax: 0.10.0
libtpu: 0.0.40
codegen_flags: <defaults>
</compile_context>

<pallas_src>
import math

import numpy as np

import jax
import jax.numpy as jnp
from jax.experimental import pallas as pl
from jax.experimental.pallas import tpu as pltpu

BN_EPS = 1e-5
_VMEM_LIMIT = 32 * 1024 * 1024       # safe scoped limit on v5e / v6e / v7x
_ROW_BUDGET = 10 * 1024 * 1024       # activation-tile budget within that limit
_MAX_ROWS = 2048


# ---------------------------------------------------------------------------
# Block-size selection (no padding: blocks always divide the image exactly)
# ---------------------------------------------------------------------------
def _pick_rows(hw, cap_rows, n_batch):
    """Largest row block dividing hw with 8-sublane alignment (or full)."""
    cands = [d for d in range(hw, 0, -1)
             if hw % d == 0 and (d == hw or d % 8 == 0)]
    fitting = [d for d in cands if d <= cap_rows] or cands[-1:]
    rows = fitting[0]
    if n_batch * (hw // rows) < 2:               # keep both v7x TCs busy
        smaller = [d for d in fitting if d < rows] or [d for d in cands if d < rows]
        if smaller:
            rows = smaller[0]
    return rows


def _pick_gh(h_half, w2, cap_rows, n_batch):
    """Output-row-pairs per block; half-res source block must stay aligned."""
    cands = []
    for gh in range(h_half, 0, -1):
        if h_half % gh:
            continue
        rows, rows4 = gh * 2 * w2, gh * (w2 // 2)
        if gh == h_half or (rows % 8 == 0 and rows4 % 8 == 0):
            cands.append(gh)
    fitting = [g for g in cands if g * 2 * w2 <= cap_rows] or cands[-1:]
    gh = fitting[0]
    if n_batch * (h_half // gh) < 2:             # keep both v7x TCs busy
        smaller = [g for g in fitting if g < gh] or [g for g in cands if g < gh]
        if smaller:
            gh = smaller[0]
    return gh


def _upsample_matrix(gh, w2, dtype=jnp.bfloat16):
    """Constant 0/1 matrix R with up2x(x) == R @ x for a block of gh src rows."""
    rows = gh * 2 * w2
    w_half = w2 // 2
    j = np.arange(rows)
    src = (j // w2 // 2) * w_half + (j % w2) // 2
    return jnp.asarray(src[:, None] == np.arange(gh * w_half)[None, :], dtype)


# ---------------------------------------------------------------------------
# Pallas kernel: [R @ (x_half @ w_half)] + x_full @ w_full + shift
#                -> [ReLU] -> [optional fused 1x1 head]
# ---------------------------------------------------------------------------
def _make_kernel(has_half, relu, has_head):
    def kernel(*refs):
        i = 0
        if has_half:
            xh_ref, r_ref, wh_ref = refs[i], refs[i + 1], refs[i + 2]
            i += 3
        xf_ref, wf_ref, shift_ref = refs[i], refs[i + 1], refs[i + 2]
        i += 3
        if has_head:
            hw_ref, hs_ref = refs[i], refs[i + 1]
            i += 2
        o_ref = refs[i]

        y = shift_ref[...] + jnp.dot(xf_ref[...], wf_ref[...],
                                     preferred_element_type=jnp.float32)
        if has_half:
            # conv at half resolution, then nearest-2x upsample as a matmul
            a = jnp.dot(xh_ref[...], wh_ref[...],
                        preferred_element_type=jnp.float32)
            y = y + jnp.dot(r_ref[...], a.astype(jnp.bfloat16),
                            preferred_element_type=jnp.float32)
        if relu:
            y = jnp.maximum(y, 0.0)
        if has_head:                              # fused 1x1 head (final conv)
            y = jnp.dot(y.astype(hw_ref.dtype), hw_ref[...],
                        preferred_element_type=jnp.float32) + hs_ref[...]
        o_ref[...] = y.astype(o_ref.dtype)
    return kernel


def fused_upconv1x1(x_full, w_full, shift, *, h, w,
                    x_half=None, w_half=None, relu=True,
                    head_w=None, head_shift=None,
                    out_dtype=jnp.bfloat16):
    """One fused decoder stage on [N, H*W, C] channels-last activations.

        y = [relu]( up2x(x_half) @ w_half + x_full @ w_full + shift )
        y = y @ head_w + head_shift                      (optional fused head)

    x_half lives at (h//2, w//2) resolution; its nearest 2x upsample is folded
    into the kernel via a constant replication matmul so it is never
    materialised in HBM.  Eval-mode BatchNorm is pre-folded into w_*/shift.
    """
    n, hw, c_full = x_full.shape
    assert hw == h * w
    c_out = w_full.shape[-1]
    has_half = x_half is not None
    has_head = head_w is not None
    out_c = head_w.shape[1] if has_head else c_out
    out_b = jnp.dtype(out_dtype).itemsize

    args, in_specs = [], []
    if has_half:
        assert h % 2 == 0 and w % 2 == 0
        assert x_half.shape[1] == (h // 2) * (w // 2)
        c_half = x_half.shape[-1]
        # VMEM/row: db bf16 full-res in + quarter-size half-res in + db out
        #           + f32 accumulator/epilogue + R allowance (<=2048 rows).
        per_row = 4 * c_full + c_half + (2 * out_b + 8) * c_out + 1024
        cap = max(8, min(_MAX_ROWS, _ROW_BUDGET // per_row))
        gh = _pick_gh(h // 2, w, cap, n)
        rows, rows4 = gh * 2 * w, gh * (w // 2)
        R = _upsample_matrix(gh, w)
        args += [x_half, R, jnp.asarray(w_half, jnp.bfloat16)]
        in_specs += [
            pl.BlockSpec((None, rows4, c_half), lambda i, j: (i, j, 0)),
            pl.BlockSpec(R.shape, lambda i, j: (0, 0)),
            pl.BlockSpec(w_half.shape, lambda i, j: (0, 0)),
        ]
    else:
        per_row = 4 * c_full + (2 * out_b + 8) * c_out
        cap = max(8, min(_MAX_ROWS, _ROW_BUDGET // per_row))
        rows = _pick_rows(hw, cap, n)

    shift2 = jnp.asarray(shift, jnp.float32).reshape(1, c_out)
    args += [x_full, jnp.asarray(w_full, jnp.bfloat16), shift2]
    in_specs += [
        pl.BlockSpec((None, rows, c_full), lambda i, j: (i, j, 0)),
        pl.BlockSpec(w_full.shape, lambda i, j: (0, 0)),
        pl.BlockSpec((1, c_out), lambda i, j: (0, 0)),
    ]
    if has_head:
        hw2 = jnp.asarray(head_w, jnp.bfloat16)
        hs2 = jnp.asarray(head_shift, jnp.float32).reshape(1, out_c)
        args += [hw2, hs2]
        in_specs += [pl.BlockSpec(head_w.shape, lambda i, j: (0, 0)),
                     pl.BlockSpec((1, out_c), lambda i, j: (0, 0))]

    flops = 2 * n * hw * c_full * c_out
    if has_half:
        flops += 2 * n * (hw // 4) * c_half * c_out      # half-res conv
        flops += 2 * n * hw * rows4 * c_out              # replication matmul
    if has_head:
        flops += 2 * n * hw * c_out * out_c
    bytes_accessed = (sum(int(a.size) * a.dtype.itemsize for a in args)
                      + n * hw * out_c * out_b)

    out = pl.pallas_call(
        _make_kernel(has_half, relu, has_head),
        out_shape=jax.ShapeDtypeStruct((n, hw, out_c), out_dtype),
        grid=(n, hw // rows),
        in_specs=in_specs,
        out_specs=pl.BlockSpec((None, rows, out_c), lambda i, j: (i, j, 0)),
        compiler_params=pltpu.CompilerParams(
            dimension_semantics=("parallel", "parallel"),
            vmem_limit_bytes=_VMEM_LIMIT,
        ),
        cost_estimate=pl.CostEstimate(flops=flops, transcendentals=0,
                                      bytes_accessed=bytes_accessed),
    )(*args)
    return out


# ---------------------------------------------------------------------------
# Parameters (eval-mode BN folded into weights; deterministic init)
# ---------------------------------------------------------------------------
def make_params(key):
    def conv_init(key, cin, cout):
        kw, kb = jax.random.split(key)
        w = jax.random.normal(kw, (cin, cout), jnp.float32) * 0.05
        b = jax.random.normal(kb, (cout,), jnp.float32) * 0.05
        return w, b

    def plain_conv(key, cin, cout):
        w, b = conv_init(key, cin, cout)
        return {"w": w, "shift": b}

    def upconv(key, cin, cout):
        w, b = conv_init(key, cin, cout)
        # eval-mode BN, fresh stats: scale = 1/sqrt(1+eps), beta=0, mean=0.
        s = 1.0 / math.sqrt(1.0 + BN_EPS)
        return {"w": w * s, "shift": b * s}

    keys = jax.random.split(key, 7)
    return {
        "addition": plain_conv(keys[0], 64, 48),
        "up0": upconv(keys[1], 512, 256),
        "up1": upconv(keys[2], 512, 128),
        "up2": upconv(keys[3], 256, 64),
        "up3": upconv(keys[4], 128, 48),
        "up4": upconv(keys[5], 96, 48),
        "final": plain_conv(keys[6], 48, 2),
    }


# ---------------------------------------------------------------------------
# Forward (decoder path of Memseg.forward); NCHW in, NCHW out
# ---------------------------------------------------------------------------
def memseg_forward(params, x_enc_first, x_enc_last, x_att_1, x_att_2, x_att_3):
    """x_enc_first/x_enc_last/x_att_* stand in for the outputs of the external
    resnet18 encoder, MemoryBank and MSFF modules (code not provided).
    Every UpConvBlock's 1x1 conv(+BN+ReLU) commutes with the nearest upsample,
    so each stage runs at pre-upsample resolution and the 2x replication of the
    previous stage is folded into the consuming kernel."""
    def flat(t):   # NCHW f32 -> [N, H*W, C] bf16 (single fused copy per input)
        n, c, hh, ww = t.shape
        return (jnp.transpose(t, (0, 2, 3, 1)).reshape(n, hh * ww, c)
                .astype(jnp.bfloat16), hh, ww)

    p = params
    xl, h0, w0 = flat(x_enc_last)
    a1, h1, w1 = flat(x_att_1)
    a2, h2, w2 = flat(x_att_2)
    a3, h3, w3 = flat(x_att_3)
    xf, h4, w4 = flat(x_enc_first)

    # upconv0: conv+BN+ReLU at pre-upsample resolution (upsample folded ahead)
    y0 = fused_upconv1x1(xl, p["up0"]["w"], p["up0"]["shift"], h=h0, w=w0)

    # upconv1..3: cat([up2x(y_prev), x_att_k]) as two accumulated dots;
    # weight split assumes the PyTorch concat order cat([x_up, x_att]).
    wk = p["up1"]["w"]; c = y0.shape[-1]
    y1 = fused_upconv1x1(a1, wk[c:], p["up1"]["shift"], h=h1, w=w1,
                         x_half=y0, w_half=wk[:c])

    wk = p["up2"]["w"]; c = y1.shape[-1]
    y2 = fused_upconv1x1(a2, wk[c:], p["up2"]["shift"], h=h2, w=w2,
                         x_half=y1, w_half=wk[:c])

    wk = p["up3"]["w"]; c = y2.shape[-1]
    y3 = fused_upconv1x1(a3, wk[c:], p["up3"]["shift"], h=h3, w=w3,
                         x_half=y2, w_half=wk[:c])

    # upconv4: linear addition_conv folded into the second concat half, and
    # final_conv fused as a head, all at pre-upsample resolution.
    wk = p["up4"]["w"]; c = y3.shape[-1]
    w4a, w4b = wk[:c], wk[c:]
    w_full4 = p["addition"]["w"] @ w4b                       # (64, 48)
    shift4 = p["addition"]["shift"] @ w4b + p["up4"]["shift"]
    pred_small = fused_upconv1x1(
        xf, w_full4, shift4, h=h4, w=w4,
        x_half=y3, w_half=w4a,
        head_w=p["final"]["w"], head_shift=p["final"]["shift"],
        out_dtype=jnp.float32)

    # Final 2x nearest upsample + NCHW of the 2-channel logits (tiny; XLA).
    n = pred_small.shape[0]
    pred = pred_small.reshape(n, h4, w4, 2)
    pred = jnp.repeat(jnp.repeat(pred, 2, axis=1), 2, axis=2)
    return jnp.transpose(pred, (0, 3, 1, 2))


if __name__ == "__main__":
    key = jax.random.PRNGKey(0)
    k_par, k0, k1, k2, k3, k4 = jax.random.split(key, 6)

    params = make_params(k_par)

    # Small shapes consistent with the decoder's channel/spatial chain.
    N, h0, w0 = 2, 2, 2
    x_enc_last = jax.random.normal(k0, (N, 512, h0, w0), jnp.float32)
    x_att_1 = jax.random.normal(k1, (N, 256, 2 * h0, 2 * w0), jnp.float32)
    x_att_2 = jax.random.normal(k2, (N, 128, 4 * h0, 4 * w0), jnp.float32)
    x_att_3 = jax.random.normal(k3, (N, 64, 8 * h0, 8 * w0), jnp.float32)
    x_enc_first = jax.random.normal(k4, (N, 64, 16 * h0, 16 * w0), jnp.float32)

    out = jax.jit(memseg_forward)(params, x_enc_first, x_enc_last,
                                  x_att_1, x_att_2, x_att_3)
    out = jax.block_until_ready(out)
    assert out.shape == (N, 2, 32 * h0, 32 * w0), out.shape
    print("KERNEL_OK")
</pallas_src>

<mosaic_0001>
module attributes {stable_mosaic.version = 11 : i64} {
  func.func @kernel(%arg0: i32, %arg1: i32, %arg2: memref<1x4x512xbf16, #tpu.memory_space<vmem>>, %arg3: memref<512x256xbf16, #tpu.memory_space<vmem>>, %arg4: memref<1x256xf32, #tpu.memory_space<vmem>>, %arg5: memref<1x4x256xbf16, #tpu.memory_space<vmem>>) attributes {dimension_semantics = [#tpu.dimension_semantics<parallel>, #tpu.dimension_semantics<parallel>], iteration_bounds = array<i64: 2, 1>, scalar_prefetch = 0 : i64, scratch_operands = 0 : i64, tpu.core_type = #tpu.core_type<tc>, window_params = [{transform_indices = @transform_0, window_bounds = array<i64: 1, 4, 512>}, {pipeline_mode = #tpu.pipeline_mode<synchronous>, transform_indices = @transform_1, window_bounds = array<i64: 512, 256>}, {pipeline_mode = #tpu.pipeline_mode<synchronous>, transform_indices = @transform_2, window_bounds = array<i64: 1, 256>}, {transform_indices = @transform_3, window_bounds = array<i64: 1, 4, 256>}]} {
    %c0 = arith.constant 0 : index
    %c0_0 = arith.constant 0 : index
    %0 = vector.load %arg4[%c0, %c0_0] : memref<1x256xf32, #tpu.memory_space<vmem>>, vector<1x256xf32>
    %c0_1 = arith.constant 0 : index
    %c0_2 = arith.constant 0 : index
    %c0_3 = arith.constant 0 : index
    %1 = vector.load %arg2[%c0_1, %c0_2, %c0_3] : memref<1x4x512xbf16, #tpu.memory_space<vmem>>, vector<1x4x512xbf16>
    %2 = vector.shape_cast %1 : vector<1x4x512xbf16> to vector<4x512xbf16>
    %c0_4 = arith.constant 0 : index
    %c0_5 = arith.constant 0 : index
    %3 = vector.load %arg3[%c0_4, %c0_5] : memref<512x256xbf16, #tpu.memory_space<vmem>>, vector<512x256xbf16>
    %cst = arith.constant dense<0.000000e+00> : vector<4x256xf32>
    %4 = tpu.matmul %2, %3, %cst {dimension_numbers = #tpu.dot_dimension_numbers<[1], [0], [0], [1], [0, 0, 1, 1], [], []>} : vector<4x512xbf16>, vector<512x256xbf16>, vector<4x256xf32> -> vector<4x256xf32>
    %5 = vector.broadcast %0 : vector<1x256xf32> to vector<4x256xf32>
    %6 = arith.addf %5, %4 : vector<4x256xf32>
    %cst_6 = arith.constant 0.000000e+00 : f32
    %7 = vector.broadcast %cst_6 : f32 to vector<4x256xf32>
    %8 = arith.maximumf %6, %7 : vector<4x256xf32>
    %9 = arith.truncf %8 : vector<4x256xf32> to vector<4x256xbf16>
    %c0_7 = arith.constant 0 : index
    %c0_8 = arith.constant 0 : index
    %c0_9 = arith.constant 0 : index
    %10 = vector.load %arg5[%c0_7, %c0_8, %c0_9] : memref<1x4x256xbf16, #tpu.memory_space<vmem>>, vector<1x4x256xbf16>
    %11 = vector.shape_cast %10 : vector<1x4x256xbf16> to vector<4x256xbf16>
    %12 = vector.shape_cast %9 : vector<4x256xbf16> to vector<1x4x256xbf16>
    tpu.vector_store %arg5[%c0_7, %c0_8, %c0_9], %12 {strides = array<i32>} : memref<1x4x256xbf16, #tpu.memory_space<vmem>>, vector<1x4x256xbf16>,
    return
  }
  func.func @transform_0(%arg0: i32, %arg1: i32) -> (i32, i32, i32) {
    %c0_i32 = arith.constant 0 : i32
    %c0_i32_0 = arith.constant 0 : i32
    return %arg0, %arg1, %c0_i32 : i32, i32, i32
  }
  func.func @transform_1(%arg0: i32, %arg1: i32) -> (i32, i32) {
    %c0_i32 = arith.constant 0 : i32
    %c0_i32_0 = arith.constant 0 : i32
    %c0_i32_1 = arith.constant 0 : i32
    return %c0_i32, %c0_i32_0 : i32, i32
  }
  func.func @transform_2(%arg0: i32, %arg1: i32) -> (i32, i32) {
    %c0_i32 = arith.constant 0 : i32
    %c0_i32_0 = arith.constant 0 : i32
    %c0_i32_1 = arith.constant 0 : i32
    return %c0_i32, %c0_i32_0 : i32, i32
  }
  func.func @transform_3(%arg0: i32, %arg1: i32) -> (i32, i32, i32) {
    %c0_i32 = arith.constant 0 : i32
    %c0_i32_0 = arith.constant 0 : i32
    return %arg0, %arg1, %c0_i32 : i32, i32, i32
  }
}

module attributes {stable_mosaic.version = 11 : i64} {
  func.func @kernel(%arg0: i32, %arg1: i32, %arg2: memref<1x4x256xbf16, #tpu.memory_space<vmem>>, %arg3: memref<16x4xbf16, #tpu.memory_space<vmem>>, %arg4: memref<256x128xbf16, #tpu.memory_space<vmem>>, %arg5: memref<1x16x256xbf16, #tpu.memory_space<vmem>>, %arg6: memref<256x128xbf16, #tpu.memory_space<vmem>>, %arg7: memref<1x128xf32, #tpu.memory_space<vmem>>, %arg8: memref<1x16x128xbf16, #tpu.memory_space<vmem>>) attributes {dimension_semantics = [#tpu.dimension_semantics<parallel>, #tpu.dimension_semantics<parallel>], iteration_bounds = array<i64: 2, 1>, scalar_prefetch = 0 : i64, scratch_operands = 0 : i64, tpu.core_type = #tpu.core_type<tc>, window_params = [{transform_indices = @transform_0, window_bounds = array<i64: 1, 4, 256>}, {pipeline_mode = #tpu.pipeline_mode<synchronous>, transform_indices = @transform_1, window_bounds = array<i64: 16, 4>}, {pipeline_mode = #tpu.pipeline_mode<synchronous>, transform_indices = @transform_2, window_bounds = array<i64: 256, 128>}, {transform_indices = @transform_3, window_bounds = array<i64: 1, 16, 256>}, {pipeline_mode = #tpu.pipeline_mode<synchronous>, transform_indices = @transform_4, window_bounds = array<i64: 256, 128>}, {pipeline_mode = #tpu.pipeline_mode<synchronous>, transform_indices = @transform_5, window_bounds = array<i64: 1, 128>}, {transform_indices = @transform_6, window_bounds = array<i64: 1, 16, 128>}]} {
    %c0 = arith.constant 0 : index
    %c0_0 = arith.constant 0 : index
    %0 = vector.load %arg7[%c0, %c0_0] : memref<1x128xf32, #tpu.memory_space<vmem>>, vector<1x128xf32>
    %c0_1 = arith.constant 0 : index
    %c0_2 = arith.constant 0 : index
    %c0_3 = arith.constant 0 : index
    %1 = vector.load %arg5[%c0_1, %c0_2, %c0_3] : memref<1x16x256xbf16, #tpu.memory_space<vmem>>, vector<1x16x256xbf16>
    %2 = vector.shape_cast %1 : vector<1x16x256xbf16> to vector<16x256xbf16>
    %c0_4 = arith.constant 0 : index
    %c0_5 = arith.constant 0 : index
    %3 = vector.load %arg6[%c0_4, %c0_5] : memref<256x128xbf16, #tpu.memory_space<vmem>>, vector<256x128xbf16>
    %cst = arith.constant dense<0.000000e+00> : vector<16x128xf32>
    %4 = tpu.matmul %2, %3, %cst {dimension_numbers = #tpu.dot_dimension_numbers<[1], [0], [0], [1], [0, 0, 1, 1], [], []>} : vector<16x256xbf16>, vector<256x128xbf16>, vector<16x128xf32> -> vector<16x128xf32>
    %5 = vector.broadcast %0 : vector<1x128xf32> to vector<16x128xf32>
    %6 = arith.addf %5, %4 : vector<16x128xf32>
    %c0_6 = arith.constant 0 : index
    %c0_7 = arith.constant 0 : index
    %c0_8 = arith.constant 0 : index
    %7 = vector.load %arg2[%c0_6, %c0_7, %c0_8] : memref<1x4x256xbf16, #tpu.memory_space<vmem>>, vector<1x4x256xbf16>
    %8 = vector.shape_cast %7 : vector<1x4x256xbf16> to vector<4x256xbf16>
    %c0_9 = arith.constant 0 : index
    %c0_10 = arith.constant 0 : index
    %9 = vector.load %arg4[%c0_9, %c0_10] : memref<256x128xbf16, #tpu.memory_space<vmem>>, vector<256x128xbf16>
    %cst_11 = arith.constant dense<0.000000e+00> : vector<4x128xf32>
    %10 = tpu.matmul %8, %9, %cst_11 {dimension_numbers = #tpu.dot_dimension_numbers<[1], [0], [0], [1], [0, 0, 1, 1], [], []>} : vector<4x256xbf16>, vector<256x128xbf16>, vector<4x128xf32> -> vector<4x128xf32>
    %c0_12 = arith.constant 0 : index
    %c0_13 = arith.constant 0 : index
    %11 = vector.load %arg3[%c0_12, %c0_13] : memref<16x4xbf16, #tpu.memory_space<vmem>>, vector<16x4xbf16>
    %12 = arith.truncf %10 : vector<4x128xf32> to vector<4x128xbf16>
    %cst_14 = arith.constant dense<0.000000e+00> : vector<16x128xf32>
    %13 = tpu.matmul %11, %12, %cst_14 {dimension_numbers = #tpu.dot_dimension_numbers<[1], [0], [0], [1], [0, 0, 1, 1], [], []>} : vector<16x4xbf16>, vector<4x128xbf16>, vector<16x128xf32> -> vector<16x128xf32>
    %14 = arith.addf %6, %13 : vector<16x128xf32>
    %cst_15 = arith.constant 0.000000e+00 : f32
    %15 = vector.broadcast %cst_15 : f32 to vector<16x128xf32>
    %16 = arith.maximumf %14, %15 : vector<16x128xf32>
    %17 = arith.truncf %16 : vector<16x128xf32> to vector<16x128xbf16>
    %c0_16 = arith.constant 0 : index
    %c0_17 = arith.constant 0 : index
    %c0_18 = arith.constant 0 : index
    %18 = vector.load %arg8[%c0_16, %c0_17, %c0_18] : memref<1x16x128xbf16, #tpu.memory_space<vmem>>, vector<1x16x128xbf16>
    %19 = vector.shape_cast %18 : vector<1x16x128xbf16> to vector<16x128xbf16>
    %20 = vector.shape_cast %17 : vector<16x128xbf16> to vector<1x16x128xbf16>
    tpu.vector_store %arg8[%c0_16, %c0_17, %c0_18], %20 {strides = array<i32>} : memref<1x16x128xbf16, #tpu.memory_space<vmem>>, vector<1x16x128xbf16>,
    return
  }
  func.func @transform_0(%arg0: i32, %arg1: i32) -> (i32, i32, i32) {
    %c0_i32 = arith.constant 0 : i32
    %c0_i32_0 = arith.constant 0 : i32
    return %arg0, %arg1, %c0_i32 : i32, i32, i32
  }
  func.func @transform_1(%arg0: i32, %arg1: i32) -> (i32, i32) {
    %c0_i32 = arith.constant 0 : i32
    %c0_i32_0 = arith.constant 0 : i32
    %c0_i32_1 = arith.constant 0 : i32
    return %c0_i32, %c0_i32_0 : i32, i32
  }
  func.func @transform_2(%arg0: i32, %arg1: i32) -> (i32, i32) {
    %c0_i32 = arith.constant 0 : i32
    %c0_i32_0 = arith.constant 0 : i32
    %c0_i32_1 = arith.constant 0 : i32
    return %c0_i32, %c0_i32_0 : i32, i32
  }
  func.func @transform_3(%arg0: i32, %arg1: i32) -> (i32, i32, i32) {
    %c0_i32 = arith.constant 0 : i32
    %c0_i32_0 = arith.constant 0 : i32
    return %arg0, %arg1, %c0_i32 : i32, i32, i32
  }
  func.func @transform_4(%arg0: i32, %arg1: i32) -> (i32, i32) {
    %c0_i32 = arith.constant 0 : i32
    %c0_i32_0 = arith.constant 0 : i32
    %c0_i32_1 = arith.constant 0 : i32
    return %c0_i32, %c0_i32_0 : i32, i32
  }
  func.func @transform_5(%arg0: i32, %arg1: i32) -> (i32, i32) {
    %c0_i32 = arith.constant 0 : i32
    %c0_i32_0 = arith.constant 0 : i32
    %c0_i32_1 = arith.constant 0 : i32
    return %c0_i32, %c0_i32_0 : i32, i32
  }
  func.func @transform_6(%arg0: i32, %arg1: i32) -> (i32, i32, i32) {
    %c0_i32 = arith.constant 0 : i32
    %c0_i32_0 = arith.constant 0 : i32
    return %arg0, %arg1, %c0_i32 : i32, i32, i32
  }
}

module attributes {stable_mosaic.version = 11 : i64} {
  func.func @kernel(%arg0: i32, %arg1: i32, %arg2: memref<1x16x128xbf16, #tpu.memory_space<vmem>>, %arg3: memref<64x16xbf16, #tpu.memory_space<vmem>>, %arg4: memref<128x64xbf16, #tpu.memory_space<vmem>>, %arg5: memref<1x64x128xbf16, #tpu.memory_space<vmem>>, %arg6: memref<128x64xbf16, #tpu.memory_space<vmem>>, %arg7: memref<1x64xf32, #tpu.memory_space<vmem>>, %arg8: memref<1x64x64xbf16, #tpu.memory_space<vmem>>) attributes {dimension_semantics = [#tpu.dimension_semantics<parallel>, #tpu.dimension_semantics<parallel>], iteration_bounds = array<i64: 2, 1>, scalar_prefetch = 0 : i64, scratch_operands = 0 : i64, tpu.core_type = #tpu.core_type<tc>, window_params = [{transform_indices = @transform_0, window_bounds = array<i64: 1, 16, 128>}, {pipeline_mode = #tpu.pipeline_mode<synchronous>, transform_indices = @transform_1, window_bounds = array<i64: 64, 16>}, {pipeline_mode = #tpu.pipeline_mode<synchronous>, transform_indices = @transform_2, window_bounds = array<i64: 128, 64>}, {transform_indices = @transform_3, window_bounds = array<i64: 1, 64, 128>}, {pipeline_mode = #tpu.pipeline_mode<synchronous>, transform_indices = @transform_4, window_bounds = array<i64: 128, 64>}, {pipeline_mode = #tpu.pipeline_mode<synchronous>, transform_indices = @transform_5, window_bounds = array<i64: 1, 64>}, {transform_indices = @transform_6, window_bounds = array<i64: 1, 64, 64>}]} {
    %c0 = arith.constant 0 : index
    %c0_0 = arith.constant 0 : index
    %0 = vector.load %arg7[%c0, %c0_0] : memref<1x64xf32, #tpu.memory_space<vmem>>, vector<1x64xf32>
    %c0_1 = arith.constant 0 : index
    %c0_2 = arith.constant 0 : index
    %c0_3 = arith.constant 0 : index
    %1 = vector.load %arg5[%c0_1, %c0_2, %c0_3] : memref<1x64x128xbf16, #tpu.memory_space<vmem>>, vector<1x64x128xbf16>
    %2 = vector.shape_cast %1 : vector<1x64x128xbf16> to vector<64x128xbf16>
    %c0_4 = arith.constant 0 : index
    %c0_5 = arith.constant 0 : index
    %3 = vector.load %arg6[%c0_4, %c0_5] : memref<128x64xbf16, #tpu.memory_space<vmem>>, vector<128x64xbf16>
    %cst = arith.constant dense<0.000000e+00> : vector<64x64xf32>
    %4 = tpu.matmul %2, %3, %cst {dimension_numbers = #tpu.dot_dimension_numbers<[1], [0], [0], [1], [0, 0, 1, 1], [], []>} : vector<64x128xbf16>, vector<128x64xbf16>, vector<64x64xf32> -> vector<64x64xf32>
    %5 = vector.broadcast %0 : vector<1x64xf32> to vector<64x64xf32>
    %6 = arith.addf %5, %4 : vector<64x64xf32>
    %c0_6 = arith.constant 0 : index
    %c0_7 = arith.constant 0 : index
    %c0_8 = arith.constant 0 : index
    %7 = vector.load %arg2[%c0_6, %c0_7, %c0_8] : memref<1x16x128xbf16, #tpu.memory_space<vmem>>, vector<1x16x128xbf16>
    %8 = vector.shape_cast %7 : vector<1x16x128xbf16> to vector<16x128xbf16>
    %c0_9 = arith.constant 0 : index
    %c0_10 = arith.constant 0 : index
    %9 = vector.load %arg4[%c0_9, %c0_10] : memref<128x64xbf16, #tpu.memory_space<vmem>>, vector<128x64xbf16>
    %cst_11 = arith.constant dense<0.000000e+00> : vector<16x64xf32>
    %10 = tpu.matmul %8, %9, %cst_11 {dimension_numbers = #tpu.dot_dimension_numbers<[1], [0], [0], [1], [0, 0, 1, 1], [], []>} : vector<16x128xbf16>, vector<128x64xbf16>, vector<16x64xf32> -> vector<16x64xf32>
    %c0_12 = arith.constant 0 : index
    %c0_13 = arith.constant 0 : index
    %11 = vector.load %arg3[%c0_12, %c0_13] : memref<64x16xbf16, #tpu.memory_space<vmem>>, vector<64x16xbf16>
    %12 = arith.truncf %10 : vector<16x64xf32> to vector<16x64xbf16>
    %cst_14 = arith.constant dense<0.000000e+00> : vector<64x64xf32>
    %13 = tpu.matmul %11, %12, %cst_14 {dimension_numbers = #tpu.dot_dimension_numbers<[1], [0], [0], [1], [0, 0, 1, 1], [], []>} : vector<64x16xbf16>, vector<16x64xbf16>, vector<64x64xf32> -> vector<64x64xf32>
    %14 = arith.addf %6, %13 : vector<64x64xf32>
    %cst_15 = arith.constant 0.000000e+00 : f32
    %15 = vector.broadcast %cst_15 : f32 to vector<64x64xf32>
    %16 = arith.maximumf %14, %15 : vector<64x64xf32>
    %17 = arith.truncf %16 : vector<64x64xf32> to vector<64x64xbf16>
    %c0_16 = arith.constant 0 : index
    %c0_17 = arith.constant 0 : index
    %c0_18 = arith.constant 0 : index
    %18 = vector.load %arg8[%c0_16, %c0_17, %c0_18] : memref<1x64x64xbf16, #tpu.memory_space<vmem>>, vector<1x64x64xbf16>
    %19 = vector.shape_cast %18 : vector<1x64x64xbf16> to vector<64x64xbf16>
    %20 = vector.shape_cast %17 : vector<64x64xbf16> to vector<1x64x64xbf16>
    tpu.vector_store %arg8[%c0_16, %c0_17, %c0_18], %20 {strides = array<i32>} : memref<1x64x64xbf16, #tpu.memory_space<vmem>>, vector<1x64x64xbf16>,
    return
  }
  func.func @transform_0(%arg0: i32, %arg1: i32) -> (i32, i32, i32) {
    %c0_i32 = arith.constant 0 : i32
    %c0_i32_0 = arith.constant 0 : i32
    return %arg0, %arg1, %c0_i32 : i32, i32, i32
  }
  func.func @transform_1(%arg0: i32, %arg1: i32) -> (i32, i32) {
    %c0_i32 = arith.constant 0 : i32
    %c0_i32_0 = arith.constant 0 : i32
    %c0_i32_1 = arith.constant 0 : i32
    return %c0_i32, %c0_i32_0 : i32, i32
  }
  func.func @transform_2(%arg0: i32, %arg1: i32) -> (i32, i32) {
    %c0_i32 = arith.constant 0 : i32
    %c0_i32_0 = arith.constant 0 : i32
    %c0_i32_1 = arith.constant 0 : i32
    return %c0_i32, %c0_i32_0 : i32, i32
  }
  func.func @transform_3(%arg0: i32, %arg1: i32) -> (i32, i32, i32) {
    %c0_i32 = arith.constant 0 : i32
    %c0_i32_0 = arith.constant 0 : i32
    return %arg0, %arg1, %c0_i32 : i32, i32, i32
  }
  func.func @transform_4(%arg0: i32, %arg1: i32) -> (i32, i32) {
    %c0_i32 = arith.constant 0 : i32
    %c0_i32_0 = arith.constant 0 : i32
    %c0_i32_1 = arith.constant 0 : i32
    return %c0_i32, %c0_i32_0 : i32, i32
  }
  func.func @transform_5(%arg0: i32, %arg1: i32) -> (i32, i32) {
    %c0_i32 = arith.constant 0 : i32
    %c0_i32_0 = arith.constant 0 : i32
    %c0_i32_1 = arith.constant 0 : i32
    return %c0_i32, %c0_i32_0 : i32, i32
  }
  func.func @transform_6(%arg0: i32, %arg1: i32) -> (i32, i32, i32) {
    %c0_i32 = arith.constant 0 : i32
    %c0_i32_0 = arith.constant 0 : i32
    return %arg0, %arg1, %c0_i32 : i32, i32, i32
  }
}

module attributes {stable_mosaic.version = 11 : i64} {
  func.func @kernel(%arg0: i32, %arg1: i32, %arg2: memref<1x64x64xbf16, #tpu.memory_space<vmem>>, %arg3: memref<256x64xbf16, #tpu.memory_space<vmem>>, %arg4: memref<64x48xbf16, #tpu.memory_space<vmem>>, %arg5: memref<1x256x64xbf16, #tpu.memory_space<vmem>>, %arg6: memref<64x48xbf16, #tpu.memory_space<vmem>>, %arg7: memref<1x48xf32, #tpu.memory_space<vmem>>, %arg8: memref<1x256x48xbf16, #tpu.memory_space<vmem>>) attributes {dimension_semantics = [#tpu.dimension_semantics<parallel>, #tpu.dimension_semantics<parallel>], iteration_bounds = array<i64: 2, 1>, scalar_prefetch = 0 : i64, scratch_operands = 0 : i64, tpu.core_type = #tpu.core_type<tc>, window_params = [{transform_indices = @transform_0, window_bounds = array<i64: 1, 64, 64>}, {pipeline_mode = #tpu.pipeline_mode<synchronous>, transform_indices = @transform_1, window_bounds = array<i64: 256, 64>}, {pipeline_mode = #tpu.pipeline_mode<synchronous>, transform_indices = @transform_2, window_bounds = array<i64: 64, 48>}, {transform_indices = @transform_3, window_bounds = array<i64: 1, 256, 64>}, {pipeline_mode = #tpu.pipeline_mode<synchronous>, transform_indices = @transform_4, window_bounds = array<i64: 64, 48>}, {pipeline_mode = #tpu.pipeline_mode<synchronous>, transform_indices = @transform_5, window_bounds = array<i64: 1, 48>}, {transform_indices = @transform_6, window_bounds = array<i64: 1, 256, 48>}]} {
    %c0 = arith.constant 0 : index
    %c0_0 = arith.constant 0 : index
    %0 = vector.load %arg7[%c0, %c0_0] : memref<1x48xf32, #tpu.memory_space<vmem>>, vector<1x48xf32>
    %c0_1 = arith.constant 0 : index
    %c0_2 = arith.constant 0 : index
    %c0_3 = arith.constant 0 : index
    %1 = vector.load %arg5[%c0_1, %c0_2, %c0_3] : memref<1x256x64xbf16, #tpu.memory_space<vmem>>, vector<1x256x64xbf16>
    %2 = vector.shape_cast %1 : vector<1x256x64xbf16> to vector<256x64xbf16>
    %c0_4 = arith.constant 0 : index
    %c0_5 = arith.constant 0 : index
    %3 = vector.load %arg6[%c0_4, %c0_5] : memref<64x48xbf16, #tpu.memory_space<vmem>>, vector<64x48xbf16>
    %cst = arith.constant dense<0.000000e+00> : vector<256x48xf32>
    %4 = tpu.matmul %2, %3, %cst {dimension_numbers = #tpu.dot_dimension_numbers<[1], [0], [0], [1], [0, 0, 1, 1], [], []>} : vector<256x64xbf16>, vector<64x48xbf16>, vector<256x48xf32> -> vector<256x48xf32>
    %5 = vector.broadcast %0 : vector<1x48xf32> to vector<256x48xf32>
    %6 = arith.addf %5, %4 : vector<256x48xf32>
    %c0_6 = arith.constant 0 : index
    %c0_7 = arith.constant 0 : index
    %c0_8 = arith.constant 0 : index
    %7 = vector.load %arg2[%c0_6, %c0_7, %c0_8] : memref<1x64x64xbf16, #tpu.memory_space<vmem>>, vector<1x64x64xbf16>
    %8 = vector.shape_cast %7 : vector<1x64x64xbf16> to vector<64x64xbf16>
    %c0_9 = arith.constant 0 : index
    %c0_10 = arith.constant 0 : index
    %9 = vector.load %arg4[%c0_9, %c0_10] : memref<64x48xbf16, #tpu.memory_space<vmem>>, vector<64x48xbf16>
    %cst_11 = arith.constant dense<0.000000e+00> : vector<64x48xf32>
    %10 = tpu.matmul %8, %9, %cst_11 {dimension_numbers = #tpu.dot_dimension_numbers<[1], [0], [0], [1], [0, 0, 1, 1], [], []>} : vector<64x64xbf16>, vector<64x48xbf16>, vector<64x48xf32> -> vector<64x48xf32>
    %c0_12 = arith.constant 0 : index
    %c0_13 = arith.constant 0 : index
    %11 = vector.load %arg3[%c0_12, %c0_13] : memref<256x64xbf16, #tpu.memory_space<vmem>>, vector<256x64xbf16>
    %12 = arith.truncf %10 : vector<64x48xf32> to vector<64x48xbf16>
    %cst_14 = arith.constant dense<0.000000e+00> : vector<256x48xf32>
    %13 = tpu.matmul %11, %12, %cst_14 {dimension_numbers = #tpu.dot_dimension_numbers<[1], [0], [0], [1], [0, 0, 1, 1], [], []>} : vector<256x64xbf16>, vector<64x48xbf16>, vector<256x48xf32> -> vector<256x48xf32>
    %14 = arith.addf %6, %13 : vector<256x48xf32>
    %cst_15 = arith.constant 0.000000e+00 : f32
    %15 = vector.broadcast %cst_15 : f32 to vector<256x48xf32>
    %16 = arith.maximumf %14, %15 : vector<256x48xf32>
    %17 = arith.truncf %16 : vector<256x48xf32> to vector<256x48xbf16>
    %c0_16 = arith.constant 0 : index
    %c0_17 = arith.constant 0 : index
    %c0_18 = arith.constant 0 : index
    %18 = vector.load %arg8[%c0_16, %c0_17, %c0_18] : memref<1x256x48xbf16, #tpu.memory_space<vmem>>, vector<1x256x48xbf16>
    %19 = vector.shape_cast %18 : vector<1x256x48xbf16> to vector<256x48xbf16>
    %20 = vector.shape_cast %17 : vector<256x48xbf16> to vector<1x256x48xbf16>
    tpu.vector_store %arg8[%c0_16, %c0_17, %c0_18], %20 {strides = array<i32>} : memref<1x256x48xbf16, #tpu.memory_space<vmem>>, vector<1x256x48xbf16>,
    return
  }
  func.func @transform_0(%arg0: i32, %arg1: i32) -> (i32, i32, i32) {
    %c0_i32 = arith.constant 0 : i32
    %c0_i32_0 = arith.constant 0 : i32
    return %arg0, %arg1, %c0_i32 : i32, i32, i32
  }
  func.func @transform_1(%arg0: i32, %arg1: i32) -> (i32, i32) {
    %c0_i32 = arith.constant 0 : i32
    %c0_i32_0 = arith.constant 0 : i32
    %c0_i32_1 = arith.constant 0 : i32
    return %c0_i32, %c0_i32_0 : i32, i32
  }
  func.func @transform_2(%arg0: i32, %arg1: i32) -> (i32, i32) {
    %c0_i32 = arith.constant 0 : i32
    %c0_i32_0 = arith.constant 0 : i32
    %c0_i32_1 = arith.constant 0 : i32
    return %c0_i32, %c0_i32_0 : i32, i32
  }
  func.func @transform_3(%arg0: i32, %arg1: i32) -> (i32, i32, i32) {
    %c0_i32 = arith.constant 0 : i32
    %c0_i32_0 = arith.constant 0 : i32
    return %arg0, %arg1, %c0_i32 : i32, i32, i32
  }
  func.func @transform_4(%arg0: i32, %arg1: i32) -> (i32, i32) {
    %c0_i32 = arith.constant 0 : i32
    %c0_i32_0 = arith.constant 0 : i32
    %c0_i32_1 = arith.constant 0 : i32
    return %c0_i32, %c0_i32_0 : i32, i32
  }
  func.func @transform_5(%arg0: i32, %arg1: i32) -> (i32, i32) {
    %c0_i32 = arith.constant 0 : i32
    %c0_i32_0 = arith.constant 0 : i32
    %c0_i32_1 = arith.constant 0 : i32
    return %c0_i32, %c0_i32_0 : i32, i32
  }
  func.func @transform_6(%arg0: i32, %arg1: i32) -> (i32, i32, i32) {
    %c0_i32 = arith.constant 0 : i32
    %c0_i32_0 = arith.constant 0 : i32
    return %arg0, %arg1, %c0_i32 : i32, i32, i32
  }
}

module attributes {stable_mosaic.version = 11 : i64} {
  func.func @kernel(%arg0: i32, %arg1: i32, %arg2: memref<1x256x48xbf16, #tpu.memory_space<vmem>>, %arg3: memref<1024x256xbf16, #tpu.memory_space<vmem>>, %arg4: memref<48x48xbf16, #tpu.memory_space<vmem>>, %arg5: memref<1x1024x64xbf16, #tpu.memory_space<vmem>>, %arg6: memref<64x48xbf16, #tpu.memory_space<vmem>>, %arg7: memref<1x48xf32, #tpu.memory_space<vmem>>, %arg8: memref<48x2xbf16, #tpu.memory_space<vmem>>, %arg9: memref<1x2xf32, #tpu.memory_space<vmem>>, %arg10: memref<1x1024x2xf32, #tpu.memory_space<vmem>>) attributes {dimension_semantics = [#tpu.dimension_semantics<parallel>, #tpu.dimension_semantics<parallel>], iteration_bounds = array<i64: 2, 1>, scalar_prefetch = 0 : i64, scratch_operands = 0 : i64, tpu.core_type = #tpu.core_type<tc>, window_params = [{transform_indices = @transform_0, window_bounds = array<i64: 1, 256, 48>}, {pipeline_mode = #tpu.pipeline_mode<synchronous>, transform_indices = @transform_1, window_bounds = array<i64: 1024, 256>}, {pipeline_mode = #tpu.pipeline_mode<synchronous>, transform_indices = @transform_2, window_bounds = array<i64: 48, 48>}, {transform_indices = @transform_3, window_bounds = array<i64: 1, 1024, 64>}, {pipeline_mode = #tpu.pipeline_mode<synchronous>, transform_indices = @transform_4, window_bounds = array<i64: 64, 48>}, {pipeline_mode = #tpu.pipeline_mode<synchronous>, transform_indices = @transform_5, window_bounds = array<i64: 1, 48>}, {pipeline_mode = #tpu.pipeline_mode<synchronous>, transform_indices = @transform_6, window_bounds = array<i64: 48, 2>}, {pipeline_mode = #tpu.pipeline_mode<synchronous>, transform_indices = @transform_7, window_bounds = array<i64: 1, 2>}, {transform_indices = @transform_8, window_bounds = array<i64: 1, 1024, 2>}]} {
    %c0 = arith.constant 0 : index
    %c0_0 = arith.constant 0 : index
    %0 = vector.load %arg7[%c0, %c0_0] : memref<1x48xf32, #tpu.memory_space<vmem>>, vector<1x48xf32>
    %c0_1 = arith.constant 0 : index
    %c0_2 = arith.constant 0 : index
    %c0_3 = arith.constant 0 : index
    %1 = vector.load %arg5[%c0_1, %c0_2, %c0_3] : memref<1x1024x64xbf16, #tpu.memory_space<vmem>>, vector<1x1024x64xbf16>
    %2 = vector.shape_cast %1 : vector<1x1024x64xbf16> to vector<1024x64xbf16>
    %c0_4 = arith.constant 0 : index
    %c0_5 = arith.constant 0 : index
    %3 = vector.load %arg6[%c0_4, %c0_5] : memref<64x48xbf16, #tpu.memory_space<vmem>>, vector<64x48xbf16>
    %cst = arith.constant dense<0.000000e+00> : vector<1024x48xf32>
    %4 = tpu.matmul %2, %3, %cst {dimension_numbers = #tpu.dot_dimension_numbers<[1], [0], [0], [1], [0, 0, 1, 1], [], []>} : vector<1024x64xbf16>, vector<64x48xbf16>, vector<1024x48xf32> -> vector<1024x48xf32>
    %5 = vector.broadcast %0 : vector<1x48xf32> to vector<1024x48xf32>
    %6 = arith.addf %5, %4 : vector<1024x48xf32>
    %c0_6 = arith.constant 0 : index
    %c0_7 = arith.constant 0 : index
    %c0_8 = arith.constant 0 : index
    %7 = vector.load %arg2[%c0_6, %c0_7, %c0_8] : memref<1x256x48xbf16, #tpu.memory_space<vmem>>, vector<1x256x48xbf16>
    %8 = vector.shape_cast %7 : vector<1x256x48xbf16> to vector<256x48xbf16>
    %c0_9 = arith.constant 0 : index
    %c0_10 = arith.constant 0 : index
    %9 = vector.load %arg4[%c0_9, %c0_10] : memref<48x48xbf16, #tpu.memory_space<vmem>>, vector<48x48xbf16>
    %cst_11 = arith.constant dense<0.000000e+00> : vector<256x48xf32>
    %10 = tpu.matmul %8, %9, %cst_11 {dimension_numbers = #tpu.dot_dimension_numbers<[1], [0], [0], [1], [0, 0, 1, 1], [], []>} : vector<256x48xbf16>, vector<48x48xbf16>, vector<256x48xf32> -> vector<256x48xf32>
    %c0_12 = arith.constant 0 : index
    %c0_13 = arith.constant 0 : index
    %11 = vector.load %arg3[%c0_12, %c0_13] : memref<1024x256xbf16, #tpu.memory_space<vmem>>, vector<1024x256xbf16>
    %12 = arith.truncf %10 : vector<256x48xf32> to vector<256x48xbf16>
    %cst_14 = arith.constant dense<0.000000e+00> : vector<1024x48xf32>
    %13 = tpu.matmul %11, %12, %cst_14 {dimension_numbers = #tpu.dot_dimension_numbers<[1], [0], [0], [1], [0, 0, 1, 1], [], []>} : vector<1024x256xbf16>, vector<256x48xbf16>, vector<1024x48xf32> -> vector<1024x48xf32>
    %14 = arith.addf %6, %13 : vector<1024x48xf32>
    %cst_15 = arith.constant 0.000000e+00 : f32
    %15 = vector.broadcast %cst_15 : f32 to vector<1024x48xf32>
    %16 = arith.maximumf %14, %15 : vector<1024x48xf32>
    %17 = arith.truncf %16 : vector<1024x48xf32> to vector<1024x48xbf16>
    %c0_16 = arith.constant 0 : index
    %c0_17 = arith.constant 0 : index
    %18 = vector.load %arg8[%c0_16, %c0_17] : memref<48x2xbf16, #tpu.memory_space<vmem>>, vector<48x2xbf16>
    %cst_18 = arith.constant dense<0.000000e+00> : vector<1024x2xf32>
    %19 = tpu.matmul %17, %18, %cst_18 {dimension_numbers = #tpu.dot_dimension_numbers<[1], [0], [0], [1], [0, 0, 1, 1], [], []>} : vector<1024x48xbf16>, vector<48x2xbf16>, vector<1024x2xf32> -> vector<1024x2xf32>
    %c0_19 = arith.constant 0 : index
    %c0_20 = arith.constant 0 : index
    %20 = vector.load %arg9[%c0_19, %c0_20] : memref<1x2xf32, #tpu.memory_space<vmem>>, vector<1x2xf32>
    %21 = vector.broadcast %20 : vector<1x2xf32> to vector<1024x2xf32>
    %22 = arith.addf %19, %21 : vector<1024x2xf32>
    %c0_21 = arith.constant 0 : index
    %c0_22 = arith.constant 0 : index
    %c0_23 = arith.constant 0 : index
    %23 = vector.load %arg10[%c0_21, %c0_22, %c0_23] : memref<1x1024x2xf32, #tpu.memory_space<vmem>>, vector<1x1024x2xf32>
    %24 = vector.shape_cast %23 : vector<1x1024x2xf32> to vector<1024x2xf32>
    %25 = vector.shape_cast %22 : vector<1024x2xf32> to vector<1x1024x2xf32>
    tpu.vector_store %arg10[%c0_21, %c0_22, %c0_23], %25 {strides = array<i32>} : memref<1x1024x2xf32, #tpu.memory_space<vmem>>, vector<1x1024x2xf32>,
    return
  }
  func.func @transform_0(%arg0: i32, %arg1: i32) -> (i32, i32, i32) {
    %c0_i32 = arith.constant 0 : i32
    %c0_i32_0 = arith.constant 0 : i32
    return %arg0, %arg1, %c0_i32 : i32, i32, i32
  }
  func.func @transform_1(%arg0: i32, %arg1: i32) -> (i32, i32) {
    %c0_i32 = arith.constant 0 : i32
    %c0_i32_0 = arith.constant 0 : i32
    %c0_i32_1 = arith.constant 0 : i32
    return %c0_i32, %c0_i32_0 : i32, i32
  }
  func.func @transform_2(%arg0: i32, %arg1: i32) -> (i32, i32) {
    %c0_i32 = arith.constant 0 : i32
    %c0_i32_0 = arith.constant 0 : i32
    %c0_i32_1 = arith.constant 0 : i32
    return %c0_i32, %c0_i32_0 : i32, i32
  }
  func.func @transform_3(%arg0: i32, %arg1: i32) -> (i32, i32, i32) {
    %c0_i32 = arith.constant 0 : i32
    %c0_i32_0 = arith.constant 0 : i32
    return %arg0, %arg1, %c0_i32 : i32, i32, i32
  }
  func.func @transform_4(%arg0: i32, %arg1: i32) -> (i32, i32) {
    %c0_i32 = arith.constant 0 : i32
    %c0_i32_0 = arith.constant 0 : i32
    %c0_i32_1 = arith.constant 0 : i32
    return %c0_i32, %c0_i32_0 : i32, i32
  }
  func.func @transform_5(%arg0: i32, %arg1: i32) -> (i32, i32) {
    %c0_i32 = arith.constant 0 : i32
    %c0_i32_0 = arith.constant 0 : i32
    %c0_i32_1 = arith.constant 0 : i32
    return %c0_i32, %c0_i32_0 : i32, i32
  }
  func.func @transform_6(%arg0: i32, %arg1: i32) -> (i32, i32) {
    %c0_i32 = arith.constant 0 : i32
    %c0_i32_0 = arith.constant 0 : i32
    %c0_i32_1 = arith.constant 0 : i32
    return %c0_i32, %c0_i32_0 : i32, i32
  }
  func.func @transform_7(%arg0: i32, %arg1: i32) -> (i32, i32) {
    %c0_i32 = arith.constant 0 : i32
    %c0_i32_0 = arith.constant 0 : i32
    %c0_i32_1 = arith.constant 0 : i32
    return %c0_i32, %c0_i32_0 : i32, i32
  }
  func.func @transform_8(%arg0: i32, %arg1: i32) -> (i32, i32, i32) {
    %c0_i32 = arith.constant 0 : i32
    %c0_i32_0 = arith.constant 0 : i32
    return %arg0, %arg1, %c0_i32 : i32, i32, i32
  }
}

</mosaic_0001>

<bundles_post_ra>
// kernel: memseg_forward.7
= control target key start
LH: loop header
LB: loop body
LE: loop exit
PB: predicated region body
PF: predicated region fallthrough
CT: control target
= control target key end

     0   :  { %s1156_s21 = smov 0   ;;  %s1158_s22 = smov 0   ;;  %s1294_s0 = inlined_call_operand.vmem [shape: bf16[2,16,128], index: 0, kind: input, shape index: {}]   ;;  %s1295_s1 = inlined_call_operand.vmem [shape: bf16[64,16], index: 1, kind: input, shape index: {}]   ;;  %s1296_s2 = inlined_call_operand.vmem [shape: bf16[128,64], index: 2, kind: input, shape index: {}]   ;;  %s1297_s3 = inlined_call_operand.vmem [shape: bf16[2,64,128], index: 3, kind: input, shape index: {}]   ;;  %s1298_s4 = inlined_call_operand.vmem [shape: bf16[128,64], index: 4, kind: input, shape index: {}]   ;;  %s1299_s5 = inlined_call_operand.vmem [shape: f32[1,64], index: 5, kind: input, shape index: {}]   ;;  %s1300_s6 = inlined_call_operand.vmem [shape: bf16[2,64,64], index: 6, kind: output, shape index: {}]  }
   0x1   :  { %s1160_s23 = smov 0  }
   0x2 LB: > { %s28_s24 = sadd.s32 1, %s1113_s22  ;;  %p890_p0 = scmp.ge.s32.totalorder %s1117_s23, 1  ;;  %s1117_s23 = sphi %s1160_s23, %s16_s23   ;;  %s1113_s22 = sphi %s1158_s22, %s1302_s22   ;;  %s1109_s21 = sphi %s1156_s21, %s1301_s21  }
   0x3   : > { %p30_p1 = scmp.ge.s32.totalorder %s28_s24, 2  ;;  %p250_p2 = scmp.lt.s32.totalorder %s1117_s23, 3 }
   0x5   : > { %s1304_s24 = smov (%p30_p1, %s28_s24), 0  ;;  %p251_p3 = pnand %p890_p0, %p250_p2 }
   0x6   : > { %v1070_v0 = vld [vmem:[%s1296_s2] sm:$0xff] (!%p251_p3)   ;;  %v1119_v1 = vmov (!%p251_p3), 0.0   ;;  %v1071_v2 = vld [vmem:[%s1296_s2 + $0x8] sm:$0xff] (!%p251_p3)   ;;  %vm1120_vm0 = vmmov (!%p251_p3), 0   ;;  %p298_p4 = scmp.lt.s32.totalorder (!%p251_p3), %s1109_s21, 1  ;;  %v1072_v3 = vld [vmem:[%s1296_s2 + $0x10] sm:$0xff] (!%p251_p3)  }
   0x7   : > { %254 = sbr.rel (%p251_p3) target bundleno = 489 (0x1e9), region = 44  ;;  %998 = vmatprep.subr.bf16.mxu1 (!%p251_p3), %v1119_v1  ;;  %1014 = vmatprep.mubr.msk.bf16.mxu1 (!%p251_p3), %vm1120_vm0, %v1119_v1  ;;  %v1073_v4 = vld [vmem:[%s1296_s2 + $0x18] sm:$0xff] (!%p251_p3)   ;;  %v1079_v5 = vld [vmem:[%s1298_s4] sm:$0xff] (!%p251_p3)   ;;  %v1080_v6 = vld [vmem:[%s1298_s4 + $0x8] sm:$0xff] (!%p251_p3)   ;;  %vm646_vm1 = vcmask (!%p251_p3), 130048   ;;  %vm772_vm2 = vcmask (!%p251_p3), 519168  }
   0x8   : > { %999 = vmatpush3.bf16.msra.mxu1 (!%p251_p3), %v1070_v0  ;;  %974 = vmatprep.subr.bf16.mxu0 (!%p251_p3), %v1079_v5  ;;  %v1081_v7 = vld [vmem:[%s1298_s4 + $0x10] sm:$0xff] (!%p251_p3)   ;;  %v1074_v8 = vld [vmem:[%s1296_s2 + $0x20] sm:$0xff] (!%p251_p3)   ;;  %v1082_v9 = vld [vmem:[%s1298_s4 + $0x18] sm:$0xff] (!%p251_p3)  }
   0x9   : > { %1000 = vmatprep.subr.bf16.mxu1 (!%p251_p3), %v1119_v1  ;;  %975 = vmatpush3.bf16.msra.mxu0 (!%p251_p3), %v1079_v5  ;;  %v1075_v10 = vld [vmem:[%s1296_s2 + $0x28] sm:$0xff] (!%p251_p3)   ;;  %v1083_v11 = vld [vmem:[%s1298_s4 + $0x20] sm:$0xff] (!%p251_p3)   ;;  %v1076_v12 = vld [vmem:[%s1296_s2 + $0x30] sm:$0xff] (!%p251_p3)  }
   0xa   : > { %976 = vmatprep.subr.bf16.mxu0 (!%p251_p3), %v1080_v6  ;;  %v1084_v13 = vld [vmem:[%s1298_s4 + $0x28] sm:$0xff] (!%p251_p3)   ;;  %v1077_v14 = vld [vmem:[%s1296_s2 + $0x38] sm:$0xff] (!%p251_p3)   ;;  %v1085_v16 = vld [vmem:[%s1298_s4 + $0x30] sm:$0xff] (!%p251_p3)  }
   0xb   : > { %v1086_v17 = vld [vmem:[%s1298_s4 + $0x38] sm:$0xff] (!%p251_p3)   ;;  %v1089_v20 = vld [vmem:[%s1295_s1] sm:$0xff] (!%p251_p3)   ;;  %v1090_v28 = vld [vmem:[%s1295_s1 + $0x8] sm:$0xff] (!%p251_p3)  }
   0xc   : > { %1001 = vmatpush3.bf16.msra.mxu1 (!%p251_p3), %v1071_v2  ;;  %v1093_v29 = vld [vmem:[%s1295_s1 + $0x10] sm:$0xff] (!%p251_p3)   ;;  %v1094_v30 = vld [vmem:[%s1295_s1 + $0x18] sm:$0xff] (!%p251_p3)   ;;  %v909_v39 = vld [vmem:[%s1299_s5] ss:$0 sm:$0xff] (!%p251_p3) }
   0xd   : > { %1002 = vmatprep.subr.bf16.mxu1 (!%p251_p3), %v1119_v1  ;;  %977 = vmatpush3.bf16.msra.mxu0 (!%p251_p3), %v1080_v6 }
   0xe   : > { %s1306_s21 = smov (!%p298_p4, %s1109_s21), 1  ;;  %978 = vmatprep.subr.bf16.mxu0 %v1081_v7 }
   0xf   : > { %s937_s7 = sshll.u32 %s1306_s21, 3  ;;  %s938_s17 = sshll.u32 %s1306_s21, 5 }
  0x10   : > { %s1189_s10 = scalar_lea.vmem %s1294_s0, %s937_s7  ;;  %1003 = vmatpush3.bf16.msra.mxu1 %v1072_v3  ;;  %s1212_s28 = scalar_lea.vmem %s1297_s3, %s938_s17 }
  0x11   : > { %1004 = vmatprep.subr.bf16.mxu1 %v1119_v1  ;;  %979 = vmatpush3.bf16.msra.mxu0 %v1081_v7  ;;  %v1078_v15 = vld [vmem:[%s1189_s10] sm:$0xff]   ;;  %v1088_v19 = vld [vmem:[%s1212_s28 + $0x8] sm:$0xff]   ;;  %v1091_v21 = vld [vmem:[%s1212_s28 + $0x10] sm:$0xff]   ;;  %s1267_s15 = scalar_lea.vmem %s1300_s6, %s938_s17 }
  0x12   : > { %980 = vmatprep.subr.bf16.mxu0 %v1082_v9  ;;  %v1087_v18 = vld [vmem:[%s1212_s28] sm:$0xff]   ;;  %v1092_v22 = vld [vmem:[%s1212_s28 + $0x18] sm:$0xff]  }
  0x13   : > { %990 = vmatprep.mubr.bf16.mxu0 %v1087_v18 }
  0x14   : > { %1005 = vmatpush3.bf16.msra.mxu1 %v1073_v4 }
  0x15   : > { %1006 = vmatprep.subr.bf16.mxu1 %v1119_v1  ;;  %981 = vmatpush3.bf16.msra.mxu0 %v1082_v9 }
  0x16   : > { %982 = vmatprep.subr.bf16.mxu0 %v1083_v11 }
  0x18   : > { %1007 = vmatpush3.bf16.msra.mxu1 %v1074_v8 }
  0x19   : > { %1008 = vmatprep.subr.bf16.mxu1 %v1119_v1  ;;  %983 = vmatpush3.bf16.msra.mxu0 %v1083_v11 }
  0x1a   : > { %984 = vmatprep.subr.bf16.mxu0 %v1084_v13 }
  0x1c   : > { %1009 = vmatpush3.bf16.msra.mxu1 %v1075_v10 }
  0x1d   : > { %1010 = vmatprep.subr.bf16.mxu1 %v1119_v1  ;;  %985 = vmatpush3.bf16.msra.mxu0 %v1084_v13 }
  0x1e   : > { %986 = vmatprep.subr.bf16.mxu0 %v1085_v16 }
  0x20   : > { %1011 = vmatpush3.bf16.msra.mxu1 %v1076_v12 }
  0x21   : > { %1012 = vmatprep.subr.bf16.mxu1 %v1119_v1  ;;  %987 = vmatpush3.bf16.msra.mxu0 %v1085_v16 }
  0x22   : > { %988 = vmatprep.subr.bf16.mxu0 %v1086_v17 }
  0x24   : > { %1013 = vmatpush3.bf16.msra.mxu1 %v1077_v14 }
  0x25   : > { %989 = vmatpush3.bf16.msra.mxu0 %v1086_v17 }
  0x27   : > { %1015 = vmatmul.mubr.bf16.vlgmr.msra.gmra.mrb[0].mxu1 %v1078_v15 }
  0x28   : > { %991 = vmatmul.mubr.bf16.vlgmr.msra.gmra.mrb[0].mxu0 %v1088_v19  ;;  %1020 = vmatprep.mubr.msk.bf16.mxu1 %vm646_vm1, %v1089_v20 }
  0x29   : > { %994 = vmatprep.mubr.bf16.mxu0 %v1091_v21 }
  0x30   : > { %995 = vmatmul.mubr.bf16.gmra.mrb[4].mxu0 %v1092_v22 }
  0xfa   : > { %v610_v23 = vpop.f32.mrb[0].mxu1 }
  0xfb   : > { %v1016_v24 = vpop.f32.mrb[1].mxu1  ;;  %v992_v31 = vpop.f32.mrb[0].mxu0 }
  0xfc   : > { %v613_v25 = vpop.f32.mrb[2].mxu1  ;;  %v459_v32 = vpop.f32.mrb[1].mxu0  ;;  %v498_v40 = vadd.f32 %v992_v31, %v909_v39 }
  0xfd   : > { %v625_v26 = vpack.c.bf16 %v613_v25, %v610_v23  ;;  %v1017_v27 = vpop.f32.mrb[3].mxu1  ;;  %v993_v33 = vpop.f32.mrb[2].mxu0  ;;  %v496_v41 = vadd.f32 %v909_v39, %v459_v32 }
  0xfe   : > { %v462_v34 = vpop.f32.mrb[3].mxu0  ;;  %v499_v43 = vadd.f32 %v993_v33, %v909_v39 }
  0xff   : > { %1018 = vmatprep.subr.bf16.mxu1 %v625_v26  ;;  %v497_v46 = vadd.f32 %v909_v39, %v462_v34 }
 0x100   : > { %1019 = vmatpush3.bf16.msra.mxu1 %v625_v26 }
 0x103   : > { %1021 = vmatmul.mubr.msk.bf16.vlgmr.msra.gmra.mrb[4].mxu1 %vm646_vm1, %v1090_v28  ;;  %v996_v35 = vpop.f32.mrb[4].mxu0 }
 0x104   : > { %1024 = vmatprep.mubr.msk.bf16.mxu1 %vm646_vm1, %v1093_v29  ;;  %v475_v36 = vpop.f32.mrb[5].mxu0  ;;  %v502_v56 = vadd.f32 %v996_v35, %v909_v39 }
 0x105   : > { %v997_v37 = vpop.f32.mrb[6].mxu0  ;;  %v500_v59 = vadd.f32 %v909_v39, %v475_v36 }
 0x106   : > { %v478_v38 = vpop.f32.mrb[7].mxu0  ;;  %v503_v63 = vadd.f32 %v997_v37, %v909_v39 }
 0x107   : > { %v501_v2 = vadd.f32 %v909_v39, %v478_v38 }
 0x10b   : > { %1025 = vmatmul.mubr.msk.bf16.gmra.mrb[8].mxu1 %vm646_vm1, %v1094_v30 }
 0x1d6   : > { %v1022_v42 = vpop.f32.mrb[4].mxu1 }
 0x1d7   : > { %v726_v44 = vadd.f32 %v1022_v42, %v498_v40  ;;  %v693_v45 = vpop.f32.mrb[5].mxu1 }
 0x1d8   : > { %v724_v47 = vadd.f32 %v693_v45, %v496_v41  ;;  %v1023_v48 = vpop.f32.mrb[6].mxu1 }
 0x1d9   : > { %v734_v49 = vmax.f32 %v726_v44, 0.0  ;;  %v727_v50 = vadd.f32 %v1023_v48, %v499_v43  ;;  %v696_v51 = vpop.f32.mrb[7].mxu1 }
 0x1da   : > { %v732_v52 = vmax.f32 %v724_v47, 0.0  ;;  %v725_v53 = vadd.f32 %v696_v51, %v497_v46 }
 0x1db   : > { %v942_v54 = vpack.c.bf16 %v734_v49, %v734_v49  ;;  %v735_v55 = vmax.f32 %v727_v50, 0.0 }
 0x1dc   : > { %v940_v57 = vpack.c.bf16 %v732_v52, %v732_v52  ;;  %v733_v58 = vmax.f32 %v725_v53, 0.0 }
 0x1dd   : > { %775 = vst.msk [vmem:[%s1267_s15 + $0x8] sm:$0xf] %vm772_vm2, %v942_v54  ;;  %v943_v60 = vpack.c.bf16 %v735_v55, %v735_v55 }
 0x1de   : > { %773 = vst.msk [vmem:[%s1267_s15] sm:$0xf] %vm772_vm2, %v940_v57  ;;  %v941_v61 = vpack.c.bf16 %v733_v58, %v733_v58  ;;  %v1026_v62 = vpop.f32.mrb[8].mxu1 }
 0x1df   : > { %776 = vst.msk [vmem:[%s1267_s15 + $0xc] sm:$0xf] %vm772_vm2, %v943_v60  ;;  %v730_v0 = vadd.f32 %v1026_v62, %v502_v56  ;;  %v709_v1 = vpop.f32.mrb[9].mxu1 }
 0x1e0   : > { %774 = vst.msk [vmem:[%s1267_s15 + $0x4] sm:$0xf] %vm772_vm2, %v941_v61  ;;  %v728_v3 = vadd.f32 %v709_v1, %v500_v59  ;;  %v1027_v4 = vpop.f32.mrb[10].mxu1 }
 0x1e1   : > { %v738_v5 = vmax.f32 %v730_v0, 0.0  ;;  %v731_v6 = vadd.f32 %v1027_v4, %v503_v63  ;;  %v712_v7 = vpop.f32.mrb[11].mxu1 }
 0x1e2   : > { %v736_v8 = vmax.f32 %v728_v3, 0.0  ;;  %v729_v9 = vadd.f32 %v712_v7, %v501_v2 }
 0x1e3   : > { %v946_v10 = vpack.c.bf16 %v738_v5, %v738_v5  ;;  %v739_v11 = vmax.f32 %v731_v6, 0.0 }
 0x1e4   : > { %v944_v12 = vpack.c.bf16 %v736_v8, %v736_v8  ;;  %v737_v13 = vmax.f32 %v729_v9, 0.0 }
 0x1e5   : > { %779 = vst.msk [vmem:[%s1267_s15 + $0x18] sm:$0xf] %vm772_vm2, %v946_v10  ;;  %v947_v14 = vpack.c.bf16 %v739_v11, %v739_v11 }
 0x1e6   : > { %777 = vst.msk [vmem:[%s1267_s15 + $0x10] sm:$0xf] %vm772_vm2, %v944_v12  ;;  %v945_v15 = vpack.c.bf16 %v737_v13, %v737_v13 }
 0x1e7   : > { %780 = vst.msk [vmem:[%s1267_s15 + $0x1c] sm:$0xf] %vm772_vm2, %v947_v14 }
 0x1e8   : > { %778 = vst.msk [vmem:[%s1267_s15 + $0x14] sm:$0xf] %vm772_vm2, %v945_v15 }
 0x1e9 PF: > { %s16_s23 = sadd.s32 1, %s1117_s23   ;;  %s1301_s21 = smov %s1113_s22 }
 0x1ea   : > { %p13_p5 = scmp.ge.s32.totalorder %s16_s23, 4   ;;  %s1302_s22 = smov %s1304_s24 }
 0x1ec   :  { %15 = sbr.rel (!%p13_p5) target bundleno = 2 (0x2), region = 77 }

// kernel: memseg_forward.6
= control target key start
LH: loop header
LB: loop body
LE: loop exit
PB: predicated region body
PF: predicated region fallthrough
CT: control target
= control target key end

     0   :  { %s1119_s21 = smov 0   ;;  %s1121_s22 = smov 0   ;;  %s1262_s0 = inlined_call_operand.vmem [shape: bf16[2,4,256], index: 0, kind: input, shape index: {}]   ;;  %s1263_s1 = inlined_call_operand.vmem [shape: bf16[16,4], index: 1, kind: input, shape index: {}]   ;;  %s1264_s2 = inlined_call_operand.vmem [shape: bf16[256,128], index: 2, kind: input, shape index: {}]   ;;  %s1265_s3 = inlined_call_operand.vmem [shape: bf16[2,16,256], index: 3, kind: input, shape index: {}]   ;;  %s1266_s4 = inlined_call_operand.vmem [shape: bf16[256,128], index: 4, kind: input, shape index: {}]   ;;  %s1267_s5 = inlined_call_operand.vmem [shape: f32[1,128], index: 5, kind: input, shape index: {}]   ;;  %s1268_s6 = inlined_call_operand.vmem [shape: bf16[2,16,128], index: 6, kind: output, shape index: {}]  }
   0x1   :  { %s1123_s23 = smov 0  }
   0x2 LB: > { %s28_s24 = sadd.s32 1, %s1076_s22  ;;  %p885_p0 = scmp.ge.s32.totalorder %s1080_s23, 1  ;;  %s1080_s23 = sphi %s1123_s23, %s16_s23   ;;  %s1076_s22 = sphi %s1121_s22, %s1270_s22   ;;  %s1072_s21 = sphi %s1119_s21, %s1269_s21  }
   0x3   : > { %p30_p1 = scmp.ge.s32.totalorder %s28_s24, 2  ;;  %p250_p2 = scmp.lt.s32.totalorder %s1080_s23, 3 }
   0x5   : > { %s1272_s24 = smov (%p30_p1, %s28_s24), 0  ;;  %p251_p3 = pnand %p885_p0, %p250_p2 }
   0x6   : > { %v1022_v0 = vld [vmem:[%s1264_s2 + $0x40] sm:$0xff] (!%p251_p3)   ;;  %v1024_v2 = vld [vmem:[%s1264_s2 + $0x48] sm:$0xff] (!%p251_p3)   ;;  %p298_p4 = scmp.lt.s32.totalorder (!%p251_p3), %s1072_s21, 1  ;;  %v1026_v4 = vld [vmem:[%s1264_s2 + $0x50] sm:$0xff] (!%p251_p3)   ;;  %v1082_v36 = vmov (!%p251_p3), 0.0   ;;  %vm1083_vm0 = vmmov (!%p251_p3), 0  }
   0x7   : > { %254 = sbr.rel (%p251_p3) target bundleno = 481 (0x1e1), region = 44  ;;  %v1023_v1 = vld [vmem:[%s1264_s2] sm:$0xff] (!%p251_p3)   ;;  %966 = vmatprep.subr.bf16.mxu1 (!%p251_p3), %v1022_v0  ;;  %v1025_v3 = vld [vmem:[%s1264_s2 + $0x8] sm:$0xff] (!%p251_p3)   ;;  %v1027_v5 = vld [vmem:[%s1264_s2 + $0x10] sm:$0xff] (!%p251_p3)   ;;  %vm711_vm1 = vcmask (!%p251_p3), 1041408   ;;  %vm707_vm2 = vcmask (!%p251_p3), 31744  }
   0x8   : > { %967 = vmatpush3.bf16.msra.mxu1 (!%p251_p3), %v1023_v1  ;;  %v1028_v6 = vld [vmem:[%s1264_s2 + $0x58] sm:$0xff] (!%p251_p3)   ;;  %v1030_v8 = vld [vmem:[%s1264_s2 + $0x60] sm:$0xff] (!%p251_p3)   ;;  %v1032_v10 = vld [vmem:[%s1264_s2 + $0x68] sm:$0xff] (!%p251_p3)  }
   0x9   : > { %968 = vmatprep.subr.bf16.mxu1 (!%p251_p3), %v1024_v2  ;;  %v1029_v7 = vld [vmem:[%s1264_s2 + $0x18] sm:$0xff] (!%p251_p3)   ;;  %v1031_v9 = vld [vmem:[%s1264_s2 + $0x20] sm:$0xff] (!%p251_p3)   ;;  %v1033_v12 = vld [vmem:[%s1264_s2 + $0x28] sm:$0xff] (!%p251_p3)  }
   0xa   : > { %v1038_v14 = vld [vmem:[%s1266_s4 + $0x40] sm:$0xff] (!%p251_p3)   ;;  %v1040_v16 = vld [vmem:[%s1266_s4 + $0x48] sm:$0xff] (!%p251_p3)   ;;  %v1034_v17 = vld [vmem:[%s1264_s2 + $0x70] sm:$0xff] (!%p251_p3)  }
   0xb   : > { %v1039_v15 = vld [vmem:[%s1266_s4] sm:$0xff] (!%p251_p3)   ;;  %944 = vmatprep.subr.bf16.mxu0 (!%p251_p3), %v1038_v14  ;;  %v1041_v18 = vld [vmem:[%s1266_s4 + $0x8] sm:$0xff] (!%p251_p3)   ;;  %v1042_v19 = vld [vmem:[%s1266_s4 + $0x50] sm:$0xff] (!%p251_p3)  }
   0xc   : > { %969 = vmatpush3.bf16.msra.mxu1 (!%p251_p3), %v1025_v3  ;;  %945 = vmatpush3.bf16.msra.mxu0 (!%p251_p3), %v1039_v15  ;;  %v1035_v20 = vld [vmem:[%s1264_s2 + $0x30] sm:$0xff] (!%p251_p3)   ;;  %v1036_v21 = vld [vmem:[%s1264_s2 + $0x78] sm:$0xff] (!%p251_p3)   ;;  %v1046_v26 = vld [vmem:[%s1266_s4 + $0x60] sm:$0xff] (!%p251_p3)  }
   0xd   : > { %970 = vmatprep.subr.bf16.mxu1 (!%p251_p3), %v1026_v4  ;;  %946 = vmatprep.subr.bf16.mxu0 (!%p251_p3), %v1040_v16  ;;  %v1043_v22 = vld [vmem:[%s1266_s4 + $0x10] sm:$0xff] (!%p251_p3)   ;;  %v1044_v23 = vld [vmem:[%s1266_s4 + $0x58] sm:$0xff] (!%p251_p3)   ;;  %v1047_v27 = vld [vmem:[%s1266_s4 + $0x20] sm:$0xff] (!%p251_p3)  }
   0xe   : > { %s1274_s21 = smov (!%p298_p4, %s1072_s21), 1  ;;  %v1037_v24 = vld [vmem:[%s1264_s2 + $0x38] sm:$0xff]   ;;  %v1048_v28 = vld [vmem:[%s1266_s4 + $0x68] sm:$0xff]   ;;  %v1050_v30 = vld [vmem:[%s1266_s4 + $0x70] sm:$0xff]  }
   0xf   : > { %s934_s15 = sshll.u32 %s1274_s21, 2  ;;  %v1045_v25 = vld [vmem:[%s1266_s4 + $0x18] sm:$0xff]   ;;  %v1049_v29 = vld [vmem:[%s1266_s4 + $0x28] sm:$0xff]   ;;  %v1051_v31 = vld [vmem:[%s1266_s4 + $0x30] sm:$0xff]   ;;  %s935_s9 = sshll.u32 %s1274_s21, 4 }
  0x10   : > { %971 = vmatpush3.bf16.msra.mxu1 %v1027_v5  ;;  %s306_s26 = scalar_lea.vmem %s1262_s0, %s934_s15  ;;  %947 = vmatpush3.bf16.msra.mxu0 %v1041_v18  ;;  %v1052_v32 = vld [vmem:[%s1266_s4 + $0x78] sm:$0xff]   ;;  %s316_s12 = scalar_lea.vmem %s1265_s3, %s935_s9  ;;  %v1057_v44 = vld [vmem:[%s1263_s1] sm:$0xff]  }
  0x11   : > { %972 = vmatprep.subr.bf16.mxu1 %v1028_v6  ;;  %v911_v11 = vld.sshfl [vmem:[%s306_s26] sm:$0x33 pattern:$0x76325410]  ;;  %948 = vmatprep.subr.bf16.mxu0 %v1042_v19  ;;  %v1053_v33 = vld [vmem:[%s1266_s4 + $0x38] sm:$0xff]   ;;  %s936_s17 = sshll.u32 %s1274_s21, 3 }
  0x12   : > { %v560_v13 = vcombine.high %v911_v11, %v911_v11  ;;  %v1056_v34 = vld [vmem:[%s316_s12 + $0x4] ss:$8 sps:$4 sm:$0xff]   ;;  %v1054_v35 = vld [vmem:[%s316_s12] ss:$8 sps:$4 sm:$0xff]   ;;  %s326_s20 = scalar_lea.vmem %s1268_s6, %s936_s17 }
  0x13   : > { %502 = vmatprep.mubr.bf16.mxu0 %v1056_v34  ;;  %v910_v51 = vld [vmem:[%s1267_s5] ss:$0 sm:$0xff] }
  0x14   : > { %973 = vmatpush3.bf16.msra.mxu1 %v1029_v7  ;;  %691 = vmatprep.mubr.bf16.mxu1 %v560_v13 }
  0x15   : > { %974 = vmatprep.subr.bf16.mxu1 %v1030_v8  ;;  %949 = vmatpush3.bf16.msra.mxu0 %v1043_v22 }
  0x16   : > { %950 = vmatprep.subr.bf16.mxu0 %v1044_v23 }
  0x18   : > { %975 = vmatpush3.bf16.msra.mxu1 %v1031_v9 }
  0x19   : > { %976 = vmatprep.subr.bf16.mxu1 %v1032_v10  ;;  %951 = vmatpush3.bf16.msra.mxu0 %v1045_v25 }
  0x1a   : > { %952 = vmatprep.subr.bf16.mxu0 %v1046_v26 }
  0x1c   : > { %977 = vmatpush3.bf16.msra.mxu1 %v1033_v12 }
  0x1d   : > { %978 = vmatprep.subr.bf16.mxu1 %v1034_v17  ;;  %953 = vmatpush3.bf16.msra.mxu0 %v1047_v27 }
  0x1e   : > { %954 = vmatprep.subr.bf16.mxu0 %v1048_v28 }
  0x20   : > { %979 = vmatpush3.bf16.msra.mxu1 %v1035_v20 }
  0x21   : > { %980 = vmatprep.subr.bf16.mxu1 %v1036_v21  ;;  %955 = vmatpush3.bf16.msra.mxu0 %v1049_v29 }
  0x22   : > { %956 = vmatprep.subr.bf16.mxu0 %v1050_v30 }
  0x24   : > { %981 = vmatpush3.bf16.msra.mxu1 %v1037_v24 }
  0x25   : > { %957 = vmatpush3.bf16.msra.mxu0 %v1051_v31 }
  0x26   : > { %958 = vmatprep.subr.bf16.mxu0 %v1052_v32 }
  0x27   : > { %692 = vmatmul.mubr.bf16.vlgmr.msra.gmra.mrb[0].mxu1 %v911_v11 }
  0x29   : > { %959 = vmatpush3.bf16.msra.mxu0 %v1053_v33 }
  0x2a   : > { %990 = vmatprep.subr.bf16.mxu0 %v1082_v36 }
  0x2c   : > { %503 = vmatmul.mubr.bf16.vlgmr.msra.gmra.mrb[0].mxu0 %v1054_v35 }
  0x2d   : > { %992 = vmatprep.mubr.msk.bf16.mxu0 %vm1083_vm0, %v1082_v36 }
  0xfa   : > { %v982_v37 = vpop.f32.mrb[0].mxu1 }
  0xfb   : > { %v983_v38 = vpop.f32.mrb[1].mxu1 }
  0xfc   : > { %v984_v39 = vadd.f32 %v983_v38, %v982_v37  ;;  %v985_v40 = vpop.f32.mrb[2].mxu1 }
  0xfd   : > { %v986_v41 = vpop.f32.mrb[3].mxu1 }
  0xfe   : > { %v701_v42 = vpack.c.bf16 %v984_v39, %v984_v39 }
  0xff   : > { %v960_v45 = vpop.f32.mrb[0].mxu0 }
 0x100   : > { %v713_v43 = vsel %vm711_vm1, %v701_v42, 0  ;;  %v961_v46 = vpop.f32.mrb[1].mxu0 }
 0x101   : > { %991 = vmatpush3.bf16.msra.mxu0 %v713_v43  ;;  %v962_v47 = vadd.f32 %v961_v46, %v960_v45  ;;  %v963_v48 = vpop.f32.mrb[2].mxu0 }
 0x102   : > { %v964_v49 = vpop.f32.mrb[3].mxu0 }
 0x103   : > { %v965_v50 = vadd.f32 %v964_v49, %v963_v48  ;;  %v517_v52 = vadd.f32 %v962_v47, %v910_v51 }
 0x104   : > { %993 = vmatmul.mubr.msk.bf16.vlgmr.msra.gmra.mrb[4].mxu0 %vm707_vm2, %v1057_v44 }
 0x105   : > { %v518_v56 = vadd.f32 %v965_v50, %v910_v51 }
 0x1d7   : > { %v749_v53 = vpop.f32.mrb[4].mxu0 }
 0x1d8   : > { %v756_v54 = vadd.f32 %v749_v53, %v517_v52  ;;  %v994_v55 = vpop.f32.mrb[5].mxu0 }
 0x1d9   : > { %v752_v57 = vpop.f32.mrb[6].mxu0 }
 0x1da   : > { %v757_v58 = vadd.f32 %v752_v57, %v518_v56  ;;  %v995_v59 = vpop.f32.mrb[7].mxu0  ;;  %v758_v60 = vmax.f32 %v756_v54, 0.0 }
 0x1dc   : > { %v759_v61 = vmax.f32 %v757_v58, 0.0 }
 0x1de   : > { %v942_v62 = vpack.c.bf16 %v759_v61, %v758_v60 }
 0x1e0   : > { %943 = vst [vmem:[%s326_s20] sm:$0xff] %v942_v62  }
 0x1e1 PF: > { %s16_s23 = sadd.s32 1, %s1080_s23   ;;  %s1269_s21 = smov %s1076_s22 }
 0x1e2   : > { %p13_p5 = scmp.ge.s32.totalorder %s16_s23, 4   ;;  %s1270_s22 = smov %s1272_s24 }
 0x1e4   :  { %15 = sbr.rel (!%p13_p5) target bundleno = 2 (0x2), region = 77 }

// kernel: memseg_forward.5
= control target key start
LH: loop header
LB: loop body
LE: loop exit
PB: predicated region body
PF: predicated region fallthrough
CT: control target
= control target key end

     0   :  { %s1064_s12 = smov 0   ;;  %s1066_s13 = smov 0   ;;  %s1305_s0 = inlined_call_operand.vmem [shape: bf16[2,4,512], index: 0, kind: input, shape index: {}]   ;;  %s1306_s1 = inlined_call_operand.vmem [shape: bf16[512,256], index: 1, kind: input, shape index: {}]   ;;  %s1307_s2 = inlined_call_operand.vmem [shape: f32[1,256], index: 2, kind: input, shape index: {}]   ;;  %s1308_s3 = inlined_call_operand.vmem [shape: bf16[2,4,256], index: 3, kind: output, shape index: {}]  }
   0x1   :  { %s1068_s14 = smov 0  }
   0x2 LB: > { %s25_s15 = sadd.s32 1, %s1037_s13  ;;  %p822_p0 = scmp.ge.s32.totalorder %s1041_s14, 1  ;;  %s1041_s14 = sphi %s1068_s14, %s13_s14   ;;  %s1037_s13 = sphi %s1066_s13, %s1310_s13   ;;  %s1033_s12 = sphi %s1064_s12, %s1309_s12  }
   0x3   : > { %p27_p1 = scmp.ge.s32.totalorder %s25_s15, 2  ;;  %p157_p2 = scmp.lt.s32.totalorder %s1041_s14, 3 }
   0x5   : > { %s1312_s15 = smov (%p27_p1, %s25_s15), 0  ;;  %p158_p3 = pnand %p822_p0, %p157_p2 }
   0x6   : > { %v922_v0 = vld [vmem:[%s1306_s1 + $0x4] ss:$8 sps:$4 sm:$0xff] (!%p158_p3)   ;;  %v926_v2 = vld [vmem:[%s1306_s1] ss:$8 sps:$4 sm:$0xff] (!%p158_p3)   ;;  %v928_v4 = vld [vmem:[%s1306_s1 + $0x14] ss:$8 sps:$4 sm:$0xff] (!%p158_p3)   ;;  %v278_v38 = vlaneseq (!%p158_p3) }
   0x7   : > { %161 = sbr.rel (%p158_p3) target bundleno = 294 (0x126), region = 32  ;;  %v924_v1 = vld [vmem:[%s1306_s1 + $0x104] ss:$8 sps:$4 sm:$0xff] (!%p158_p3)   ;;  %615 = vmatprep.subr.bf16.mxu0 (!%p158_p3), %v922_v0  ;;  %v927_v3 = vld [vmem:[%s1306_s1 + $0x100] ss:$8 sps:$4 sm:$0xff] (!%p158_p3)   ;;  %p189_p4 = scmp.lt.s32.totalorder (!%p158_p3), %s1033_s12, 1 }
   0x8   : > { %656 = vmatprep.subr.bf16.mxu1 (!%p158_p3), %v924_v1  ;;  %616 = vmatpush1.bf16.msra.mxu0 (!%p158_p3), %v926_v2  ;;  %v930_v5 = vld [vmem:[%s1306_s1 + $0x114] ss:$8 sps:$4 sm:$0xff] (!%p158_p3)   ;;  %v932_v6 = vld [vmem:[%s1306_s1 + $0x10] ss:$8 sps:$4 sm:$0xff] (!%p158_p3)   ;;  %v934_v8 = vld [vmem:[%s1306_s1 + $0x24] ss:$8 sps:$4 sm:$0xff] (!%p158_p3)  }
   0x9   : > { %657 = vmatpush1.bf16.msra.mxu1 (!%p158_p3), %v927_v3  ;;  %617 = vmatprep.subr.bf16.mxu0 (!%p158_p3), %v928_v4  ;;  %v933_v7 = vld [vmem:[%s1306_s1 + $0x110] ss:$8 sps:$4 sm:$0xff] (!%p158_p3)   ;;  %v936_v9 = vld [vmem:[%s1306_s1 + $0x124] ss:$8 sps:$4 sm:$0xff] (!%p158_p3)   ;;  %v938_v10 = vld [vmem:[%s1306_s1 + $0x20] ss:$8 sps:$4 sm:$0xff] (!%p158_p3)  }
   0xa   : > { %658 = vmatprep.subr.bf16.mxu1 (!%p158_p3), %v930_v5  ;;  %v939_v11 = vld [vmem:[%s1306_s1 + $0x120] ss:$8 sps:$4 sm:$0xff] (!%p158_p3)   ;;  %v940_v12 = vld [vmem:[%s1306_s1 + $0x34] ss:$8 sps:$4 sm:$0xff] (!%p158_p3)   ;;  %v944_v14 = vld [vmem:[%s1306_s1 + $0x30] ss:$8 sps:$4 sm:$0xff] (!%p158_p3)  }
   0xb   : > { %v942_v13 = vld [vmem:[%s1306_s1 + $0x134] ss:$8 sps:$4 sm:$0xff] (!%p158_p3)   ;;  %v945_v15 = vld [vmem:[%s1306_s1 + $0x130] ss:$8 sps:$4 sm:$0xff] (!%p158_p3)   ;;  %v946_v16 = vld [vmem:[%s1306_s1 + $0x44] ss:$8 sps:$4 sm:$0xff] (!%p158_p3)  }
   0xc   : > { %618 = vmatpush1.bf16.msra.mxu0 (!%p158_p3), %v932_v6  ;;  %v948_v17 = vld [vmem:[%s1306_s1 + $0x144] ss:$8 sps:$4 sm:$0xff] (!%p158_p3)   ;;  %v950_v18 = vld [vmem:[%s1306_s1 + $0x40] ss:$8 sps:$4 sm:$0xff] (!%p158_p3)   ;;  %v952_v20 = vld [vmem:[%s1306_s1 + $0x54] ss:$8 sps:$4 sm:$0xff] (!%p158_p3)  }
   0xd   : > { %659 = vmatpush1.bf16.msra.mxu1 (!%p158_p3), %v933_v7  ;;  %619 = vmatprep.subr.bf16.mxu0 (!%p158_p3), %v934_v8  ;;  %v951_v19 = vld [vmem:[%s1306_s1 + $0x140] ss:$8 sps:$4 sm:$0xff] (!%p158_p3)   ;;  %v954_v21 = vld [vmem:[%s1306_s1 + $0x154] ss:$8 sps:$4 sm:$0xff] (!%p158_p3)   ;;  %v956_v22 = vld [vmem:[%s1306_s1 + $0x50] ss:$8 sps:$4 sm:$0xff] (!%p158_p3)  }
   0xe   : > { %660 = vmatprep.subr.bf16.mxu1 %v936_v9  ;;  %v957_v23 = vld [vmem:[%s1306_s1 + $0x150] ss:$8 sps:$4 sm:$0xff]   ;;  %v958_v24 = vld [vmem:[%s1306_s1 + $0x64] ss:$8 sps:$4 sm:$0xff]   ;;  %v962_v26 = vld [vmem:[%s1306_s1 + $0x60] ss:$8 sps:$4 sm:$0xff]  }
   0xf   : > { %v960_v25 = vld [vmem:[%s1306_s1 + $0x164] ss:$8 sps:$4 sm:$0xff]   ;;  %v963_v27 = vld [vmem:[%s1306_s1 + $0x160] ss:$8 sps:$4 sm:$0xff]   ;;  %v964_v28 = vld [vmem:[%s1306_s1 + $0x74] ss:$8 sps:$4 sm:$0xff]  }
  0x10   : > { %620 = vmatpush1.bf16.msra.mxu0 %v938_v10  ;;  %v966_v29 = vld [vmem:[%s1306_s1 + $0x174] ss:$8 sps:$4 sm:$0xff]   ;;  %v968_v30 = vld [vmem:[%s1306_s1 + $0x70] ss:$8 sps:$4 sm:$0xff]   ;;  %v970_v32 = vld [vmem:[%s1306_s1 + $0x84] ss:$8 sps:$4 sm:$0xff]  }
  0x11   : > { %661 = vmatpush1.bf16.msra.mxu1 %v939_v11  ;;  %621 = vmatprep.subr.bf16.mxu0 %v940_v12  ;;  %v969_v31 = vld [vmem:[%s1306_s1 + $0x170] ss:$8 sps:$4 sm:$0xff]   ;;  %v972_v33 = vld [vmem:[%s1306_s1 + $0x184] ss:$8 sps:$4 sm:$0xff]   ;;  %v974_v34 = vld [vmem:[%s1306_s1 + $0x80] ss:$8 sps:$4 sm:$0xff]  }
  0x12   : > { %662 = vmatprep.subr.bf16.mxu1 %v942_v13  ;;  %v975_v35 = vld [vmem:[%s1306_s1 + $0x180] ss:$8 sps:$4 sm:$0xff]   ;;  %v1043_v36 = vmov 1983009808   ;;  %v976_v39 = vld [vmem:[%s1306_s1 + $0x94] ss:$8 sps:$4 sm:$0xff]  }
  0x13   : > { %v276_v37 = vunpack.c.l.s4 %v1043_v36  ;;  %s1314_s12 = smov (!%p189_p4, %s1033_s12), 1  ;;  %v978_v40 = vld [vmem:[%s1306_s1 + $0x194] ss:$8 sps:$4 sm:$0xff]   ;;  %v980_v41 = vld [vmem:[%s1306_s1 + $0x90] ss:$8 sps:$4 sm:$0xff]   ;;  %v1205_v43 = vshrl.u32 %v278_v38, 7 }
  0x14   : > { %622 = vmatpush1.bf16.msra.mxu0 %v944_v14  ;;  %v981_v44 = vld [vmem:[%s1306_s1 + $0x190] ss:$8 sps:$4 sm:$0xff]   ;;  %v982_v45 = vld [vmem:[%s1306_s1 + $0xa4] ss:$8 sps:$4 sm:$0xff]   ;;  %s895_s29 = sshll.u32 %s1314_s12, 3  ;;  %s896_s8 = sshll.u32 %s1314_s12, 2 }
  0x15   : > { %663 = vmatpush1.bf16.msra.mxu1 %v945_v15  ;;  %623 = vmatprep.subr.bf16.mxu0 %v946_v16  ;;  %v277_v42 = vunpack.c.0.s8 %v276_v37  ;;  %v984_v46 = vld [vmem:[%s1306_s1 + $0x1a4] ss:$8 sps:$4 sm:$0xff]   ;;  %v986_v47 = vld [vmem:[%s1306_s1 + $0xa0] ss:$8 sps:$4 sm:$0xff]   ;;  %s197_s11 = scalar_lea.vmem %s1305_s0, %s895_s29  ;;  %v988_v50 = vld [vmem:[%s1306_s1 + $0xb4] ss:$8 sps:$4 sm:$0xff]  }
  0x16   : > { %664 = vmatprep.subr.bf16.mxu1 %v948_v17  ;;  %v987_v48 = vld [vmem:[%s1306_s1 + $0x1a0] ss:$8 sps:$4 sm:$0xff]   ;;  %v990_v51 = vld [vmem:[%s1306_s1 + $0x1b4] ss:$8 sps:$4 sm:$0xff]   ;;  %v992_v55 = vld [vmem:[%s1306_s1 + $0xb0] ss:$8 sps:$4 sm:$0xff]  }
  0x17   : > { %v280_v49 = vsub.s32 %v277_v42, %v1205_v43  ;;  %v208_v52 = vld [vmem:[%s197_s11] sm:$0xff]  ;;  %v993_v56 = vld [vmem:[%s1306_s1 + $0x1b0] ss:$8 sps:$4 sm:$0xff]   ;;  %v1000_v0 = vld [vmem:[%s1306_s1 + $0xd4] ss:$8 sps:$4 sm:$0xff]   ;;  %v700_v12 = vsub.s32 0, %v1205_v43  ;;  %s206_s11 = scalar_lea.vmem %s1308_s3, %s896_s8 }
  0x18   : > { %624 = vmatpush1.bf16.msra.mxu0 %v950_v18  ;;  %v274_v54 = vcombine.high %v208_v52, %v208_v52  ;;  %v994_v57 = vld [vmem:[%s1306_s1 + $0xc4] ss:$8 sps:$4 sm:$0xff]   ;;  %v998_v62 = vld [vmem:[%s1306_s1 + $0xc0] ss:$8 sps:$4 sm:$0xff]   ;;  %v1002_v1 = vld [vmem:[%s1306_s1 + $0x1d4] ss:$8 sps:$4 sm:$0xff]  }
  0x19   : > { %665 = vmatpush1.bf16.msra.mxu1 %v951_v19  ;;  %625 = vmatprep.subr.bf16.mxu0 %v952_v20  ;;  %v281_v53 = vrot.slane %v208_v52, %v280_v49  ;;  %v996_v58 = vld [vmem:[%s1306_s1 + $0x1c4] ss:$8 sps:$4 sm:$0xff]   ;;  %v999_v63 = vld [vmem:[%s1306_s1 + $0x1c0] ss:$8 sps:$4 sm:$0xff]   ;;  %v1004_v2 = vld [vmem:[%s1306_s1 + $0xd0] ss:$8 sps:$4 sm:$0xff]  }
  0x1a   : > { %666 = vmatprep.subr.bf16.mxu1 %v954_v21  ;;  %v288_v60 = vrot.slane %v274_v54, %v280_v49  ;;  %v1005_v3 = vld [vmem:[%s1306_s1 + $0x1d0] ss:$8 sps:$4 sm:$0xff]   ;;  %v1006_v4 = vld [vmem:[%s1306_s1 + $0xe4] ss:$8 sps:$4 sm:$0xff]   ;;  %v1010_v6 = vld [vmem:[%s1306_s1 + $0xe0] ss:$8 sps:$4 sm:$0xff]  }
  0x1b   : > { %v289_v59 = vcombine.high %v281_v53, %v281_v53  ;;  %v1008_v5 = vld [vmem:[%s1306_s1 + $0x1e4] ss:$8 sps:$4 sm:$0xff]   ;;  %v1011_v7 = vld [vmem:[%s1306_s1 + $0x1e0] ss:$8 sps:$4 sm:$0xff]   ;;  %v1012_v8 = vld [vmem:[%s1306_s1 + $0xf4] ss:$8 sps:$4 sm:$0xff]  }
  0x1c   : > { %626 = vmatpush1.bf16.msra.mxu0 %v956_v22  ;;  %v290_v61 = vcombine.high %v288_v60, %v288_v60  ;;  %v1014_v9 = vld [vmem:[%s1306_s1 + $0x1f4] ss:$8 sps:$4 sm:$0xff]   ;;  %v1016_v10 = vld [vmem:[%s1306_s1 + $0xf0] ss:$8 sps:$4 sm:$0xff]   ;;  %v207_v13 = vld [vmem:[%s1307_s2] sm:$0x3] }
  0x1d   : > { %667 = vmatpush1.bf16.msra.mxu1 %v957_v23  ;;  %627 = vmatprep.subr.bf16.mxu0 %v958_v24  ;;  %v1017_v11 = vld [vmem:[%s1306_s1 + $0x1f0] ss:$8 sps:$4 sm:$0xff]   ;;  %v704_v14 = vsub.s32 1, %v1205_v43  ;;  %v701_v15 = vrot.slane %v207_v13, %v700_v12 }
  0x1e   : > { %668 = vmatprep.subr.bf16.mxu1 %v960_v25  ;;  %647 = vmatprep.mubr.bf16.mxu0 %v289_v59 }
  0x1f   : > { %688 = vmatprep.mubr.bf16.mxu1 %v290_v61  ;;  %v705_v18 = vrot.slane %v207_v13, %v704_v14 }
  0x20   : > { %628 = vmatpush1.bf16.msra.mxu0 %v962_v26 }
  0x21   : > { %669 = vmatpush1.bf16.msra.mxu1 %v963_v27  ;;  %629 = vmatprep.subr.bf16.mxu0 %v964_v28 }
  0x22   : > { %670 = vmatprep.subr.bf16.mxu1 %v966_v29 }
  0x24   : > { %630 = vmatpush1.bf16.msra.mxu0 %v968_v30 }
  0x25   : > { %671 = vmatpush1.bf16.msra.mxu1 %v969_v31  ;;  %631 = vmatprep.subr.bf16.mxu0 %v970_v32 }
  0x26   : > { %672 = vmatprep.subr.bf16.mxu1 %v972_v33 }
  0x28   : > { %632 = vmatpush1.bf16.msra.mxu0 %v974_v34 }
  0x29   : > { %673 = vmatpush1.bf16.msra.mxu1 %v975_v35  ;;  %633 = vmatprep.subr.bf16.mxu0 %v976_v39 }
  0x2a   : > { %674 = vmatprep.subr.bf16.mxu1 %v978_v40 }
  0x2c   : > { %634 = vmatpush1.bf16.msra.mxu0 %v980_v41 }
  0x2d   : > { %675 = vmatpush1.bf16.msra.mxu1 %v981_v44  ;;  %635 = vmatprep.subr.bf16.mxu0 %v982_v45 }
  0x2e   : > { %676 = vmatprep.subr.bf16.mxu1 %v984_v46 }
  0x30   : > { %636 = vmatpush1.bf16.msra.mxu0 %v986_v47 }
  0x31   : > { %677 = vmatpush1.bf16.msra.mxu1 %v987_v48  ;;  %637 = vmatprep.subr.bf16.mxu0 %v988_v50 }
  0x32   : > { %678 = vmatprep.subr.bf16.mxu1 %v990_v51 }
  0x34   : > { %638 = vmatpush1.bf16.msra.mxu0 %v992_v55 }
  0x35   : > { %679 = vmatpush1.bf16.msra.mxu1 %v993_v56  ;;  %639 = vmatprep.subr.bf16.mxu0 %v994_v57 }
  0x36   : > { %680 = vmatprep.subr.bf16.mxu1 %v996_v58 }
  0x38   : > { %640 = vmatpush1.bf16.msra.mxu0 %v998_v62 }
  0x39   : > { %681 = vmatpush1.bf16.msra.mxu1 %v999_v63  ;;  %641 = vmatprep.subr.bf16.mxu0 %v1000_v0 }
  0x3a   : > { %682 = vmatprep.subr.bf16.mxu1 %v1002_v1 }
  0x3c   : > { %642 = vmatpush1.bf16.msra.mxu0 %v1004_v2 }
  0x3d   : > { %683 = vmatpush1.bf16.msra.mxu1 %v1005_v3  ;;  %643 = vmatprep.subr.bf16.mxu0 %v1006_v4 }
  0x3e   : > { %684 = vmatprep.subr.bf16.mxu1 %v1008_v5 }
  0x40   : > { %644 = vmatpush1.bf16.msra.mxu0 %v1010_v6 }
  0x41   : > { %685 = vmatpush1.bf16.msra.mxu1 %v1011_v7  ;;  %645 = vmatprep.subr.bf16.mxu0 %v1012_v8 }
  0x42   : > { %686 = vmatprep.subr.bf16.mxu1 %v1014_v9 }
  0x44   : > { %646 = vmatpush1.bf16.msra.mxu0 %v1016_v10 }
  0x45   : > { %687 = vmatpush1.bf16.msra.mxu1 %v1017_v11 }
  0x47   : > { %648 = vmatmul.mubr.bf16.vlgmr.msra.gmra.mrb[0].mxu0 %v281_v53 }
  0x48   : > { %689 = vmatmul.mubr.bf16.vlgmr.msra.gmra.mrb[0].mxu1 %v288_v60 }
 0x11a   : > { %v649_v16 = vpop.f32.mrb[0].mxu0 }
 0x11b   : > { %v690_v17 = vpop.f32.mrb[0].mxu1  ;;  %v651_v20 = vpop.f32.mrb[1].mxu0 }
 0x11c   : > { %v691_v19 = vadd.f32 %v690_v17, %v649_v16  ;;  %v692_v21 = vpop.f32.mrb[1].mxu1  ;;  %v653_v23 = vpop.f32.mrb[2].mxu0 }
 0x11d   : > { %v693_v22 = vadd.f32 %v692_v21, %v651_v20  ;;  %v694_v24 = vpop.f32.mrb[2].mxu1  ;;  %v654_v26 = vpop.f32.mrb[3].mxu0 }
 0x11e   : > { %v708_v25 = vadd.f32 %v701_v15, %v691_v19  ;;  %v695_v27 = vpop.f32.mrb[3].mxu1 }
 0x11f   : > { %v709_v28 = vadd.f32 %v705_v18, %v693_v22 }
 0x120   : > { %v710_v29 = vmax.f32 %v708_v25, 0.0 }
 0x121   : > { %v711_v30 = vmax.f32 %v709_v28, 0.0 }
 0x123   : > { %v891_v31 = vpack.c.bf16 %v711_v30, %v710_v29 }
 0x125   : > { %892 = vst.sshfl [vmem:[%s206_s11] sm:$0x33 pattern:$0x76325410] %v891_v31 }
 0x126 PF: > { %s13_s14 = sadd.s32 1, %s1041_s14   ;;  %s1309_s12 = smov %s1037_s13 }
 0x127   : > { %p10_p5 = scmp.ge.s32.totalorder %s13_s14, 4   ;;  %s1310_s13 = smov %s1312_s15 }
 0x129   :  { %12 = sbr.rel (!%p10_p5) target bundleno = 2 (0x2), region = 62 }

// kernel: memseg_forward.8
= control target key start
LH: loop header
LB: loop body
LE: loop exit
PB: predicated region body
PF: predicated region fallthrough
CT: control target
= control target key end

     0   :  { %s2017_s21 = smov 0   ;;  %s2019_s22 = smov 0   ;;  %s2374_s0 = inlined_call_operand.vmem [shape: bf16[2,64,64], index: 0, kind: input, shape index: {}]   ;;  %s2375_s1 = inlined_call_operand.vmem [shape: bf16[256,64], index: 1, kind: input, shape index: {}]   ;;  %s2376_s2 = inlined_call_operand.vmem [shape: bf16[64,48], index: 2, kind: input, shape index: {}]   ;;  %s2377_s3 = inlined_call_operand.vmem [shape: bf16[2,256,64], index: 3, kind: input, shape index: {}]   ;;  %s2378_s4 = inlined_call_operand.vmem [shape: bf16[64,48], index: 4, kind: input, shape index: {}]   ;;  %s2379_s5 = inlined_call_operand.vmem [shape: f32[1,48], index: 5, kind: input, shape index: {}]   ;;  %s2380_s6 = inlined_call_operand.vmem [shape: bf16[2,256,48], index: 6, kind: output, shape index: {}]  }
   0x1   :  { %s2021_s23 = smov 0  }
   0x2 LB: > { %s28_s24 = sadd.s32 1, %s1976_s22  ;;  %p1517_p0 = scmp.ge.s32.totalorder %s1980_s23, 1  ;;  %s1980_s23 = sphi %s2021_s23, %s16_s23   ;;  %s1976_s22 = sphi %s2019_s22, %s2382_s22   ;;  %s1972_s21 = sphi %s2017_s21, %s2381_s21  }
   0x3   : > { %p30_p1 = scmp.ge.s32.totalorder %s28_s24, 2  ;;  %p250_p2 = scmp.lt.s32.totalorder %s1980_s23, 3 }
   0x5   : > { %s2384_s24 = smov (%p30_p1, %s28_s24), 0  ;;  %p251_p3 = pnand %p1517_p0, %p250_p2 }
   0x6   : > { %v1914_v0 = vld [vmem:[%s2376_s2] sm:$0xff] (!%p251_p3)   ;;  %p298_p4 = scmp.lt.s32.totalorder (!%p251_p3), %s1972_s21, 1  ;;  %v1915_v1 = vld [vmem:[%s2376_s2 + $0x8] sm:$0xff] (!%p251_p3)   ;;  %v1916_v2 = vld [vmem:[%s2376_s2 + $0x10] sm:$0xff] (!%p251_p3)   ;;  %vm473_vm0 = vcmask (!%p251_p3), 523264   ;;  %vm1375_vm1 = vcmask (!%p251_p3), 388096  }
   0x7   : > { %254 = sbr.rel (%p251_p3) target bundleno = 526 (0x20e), region = 44  ;;  %1762 = vmatprep.subr.bf16.mxu1 (!%p251_p3), %v1914_v0  ;;  %v1922_v3 = vld [vmem:[%s2378_s4] sm:$0xff] (!%p251_p3)   ;;  %v1917_v5 = vld [vmem:[%s2376_s2 + $0x18] sm:$0xff] (!%p251_p3)   ;;  %v1923_v6 = vld [vmem:[%s2378_s4 + $0x8] sm:$0xff] (!%p251_p3)  }
   0x8   : > { %1763 = vmatpush3.bf16.msra.mxu1 (!%p251_p3), %v1914_v0  ;;  %1722 = vmatprep.subr.bf16.mxu0 (!%p251_p3), %v1922_v3  ;;  %v1924_v7 = vld [vmem:[%s2378_s4 + $0x10] sm:$0xff] (!%p251_p3)   ;;  %v1925_v10 = vld [vmem:[%s2378_s4 + $0x18] sm:$0xff] (!%p251_p3)   ;;  %v1942_v28 = vld [vmem:[%s2375_s1] sm:$0xff] (!%p251_p3)  }
   0x9   : > { %1764 = vmatprep.subr.bf16.mxu1 (!%p251_p3), %v1915_v1  ;;  %1723 = vmatpush3.bf16.msra.mxu0 (!%p251_p3), %v1922_v3  ;;  %v1943_v29 = vld [vmem:[%s2375_s1 + $0x10] sm:$0xff] (!%p251_p3)   ;;  %v1944_v46 = vld [vmem:[%s2375_s1 + $0x8] sm:$0xff] (!%p251_p3)   ;;  %v1945_v47 = vld [vmem:[%s2375_s1 + $0x18] sm:$0xff] (!%p251_p3)  }
   0xa   : > { %1724 = vmatprep.subr.bf16.mxu0 (!%p251_p3), %v1923_v6  ;;  %v1946_v48 = vld [vmem:[%s2375_s1 + $0x20] sm:$0xff] (!%p251_p3)   ;;  %v1947_v53 = vld [vmem:[%s2375_s1 + $0x28] sm:$0xff] (!%p251_p3)   ;;  %v1948_v54 = vld [vmem:[%s2375_s1 + $0x30] sm:$0xff] (!%p251_p3)  }
   0xb   : > { %v1949_v59 = vld [vmem:[%s2375_s1 + $0x38] sm:$0xff] (!%p251_p3)   ;;  %v1950_v60 = vld [vmem:[%s2375_s1 + $0x40] sm:$0xff] (!%p251_p3)  }
   0xc   : > { %1765 = vmatpush3.bf16.msra.mxu1 (!%p251_p3), %v1915_v1  ;;  %v1951_v1 = vld [vmem:[%s2375_s1 + $0x48] sm:$0xff] (!%p251_p3)  }
   0xd   : > { %1766 = vmatprep.subr.bf16.mxu1 (!%p251_p3), %v1916_v2  ;;  %1725 = vmatpush3.bf16.msra.mxu0 (!%p251_p3), %v1923_v6 }
   0xe   : > { %s2386_s21 = smov (!%p298_p4, %s1972_s21), 1  ;;  %1726 = vmatprep.subr.bf16.mxu0 %v1924_v7 }
   0xf   : > { %s1639_s7 = sshll.u32 %s2386_s21, 5  ;;  %s1640_s13 = sshll.u32 %s2386_s21, 7 }
  0x10   : > { %s2050_s10 = scalar_lea.vmem %s2374_s0, %s1639_s7  ;;  %s2066_s18 = scalar_lea.vmem %s2377_s3, %s1640_s13  ;;  %1767 = vmatpush3.bf16.msra.mxu1 %v1916_v2  ;;  %v1952_v2 = vld [vmem:[%s2375_s1 + $0x50] sm:$0xff]  }
  0x11   : > { %v1918_v4 = vld [vmem:[%s2050_s10] sm:$0xff]   ;;  %1768 = vmatprep.subr.bf16.mxu1 %v1917_v5  ;;  %v1919_v8 = vld [vmem:[%s2050_s10 + $0x8] sm:$0xff]   ;;  %v1920_v11 = vld [vmem:[%s2050_s10 + $0x10] sm:$0xff]   ;;  %1727 = vmatpush3.bf16.msra.mxu0 %v1924_v7  ;;  %s2250_s27 = scalar_lea.vmem %s2380_s6, %s1640_s13 }
  0x12   : > { %1770 = vmatprep.mubr.msk.bf16.mxu1 %vm473_vm0, %v1918_v4  ;;  %v1926_v9 = vld [vmem:[%s2066_s18] sm:$0xff]   ;;  %1728 = vmatprep.subr.bf16.mxu0 %v1925_v10  ;;  %v1927_v12 = vld [vmem:[%s2066_s18 + $0x8] sm:$0xff]   ;;  %v1928_v13 = vld [vmem:[%s2066_s18 + $0x10] sm:$0xff]  }
  0x13   : > { %1730 = vmatprep.mubr.msk.bf16.mxu0 %vm473_vm0, %v1926_v9  ;;  %v1921_v14 = vld [vmem:[%s2050_s10 + $0x18] sm:$0xff]   ;;  %v1930_v16 = vld [vmem:[%s2066_s18 + $0x20] sm:$0xff]   ;;  %v1931_v17 = vld [vmem:[%s2066_s18 + $0x28] sm:$0xff]  }
  0x14   : > { %1769 = vmatpush3.bf16.msra.mxu1 %v1917_v5  ;;  %v1929_v15 = vld [vmem:[%s2066_s18 + $0x18] sm:$0xff]   ;;  %v1932_v18 = vld [vmem:[%s2066_s18 + $0x30] sm:$0xff]   ;;  %v1934_v20 = vld [vmem:[%s2066_s18 + $0x40] sm:$0xff]  }
  0x15   : > { %1729 = vmatpush3.bf16.msra.mxu0 %v1925_v10  ;;  %v1933_v19 = vld [vmem:[%s2066_s18 + $0x38] sm:$0xff]   ;;  %v1935_v21 = vld [vmem:[%s2066_s18 + $0x48] sm:$0xff]   ;;  %v1936_v22 = vld [vmem:[%s2066_s18 + $0x50] sm:$0xff]  }
  0x16   : > { %v1937_v23 = vld [vmem:[%s2066_s18 + $0x58] sm:$0xff]   ;;  %v1938_v24 = vld [vmem:[%s2066_s18 + $0x60] sm:$0xff]   ;;  %v1939_v25 = vld [vmem:[%s2066_s18 + $0x68] sm:$0xff]  }
  0x17   : > { %1771 = vmatmul.mubr.msk.bf16.vlgmr.msra.gmra.mrb[0].mxu1 %vm473_vm0, %v1919_v8  ;;  %v1940_v26 = vld [vmem:[%s2066_s18 + $0x70] sm:$0xff]   ;;  %v1941_v27 = vld [vmem:[%s2066_s18 + $0x78] sm:$0xff]   ;;  %v1954_v8 = vld [vmem:[%s2375_s1 + $0x60] sm:$0xff]  }
  0x18   : > { %1774 = vmatprep.mubr.msk.bf16.mxu1 %vm473_vm0, %v1920_v11  ;;  %1731 = vmatmul.mubr.msk.bf16.vlgmr.msra.gmra.mrb[0].mxu0 %vm473_vm0, %v1927_v12  ;;  %v1953_v7 = vld [vmem:[%s2375_s1 + $0x58] sm:$0xff]   ;;  %v1955_v9 = vld [vmem:[%s2375_s1 + $0x68] sm:$0xff]   ;;  %v1956_v10 = vld [vmem:[%s2375_s1 + $0x70] sm:$0xff]  }
  0x19   : > { %1734 = vmatprep.mubr.msk.bf16.mxu0 %vm473_vm0, %v1928_v13  ;;  %v1957_v11 = vld [vmem:[%s2375_s1 + $0x78] sm:$0xff]  }
  0x1f   : > { %1775 = vmatmul.mubr.msk.bf16.gmra.mrb[4].mxu1 %vm473_vm0, %v1921_v14 }
  0x20   : > { %1735 = vmatmul.mubr.msk.bf16.gmra.mrb[4].mxu0 %vm473_vm0, %v1929_v15  ;;  %1790 = vmatprep.mubr.msk.bf16.mxu1 %vm473_vm0, %v1943_v29 }
  0x21   : > { %1738 = vmatprep.mubr.msk.bf16.mxu0 %vm473_vm0, %v1930_v16 }
  0x28   : > { %1739 = vmatmul.mubr.msk.bf16.gmra.mrb[8].mxu0 %vm473_vm0, %v1931_v17 }
  0x29   : > { %1742 = vmatprep.mubr.msk.bf16.mxu0 %vm473_vm0, %v1932_v18 }
  0x30   : > { %1743 = vmatmul.mubr.msk.bf16.gmra.mrb[12].mxu0 %vm473_vm0, %v1933_v19 }
  0x31   : > { %1746 = vmatprep.mubr.msk.bf16.mxu0 %vm473_vm0, %v1934_v20  ;;  %v2234_v20 = vld [vmem:[%s2379_s5] ss:$0 sm:$0xff] }
  0x38   : > { %1747 = vmatmul.mubr.msk.bf16.gmra.mrb[16].mxu0 %vm473_vm0, %v1935_v21 }
  0x39   : > { %1750 = vmatprep.mubr.msk.bf16.mxu0 %vm473_vm0, %v1936_v22 }
  0x40   : > { %1751 = vmatmul.mubr.msk.bf16.gmra.mrb[20].mxu0 %vm473_vm0, %v1937_v23 }
  0x41   : > { %1754 = vmatprep.mubr.msk.bf16.mxu0 %vm473_vm0, %v1938_v24 }
  0x48   : > { %1755 = vmatmul.mubr.msk.bf16.gmra.mrb[24].mxu0 %vm473_vm0, %v1939_v25 }
  0x49   : > { %1758 = vmatprep.mubr.msk.bf16.mxu0 %vm473_vm0, %v1940_v26 }
  0x50   : > { %1759 = vmatmul.mubr.msk.bf16.gmra.mrb[28].mxu0 %vm473_vm0, %v1941_v27 }
  0x51   : > { %1786 = vmatprep.mubr.msk.bf16.mxu0 %vm473_vm0, %v1942_v28 }
  0xea   : > { %v1772_v30 = vpop.f32.mrb[0].mxu1 }
  0xeb   : > { %v827_v31 = vpop.f32.mrb[1].mxu1 }
  0xec   : > { %v1773_v32 = vpop.f32.mrb[2].mxu1 }
  0xed   : > { %v891_v33 = vpack.c.bf16 %v1773_v32, %v1772_v30  ;;  %v830_v34 = vpop.f32.mrb[3].mxu1 }
  0xee   : > { %v890_v35 = vpack.c.bf16 %v830_v34, %v827_v31 }
  0xf0   : > { %1778 = vmatprep.subr.bf16.mxu0 %v890_v35  ;;  %1818 = vmatprep.subr.bf16.mxu1 %v890_v35 }
  0xf1   : > { %1779 = vmatpush3.bf16.msra.mxu0 %v890_v35  ;;  %1822 = vmatpush3.bf16.msra.mxu1 %v890_v35 }
  0xf2   : > { %v1776_v36 = vpop.f32.mrb[4].mxu1  ;;  %1780 = vmatprep.subr.bf16.mxu0 %v891_v33  ;;  %1819 = vmatprep.subr.bf16.mxu1 %v891_v33 }
  0xf3   : > { %v843_v37 = vpop.f32.mrb[5].mxu1  ;;  %v2123_v42 = vpop.f32.mrb[4].mxu0 }
  0xf4   : > { %v1777_v38 = vpop.f32.mrb[6].mxu1  ;;  %v572_v43 = vpop.f32.mrb[5].mxu0  ;;  %v695_v21 = vadd.f32 %v2123_v42, %v2234_v20 }
  0xf5   : > { %v893_v39 = vpack.c.bf16 %v1777_v38, %v1776_v36  ;;  %v846_v40 = vpop.f32.mrb[7].mxu1  ;;  %1781 = vmatpush3.bf16.msra.mxu0 %v891_v33  ;;  %1823 = vmatpush3.bf16.msra.mxu1 %v891_v33  ;;  %v1737_v44 = vpop.f32.mrb[6].mxu0  ;;  %v693_v22 = vadd.f32 %v2234_v20, %v572_v43 }
  0xf6   : > { %v892_v41 = vpack.c.bf16 %v846_v40, %v843_v37  ;;  %v2125_v45 = vpop.f32.mrb[7].mxu0  ;;  %v696_v25 = vadd.f32 %v1737_v44, %v2234_v20 }
  0xf7   : > { %v694_v30 = vadd.f32 %v2234_v20, %v2125_v45 }
  0xf8   : > { %1782 = vmatprep.subr.bf16.mxu0 %v892_v41  ;;  %1820 = vmatprep.subr.bf16.mxu1 %v892_v41 }
  0xf9   : > { %1783 = vmatpush3.bf16.msra.mxu0 %v892_v41  ;;  %1824 = vmatpush3.bf16.msra.mxu1 %v892_v41 }
  0xfa   : > { %1784 = vmatprep.subr.bf16.mxu0 %v893_v39  ;;  %1821 = vmatprep.subr.bf16.mxu1 %v893_v39 }
  0xfb   : > { %v2138_v49 = vpop.f32.mrb[8].mxu0 }
  0xfc   : > { %v2141_v50 = vpop.f32.mrb[9].mxu0 }
  0xfd   : > { %1785 = vmatpush3.bf16.msra.mxu0 %v893_v39  ;;  %1825 = vmatpush3.bf16.msra.mxu1 %v893_v39  ;;  %v2143_v51 = vpop.f32.mrb[10].mxu0 }
  0xfe   : > { %v2145_v52 = vpop.f32.mrb[11].mxu0 }
 0x100   : > { %1787 = vmatmul.mubr.msk.bf16.vlgmr.msra.gmra.mrb[0].mxu0 %vm473_vm0, %v1944_v46  ;;  %1791 = vmatmul.mubr.msk.bf16.vlgmr.msra.gmra.mrb[8].mxu1 %vm473_vm0, %v1945_v47 }
 0x101   : > { %1794 = vmatprep.mubr.msk.bf16.mxu1 %vm473_vm0, %v1946_v48 }
 0x103   : > { %v2154_v55 = vpop.f32.mrb[12].mxu0 }
 0x104   : > { %v2157_v56 = vpop.f32.mrb[13].mxu0 }
 0x105   : > { %v2159_v57 = vpop.f32.mrb[14].mxu0 }
 0x106   : > { %v2161_v58 = vpop.f32.mrb[15].mxu0 }
 0x108   : > { %1795 = vmatmul.mubr.msk.bf16.gmra.mrb[12].mxu1 %vm473_vm0, %v1947_v53 }
 0x109   : > { %1798 = vmatprep.mubr.msk.bf16.mxu1 %vm473_vm0, %v1948_v54 }
 0x10b   : > { %v2170_v61 = vpop.f32.mrb[16].mxu0 }
 0x10c   : > { %v2173_v62 = vpop.f32.mrb[17].mxu0 }
 0x10d   : > { %v2175_v63 = vpop.f32.mrb[18].mxu0 }
 0x10e   : > { %v2177_v0 = vpop.f32.mrb[19].mxu0 }
 0x110   : > { %1799 = vmatmul.mubr.msk.bf16.gmra.mrb[16].mxu1 %vm473_vm0, %v1949_v59 }
 0x111   : > { %1802 = vmatprep.mubr.msk.bf16.mxu1 %vm473_vm0, %v1950_v60 }
 0x113   : > { %v2186_v3 = vpop.f32.mrb[20].mxu0 }
 0x114   : > { %v2189_v4 = vpop.f32.mrb[21].mxu0 }
 0x115   : > { %v2191_v5 = vpop.f32.mrb[22].mxu0 }
 0x116   : > { %v2193_v6 = vpop.f32.mrb[23].mxu0 }
 0x118   : > { %1803 = vmatmul.mubr.msk.bf16.gmra.mrb[20].mxu1 %vm473_vm0, %v1951_v1  ;;  %v699_v1 = vadd.f32 %v2138_v49, %v2234_v20  ;;  %v700_v49 = vadd.f32 %v2143_v51, %v2234_v20 }
 0x119   : > { %1806 = vmatprep.mubr.msk.bf16.mxu1 %vm473_vm0, %v1952_v2 }
 0x11b   : > { %v2215_v12 = vpop.f32.mrb[24].mxu0 }
 0x11c   : > { %v2217_v13 = vpop.f32.mrb[25].mxu0 }
 0x11d   : > { %v2219_v14 = vpop.f32.mrb[26].mxu0 }
 0x11e   : > { %v2221_v15 = vpop.f32.mrb[27].mxu0 }
 0x120   : > { %1807 = vmatmul.mubr.msk.bf16.gmra.mrb[24].mxu1 %vm473_vm0, %v1953_v7 }
 0x121   : > { %1810 = vmatprep.mubr.msk.bf16.mxu1 %vm473_vm0, %v1954_v8  ;;  %v697_v8 = vadd.f32 %v2234_v20, %v2141_v50  ;;  %v698_v50 = vadd.f32 %v2234_v20, %v2145_v52  ;;  %v703_v52 = vadd.f32 %v2154_v55, %v2234_v20  ;;  %v702_v55 = vadd.f32 %v2234_v20, %v2161_v58 }
 0x123   : > { %v2223_v16 = vpop.f32.mrb[28].mxu0 }
 0x124   : > { %v2225_v17 = vpop.f32.mrb[29].mxu0 }
 0x125   : > { %v2227_v18 = vpop.f32.mrb[30].mxu0 }
 0x126   : > { %v2229_v19 = vpop.f32.mrb[31].mxu0 }
 0x128   : > { %1811 = vmatmul.mubr.msk.bf16.gmra.mrb[28].mxu1 %vm473_vm0, %v1955_v9 }
 0x129   : > { %1814 = vmatprep.mubr.msk.bf16.mxu1 %vm473_vm0, %v1956_v10 }
 0x130   : > { %1815 = vmatmul.mubr.msk.bf16.gmra.mrb[32].mxu1 %vm473_vm0, %v1957_v11 }
 0x1d3   : > { %v1788_v23 = vpop.f32.mrb[0].mxu0  ;;  %v1792_v24 = vpop.f32.mrb[8].mxu1 }
 0x1d4   : > { %v1826_v26 = vadd.f32 %v1788_v23, %v2234_v20  ;;  %v1189_v27 = vadd.f32 %v1792_v24, %v695_v21  ;;  %v1056_v28 = vpop.f32.mrb[1].mxu0  ;;  %v1072_v29 = vpop.f32.mrb[9].mxu1 }
 0x1d5   : > { %v1827_v31 = vadd.f32 %v2234_v20, %v1056_v28  ;;  %v1187_v32 = vadd.f32 %v1072_v29, %v693_v22  ;;  %v1789_v33 = vpop.f32.mrb[2].mxu0  ;;  %v1793_v34 = vpop.f32.mrb[10].mxu1 }
 0x1d6   : > { %v1217_v35 = vmax.f32 %v1826_v26, 0.0  ;;  %v1221_v36 = vmax.f32 %v1189_v27, 0.0  ;;  %v1828_v37 = vadd.f32 %v1789_v33, %v2234_v20  ;;  %v1190_v38 = vadd.f32 %v1793_v34, %v696_v25  ;;  %v1059_v39 = vpop.f32.mrb[3].mxu0  ;;  %v1075_v40 = vpop.f32.mrb[11].mxu1 }
 0x1d7   : > { %v1215_v41 = vmax.f32 %v1827_v31, 0.0  ;;  %v1219_v42 = vmax.f32 %v1187_v32, 0.0  ;;  %v1829_v43 = vadd.f32 %v2234_v20, %v1059_v39  ;;  %v1188_v44 = vadd.f32 %v1075_v40, %v694_v30 }
 0x1d8   : > { %v1644_v45 = vpack.c.bf16 %v1217_v35, %v1217_v35  ;;  %v1648_v46 = vpack.c.bf16 %v1221_v36, %v1221_v36  ;;  %v1218_v47 = vmax.f32 %v1828_v37, 0.0  ;;  %v1222_v48 = vmax.f32 %v1190_v38, 0.0 }
 0x1d9   : > { %v1642_v53 = vpack.c.bf16 %v1215_v41, %v1215_v41  ;;  %v1646_v54 = vpack.c.bf16 %v1219_v42, %v1219_v42  ;;  %v1216_v59 = vmax.f32 %v1829_v43, 0.0  ;;  %v1220_v60 = vmax.f32 %v1188_v44, 0.0 }
 0x1da   : > { %1378 = vst.msk [vmem:[%s2250_s27 + $0x8] sm:$0xf] %vm1375_vm1, %v1644_v45  ;;  %1382 = vst.msk [vmem:[%s2250_s27 + $0x18] sm:$0xf] %vm1375_vm1, %v1648_v46  ;;  %v1645_v2 = vpack.c.bf16 %v1218_v47, %v1218_v47  ;;  %v1649_v7 = vpack.c.bf16 %v1222_v48, %v1222_v48  ;;  %v701_v34 = vadd.f32 %v2234_v20, %v2157_v56 }
 0x1db   : > { %1376 = vst.msk [vmem:[%s2250_s27] sm:$0xf] %vm1375_vm1, %v1642_v53  ;;  %1380 = vst.msk [vmem:[%s2250_s27 + $0x10] sm:$0xf] %vm1375_vm1, %v1646_v54  ;;  %v1643_v9 = vpack.c.bf16 %v1216_v59, %v1216_v59  ;;  %v1647_v10 = vpack.c.bf16 %v1220_v60, %v1220_v60  ;;  %v1796_v11 = vpop.f32.mrb[12].mxu1  ;;  %v704_v37 = vadd.f32 %v2159_v57, %v2234_v20 }
 0x1dc   : > { %1379 = vst.msk [vmem:[%s2250_s27 + $0xc] sm:$0xf] %vm1375_vm1, %v1645_v2  ;;  %1383 = vst.msk [vmem:[%s2250_s27 + $0x1c] sm:$0xf] %vm1375_vm1, %v1649_v7  ;;  %v1193_v21 = vadd.f32 %v1796_v11, %v699_v1  ;;  %v1088_v22 = vpop.f32.mrb[13].mxu1  ;;  %v707_v53 = vadd.f32 %v2170_v61, %v2234_v20  ;;  %v705_v54 = vadd.f32 %v2234_v20, %v2173_v62 }
 0x1dd   : > { %1377 = vst.msk [vmem:[%s2250_s27 + $0x4] sm:$0xf] %vm1375_vm1, %v1643_v9  ;;  %1381 = vst.msk [vmem:[%s2250_s27 + $0x14] sm:$0xf] %vm1375_vm1, %v1647_v10  ;;  %v1191_v23 = vadd.f32 %v1088_v22, %v697_v8  ;;  %v1797_v24 = vpop.f32.mrb[14].mxu1  ;;  %v708_v1 = vadd.f32 %v2175_v63, %v2234_v20  ;;  %v706_v61 = vadd.f32 %v2234_v20, %v2177_v0 }
 0x1de   : > { %v1225_v25 = vmax.f32 %v1193_v21, 0.0  ;;  %v1194_v26 = vadd.f32 %v1797_v24, %v700_v49  ;;  %v1091_v51 = vpop.f32.mrb[15].mxu1  ;;  %v711_v24 = vadd.f32 %v2186_v3, %v2234_v20  ;;  %v710_v3 = vadd.f32 %v2234_v20, %v2193_v6 }
 0x1df   : > { %v1223_v27 = vmax.f32 %v1191_v23, 0.0  ;;  %v1192_v28 = vadd.f32 %v1091_v51, %v698_v50 }
 0x1e0   : > { %v1652_v29 = vpack.c.bf16 %v1225_v25, %v1225_v25  ;;  %v1226_v30 = vmax.f32 %v1194_v26, 0.0  ;;  %v709_v25 = vadd.f32 %v2234_v20, %v2189_v4 }
 0x1e1   : > { %v1650_v31 = vpack.c.bf16 %v1223_v27, %v1223_v27  ;;  %v1224_v32 = vmax.f32 %v1192_v28, 0.0  ;;  %v712_v27 = vadd.f32 %v2191_v5, %v2234_v20 }
 0x1e2   : > { %1386 = vst.msk [vmem:[%s2250_s27 + $0x28] sm:$0xf] %vm1375_vm1, %v1652_v29  ;;  %v1653_v33 = vpack.c.bf16 %v1226_v30, %v1226_v30 }
 0x1e3   : > { %1384 = vst.msk [vmem:[%s2250_s27 + $0x20] sm:$0xf] %vm1375_vm1, %v1650_v31  ;;  %v1651_v35 = vpack.c.bf16 %v1224_v32, %v1224_v32  ;;  %v1800_v36 = vpop.f32.mrb[16].mxu1 }
 0x1e4   : > { %1387 = vst.msk [vmem:[%s2250_s27 + $0x2c] sm:$0xf] %vm1375_vm1, %v1653_v33  ;;  %v1197_v38 = vadd.f32 %v1800_v36, %v703_v52  ;;  %v1104_v39 = vpop.f32.mrb[17].mxu1 }
 0x1e5   : > { %1385 = vst.msk [vmem:[%s2250_s27 + $0x24] sm:$0xf] %vm1375_vm1, %v1651_v35  ;;  %v1195_v40 = vadd.f32 %v1104_v39, %v701_v34  ;;  %v1801_v56 = vpop.f32.mrb[18].mxu1  ;;  %v713_v39 = vadd.f32 %v2234_v20, %v2217_v13 }
 0x1e6   : > { %v1229_v41 = vmax.f32 %v1197_v38, 0.0  ;;  %v1198_v42 = vadd.f32 %v1801_v56, %v704_v37  ;;  %v1107_v43 = vpop.f32.mrb[19].mxu1  ;;  %v715_v38 = vadd.f32 %v2215_v12, %v2234_v20  ;;  %v716_v56 = vadd.f32 %v2219_v14, %v2234_v20 }
 0x1e7   : > { %v1227_v44 = vmax.f32 %v1195_v40, 0.0  ;;  %v1196_v45 = vadd.f32 %v1107_v43, %v702_v55  ;;  %v714_v12 = vadd.f32 %v2234_v20, %v2221_v15 }
 0x1e8   : > { %v1656_v57 = vpack.c.bf16 %v1229_v41, %v1229_v41  ;;  %v1230_v46 = vmax.f32 %v1198_v42, 0.0 }
 0x1e9   : > { %v1654_v47 = vpack.c.bf16 %v1227_v44, %v1227_v44  ;;  %v1228_v48 = vmax.f32 %v1196_v45, 0.0 }
 0x1ea   : > { %1390 = vst.msk [vmem:[%s2250_s27 + $0x38] sm:$0xf] %vm1375_vm1, %v1656_v57  ;;  %v1657_v58 = vpack.c.bf16 %v1230_v46, %v1230_v46 }
 0x1eb   : > { %1388 = vst.msk [vmem:[%s2250_s27 + $0x30] sm:$0xf] %vm1375_vm1, %v1654_v47  ;;  %v1655_v59 = vpack.c.bf16 %v1228_v48, %v1228_v48  ;;  %v1804_v60 = vpop.f32.mrb[20].mxu1 }
 0x1ec   : > { %1391 = vst.msk [vmem:[%s2250_s27 + $0x3c] sm:$0xf] %vm1375_vm1, %v1657_v58  ;;  %v1201_v2 = vadd.f32 %v1804_v60, %v707_v53  ;;  %v1120_v7 = vpop.f32.mrb[21].mxu1 }
 0x1ed   : > { %1389 = vst.msk [vmem:[%s2250_s27 + $0x34] sm:$0xf] %vm1375_vm1, %v1655_v59  ;;  %v1199_v8 = vadd.f32 %v1120_v7, %v705_v54  ;;  %v1805_v62 = vpop.f32.mrb[22].mxu1  ;;  %v719_v54 = vadd.f32 %v2223_v16, %v2234_v20  ;;  %v717_v59 = vadd.f32 %v2234_v20, %v2225_v17  ;;  %v718_v16 = vadd.f32 %v2234_v20, %v2229_v19 }
 0x1ee   : > { %v1233_v9 = vmax.f32 %v1201_v2, 0.0  ;;  %v1202_v10 = vadd.f32 %v1805_v62, %v708_v1  ;;  %v1123_v11 = vpop.f32.mrb[23].mxu1  ;;  %v720_v2 = vadd.f32 %v2227_v18, %v2234_v20 }
 0x1ef   : > { %v1231_v49 = vmax.f32 %v1199_v8, 0.0  ;;  %v1200_v21 = vadd.f32 %v1123_v11, %v706_v61 }
 0x1f0   : > { %v1660_v63 = vpack.c.bf16 %v1233_v9, %v1233_v9  ;;  %v1234_v22 = vmax.f32 %v1202_v10, 0.0 }
 0x1f1   : > { %v1658_v50 = vpack.c.bf16 %v1231_v49, %v1231_v49  ;;  %v1232_v23 = vmax.f32 %v1200_v21, 0.0 }
 0x1f2   : > { %1394 = vst.msk [vmem:[%s2250_s27 + $0x48] sm:$0xf] %vm1375_vm1, %v1660_v63  ;;  %v1661_v0 = vpack.c.bf16 %v1234_v22, %v1234_v22 }
 0x1f3   : > { %1392 = vst.msk [vmem:[%s2250_s27 + $0x40] sm:$0xf] %vm1375_vm1, %v1658_v50  ;;  %v1659_v26 = vpack.c.bf16 %v1232_v23, %v1232_v23  ;;  %v1808_v51 = vpop.f32.mrb[24].mxu1 }
 0x1f4   : > { %1395 = vst.msk [vmem:[%s2250_s27 + $0x4c] sm:$0xf] %vm1375_vm1, %v1661_v0  ;;  %v1205_v28 = vadd.f32 %v1808_v51, %v711_v24  ;;  %v1136_v29 = vpop.f32.mrb[25].mxu1 }
 0x1f5   : > { %1393 = vst.msk [vmem:[%s2250_s27 + $0x44] sm:$0xf] %vm1375_vm1, %v1659_v26  ;;  %v1203_v30 = vadd.f32 %v1136_v29, %v709_v25  ;;  %v1809_v4 = vpop.f32.mrb[26].mxu1 }
 0x1f6   : > { %v1237_v31 = vmax.f32 %v1205_v28, 0.0  ;;  %v1206_v32 = vadd.f32 %v1809_v4, %v712_v27  ;;  %v1139_v52 = vpop.f32.mrb[27].mxu1 }
 0x1f7   : > { %v1235_v33 = vmax.f32 %v1203_v30, 0.0  ;;  %v1204_v34 = vadd.f32 %v1139_v52, %v710_v3 }
 0x1f8   : > { %v1664_v5 = vpack.c.bf16 %v1237_v31, %v1237_v31  ;;  %v1238_v35 = vmax.f32 %v1206_v32, 0.0 }
 0x1f9   : > { %v1662_v36 = vpack.c.bf16 %v1235_v33, %v1235_v33  ;;  %v1236_v37 = vmax.f32 %v1204_v34, 0.0 }
 0x1fa   : > { %1398 = vst.msk [vmem:[%s2250_s27 + $0x58] sm:$0xf] %vm1375_vm1, %v1664_v5  ;;  %v1665_v6 = vpack.c.bf16 %v1238_v35, %v1238_v35 }
 0x1fb   : > { %1396 = vst.msk [vmem:[%s2250_s27 + $0x50] sm:$0xf] %vm1375_vm1, %v1662_v36  ;;  %v1663_v55 = vpack.c.bf16 %v1236_v37, %v1236_v37  ;;  %v1812_v40 = vpop.f32.mrb[28].mxu1 }
 0x1fc   : > { %1399 = vst.msk [vmem:[%s2250_s27 + $0x5c] sm:$0xf] %vm1375_vm1, %v1665_v6  ;;  %v1209_v41 = vadd.f32 %v1812_v40, %v715_v38  ;;  %v1152_v42 = vpop.f32.mrb[29].mxu1 }
 0x1fd   : > { %1397 = vst.msk [vmem:[%s2250_s27 + $0x54] sm:$0xf] %vm1375_vm1, %v1663_v55  ;;  %v1207_v43 = vadd.f32 %v1152_v42, %v713_v39  ;;  %v1813_v13 = vpop.f32.mrb[30].mxu1 }
 0x1fe   : > { %v1241_v44 = vmax.f32 %v1209_v41, 0.0  ;;  %v1210_v45 = vadd.f32 %v1813_v13, %v716_v56  ;;  %v1155_v57 = vpop.f32.mrb[31].mxu1 }
 0x1ff   : > { %v1239_v46 = vmax.f32 %v1207_v43, 0.0  ;;  %v1208_v47 = vadd.f32 %v1155_v57, %v714_v12 }
 0x200   : > { %v1668_v14 = vpack.c.bf16 %v1241_v44, %v1241_v44  ;;  %v1242_v48 = vmax.f32 %v1210_v45, 0.0 }
 0x201   : > { %v1666_v53 = vpack.c.bf16 %v1239_v46, %v1239_v46  ;;  %v1240_v58 = vmax.f32 %v1208_v47, 0.0 }
 0x202   : > { %1402 = vst.msk [vmem:[%s2250_s27 + $0x68] sm:$0xf] %vm1375_vm1, %v1668_v14  ;;  %v1669_v15 = vpack.c.bf16 %v1242_v48, %v1242_v48 }
 0x203   : > { %1400 = vst.msk [vmem:[%s2250_s27 + $0x60] sm:$0xf] %vm1375_vm1, %v1666_v53  ;;  %v1667_v60 = vpack.c.bf16 %v1240_v58, %v1240_v58  ;;  %v1816_v1 = vpop.f32.mrb[32].mxu1 }
 0x204   : > { %1403 = vst.msk [vmem:[%s2250_s27 + $0x6c] sm:$0xf] %vm1375_vm1, %v1669_v15  ;;  %v1213_v7 = vadd.f32 %v1816_v1, %v719_v54  ;;  %v1168_v61 = vpop.f32.mrb[33].mxu1 }
 0x205   : > { %1401 = vst.msk [vmem:[%s2250_s27 + $0x64] sm:$0xf] %vm1375_vm1, %v1667_v60  ;;  %v1211_v17 = vadd.f32 %v1168_v61, %v717_v59  ;;  %v1817_v8 = vpop.f32.mrb[34].mxu1 }
 0x206   : > { %v1245_v62 = vmax.f32 %v1213_v7, 0.0  ;;  %v1214_v9 = vadd.f32 %v1817_v8, %v720_v2  ;;  %v1171_v10 = vpop.f32.mrb[35].mxu1 }
 0x207   : > { %v1243_v11 = vmax.f32 %v1211_v17, 0.0  ;;  %v1212_v18 = vadd.f32 %v1171_v10, %v718_v16 }
 0x208   : > { %v1672_v49 = vpack.c.bf16 %v1245_v62, %v1245_v62  ;;  %v1246_v21 = vmax.f32 %v1214_v9, 0.0 }
 0x209   : > { %v1670_v63 = vpack.c.bf16 %v1243_v11, %v1243_v11  ;;  %v1244_v22 = vmax.f32 %v1212_v18, 0.0 }
 0x20a   : > { %1406 = vst.msk [vmem:[%s2250_s27 + $0x78] sm:$0xf] %vm1375_vm1, %v1672_v49  ;;  %v1673_v50 = vpack.c.bf16 %v1246_v21, %v1246_v21 }
 0x20b   : > { %1404 = vst.msk [vmem:[%s2250_s27 + $0x70] sm:$0xf] %vm1375_vm1, %v1670_v63  ;;  %v1671_v19 = vpack.c.bf16 %v1244_v22, %v1244_v22 }
 0x20c   : > { %1407 = vst.msk [vmem:[%s2250_s27 + $0x7c] sm:$0xf] %vm1375_vm1, %v1673_v50 }
 0x20d   : > { %1405 = vst.msk [vmem:[%s2250_s27 + $0x74] sm:$0xf] %vm1375_vm1, %v1671_v19 }
 0x20e PF: > { %s16_s23 = sadd.s32 1, %s1980_s23   ;;  %s2381_s21 = smov %s1976_s22 }
 0x20f   : > { %p13_p5 = scmp.ge.s32.totalorder %s16_s23, 4   ;;  %s2382_s22 = smov %s2384_s24 }
 0x211   :  { %15 = sbr.rel (!%p13_p5) target bundleno = 2 (0x2), region = 77 }

// kernel: memseg_forward.9
= control target key start
LH: loop header
LB: loop body
LE: loop exit
PB: predicated region body
PF: predicated region fallthrough
CT: control target
= control target key end

     0   :  { %s5985_s27 = smov 0   ;;  %s5987_s28 = smov 0   ;;  %s7629_s0 = inlined_call_operand.vmem [shape: bf16[2,256,48], index: 0, kind: input, shape index: {}]   ;;  %s7630_s1 = inlined_call_operand.vmem [shape: bf16[1024,256], index: 1, kind: input, shape index: {}]   ;;  %s7631_s2 = inlined_call_operand.vmem [shape: bf16[48,48], index: 2, kind: input, shape index: {}]   ;;  %s7632_s3 = inlined_call_operand.vmem [shape: bf16[2,1024,64], index: 3, kind: input, shape index: {}]   ;;  %s7633_s4 = inlined_call_operand.vmem [shape: bf16[64,48], index: 4, kind: input, shape index: {}]   ;;  %s7634_s5 = inlined_call_operand.vmem [shape: f32[1,48], index: 5, kind: input, shape index: {}]   ;;  %s7635_s6 = inlined_call_operand.vmem [shape: bf16[48,2], index: 6, kind: input, shape index: {}]   ;;  %s7636_s7 = inlined_call_operand.vmem [shape: f32[1,2], index: 7, kind: input, shape index: {}]   ;;  %s7637_s8 = inlined_call_operand.vmem [shape: f32[2,1024,2], index: 8, kind: output, shape index: {}]  }
   0x1   :  { %s5989_s29 = smov 0  }
   0x2 LB: > { %s30_s30 = sadd.s32 1, %s5933_s28  ;;  %p4736_p0 = scmp.ge.s32.totalorder %s5937_s29, 1  ;;  %s5937_s29 = sphi %s5989_s29, %s18_s29   ;;  %s5933_s28 = sphi %s5987_s28, %s7803_s28   ;;  %s5929_s27 = sphi %s5985_s27, %s7802_s27  }
   0x3   : > { %p32_p1 = scmp.ge.s32.totalorder %s30_s30, 2  ;;  %p300_p2 = scmp.lt.s32.totalorder %s5937_s29, 3 }
   0x5   : > { %s7805_s30 = smov (%p32_p1, %s30_s30), 0  ;;  %p301_p3 = pnand %p4736_p0, %p300_p2 }
   0x7   : > { %304 = sbr.rel (%p301_p3) target bundleno = 1225 (0x4c9), region = 52 }
   0xe   : > { %v5631_v0 = vld [vmem:[%s7631_s2] sm:$0xff]   ;;  %p352_p4 = scmp.lt.s32.totalorder %s5929_s27, 1  ;;  %v5632_v1 = vld [vmem:[%s7631_s2 + $0x8] sm:$0xff]   ;;  %v5633_v3 = vld [vmem:[%s7631_s2 + $0x10] sm:$0xff]   ;;  %vm1871_vm0 = vcmask 392192   ;;  %vm863_vm1 = vcmask 523264  }
   0xf   : > { %5402 = vmatprep.subr.bf16.mxu1 %v5631_v0  ;;  %v5637_v2 = vld [vmem:[%s7633_s4] sm:$0xff]   ;;  %v5639_v4 = vld [vmem:[%s7633_s4 + $0x8] sm:$0xff]   ;;  %v5641_v8 = vld [vmem:[%s7633_s4 + $0x10] sm:$0xff]   ;;  %v5939_v46 = vmov 0   ;;  %vm4498_vm2 = vcmask 15360  }
  0x10   : > { %s7807_s27 = smov (!%p352_p4, %s5929_s27), 1  ;;  %5403 = vmatpush3.bf16.msra.mxu1 %v5631_v0  ;;  %5266 = vmatprep.subr.bf16.mxu0 %v5637_v2  ;;  %v5643_v9 = vld [vmem:[%s7633_s4 + $0x18] sm:$0xff]  }
  0x11   : > { %5404 = vmatprep.subr.bf16.mxu1 %v5632_v1  ;;  %s5109_s17 = sshll.u32 %s7807_s27, 7  ;;  %5267 = vmatpush3.bf16.msra.mxu0 %v5637_v2  ;;  %s5110_s23 = sshll.u32 %s7807_s27, 9  ;;  %v5723_v63 = vld [vmem:[%s7630_s1 + $0x34] ss:$8 sps:$4 sm:$0xff]  }
  0x12   : > { %s6021_s20 = scalar_lea.vmem %s7629_s0, %s5109_s17  ;;  %5268 = vmatprep.subr.bf16.mxu0 %v5639_v4  ;;  %s6034_s26 = scalar_lea.vmem %s7632_s3, %s5110_s23 }
  0x13   : > { %v5634_v5 = vld [vmem:[%s6021_s20] sm:$0xff]   ;;  %v5635_v6 = vld [vmem:[%s6021_s20 + $0x8] sm:$0xff]   ;;  %v5636_v7 = vld [vmem:[%s6021_s20 + $0x10] sm:$0xff]   ;;  %s5111_s25 = sshll.u32 %s7807_s27, 10 }
  0x14   : > { %5405 = vmatpush3.bf16.msra.mxu1 %v5632_v1  ;;  %5408 = vmatprep.mubr.msk.bf16.mxu1 %vm1871_vm0, %v5634_v5  ;;  %v5644_v10 = vld [vmem:[%s6034_s26] sm:$0xff]   ;;  %v5638_v11 = vld [vmem:[%s6021_s20 + $0x18] sm:$0xff]   ;;  %v5646_v12 = vld [vmem:[%s6034_s26 + $0x8] sm:$0xff]   ;;  %s7031_s13 = scalar_lea.vmem %s7637_s8, %s5111_s25 }
  0x15   : > { %5406 = vmatprep.subr.bf16.mxu1 %v5633_v3  ;;  %5269 = vmatpush3.bf16.msra.mxu0 %v5639_v4  ;;  %v5648_v13 = vld [vmem:[%s6034_s26 + $0x10] sm:$0xff]   ;;  %v5640_v14 = vld [vmem:[%s6021_s20 + $0x20] sm:$0xff]   ;;  %v5642_v15 = vld [vmem:[%s6021_s20 + $0x28] sm:$0xff]  }
  0x16   : > { %5270 = vmatprep.subr.bf16.mxu0 %v5641_v8  ;;  %5274 = vmatprep.mubr.msk.bf16.mxu0 %vm863_vm1, %v5644_v10  ;;  %v5650_v16 = vld [vmem:[%s6034_s26 + $0x18] sm:$0xff]   ;;  %v5652_v17 = vld [vmem:[%s6034_s26 + $0x20] sm:$0xff]   ;;  %v5645_v18 = vld [vmem:[%s6021_s20 + $0x30] sm:$0xff]  }
  0x17   : > { %v5647_v19 = vld [vmem:[%s6021_s20 + $0x38] sm:$0xff]   ;;  %v5654_v20 = vld [vmem:[%s6034_s26 + $0x28] sm:$0xff]   ;;  %v5656_v21 = vld [vmem:[%s6034_s26 + $0x30] sm:$0xff]  }
  0x18   : > { %5407 = vmatpush3.bf16.msra.mxu1 %v5633_v3  ;;  %v5649_v22 = vld [vmem:[%s6021_s20 + $0x40] sm:$0xff]   ;;  %v5651_v23 = vld [vmem:[%s6021_s20 + $0x48] sm:$0xff]   ;;  %v5658_v24 = vld [vmem:[%s6034_s26 + $0x38] sm:$0xff]  }
  0x19   : > { %5271 = vmatpush3.bf16.msra.mxu0 %v5641_v8  ;;  %v5660_v25 = vld [vmem:[%s6034_s26 + $0x40] sm:$0xff]   ;;  %v5653_v26 = vld [vmem:[%s6021_s20 + $0x50] sm:$0xff]   ;;  %v5655_v27 = vld [vmem:[%s6021_s20 + $0x58] sm:$0xff]   ;;  %5574 = vmatprep.subr.bf16.mxu1 %v5939_v46 }
  0x1a   : > { %5272 = vmatprep.subr.bf16.mxu0 %v5643_v9  ;;  %v5662_v28 = vld [vmem:[%s6034_s26 + $0x48] sm:$0xff]   ;;  %v5664_v29 = vld [vmem:[%s6034_s26 + $0x50] sm:$0xff]   ;;  %v5657_v30 = vld [vmem:[%s6021_s20 + $0x60] sm:$0xff]  }
  0x1b   : > { %5409 = vmatmul.mubr.msk.bf16.vlgmr.msra.gmra.mrb[0].mxu1 %vm1871_vm0, %v5635_v6  ;;  %v5659_v31 = vld [vmem:[%s6021_s20 + $0x68] sm:$0xff]   ;;  %v5665_v32 = vld [vmem:[%s6034_s26 + $0x58] sm:$0xff]   ;;  %v5666_v33 = vld [vmem:[%s6034_s26 + $0x60] sm:$0xff]  }
  0x1c   : > { %5412 = vmatprep.mubr.msk.bf16.mxu1 %vm1871_vm0, %v5636_v7  ;;  %v5661_v34 = vld [vmem:[%s6021_s20 + $0x70] sm:$0xff]   ;;  %v5663_v35 = vld [vmem:[%s6021_s20 + $0x78] sm:$0xff]   ;;  %v5667_v36 = vld [vmem:[%s6034_s26 + $0x68] sm:$0xff]  }
  0x1d   : > { %5273 = vmatpush3.bf16.msra.mxu0 %v5643_v9  ;;  %v5668_v37 = vld [vmem:[%s6034_s26 + $0x70] sm:$0xff]   ;;  %v5669_v38 = vld [vmem:[%s6034_s26 + $0x78] sm:$0xff]   ;;  %v5670_v39 = vld [vmem:[%s6034_s26 + $0x80] sm:$0xff]  }
  0x1e   : > { %v5671_v40 = vld [vmem:[%s6034_s26 + $0x88] sm:$0xff]   ;;  %v5672_v41 = vld [vmem:[%s6034_s26 + $0x90] sm:$0xff]   ;;  %v5673_v42 = vld [vmem:[%s6034_s26 + $0x98] sm:$0xff]   ;;  %2865 = vmatprep.subr.bf16.mxu0 %v5939_v46 }
  0x1f   : > { %v5674_v43 = vld [vmem:[%s6034_s26 + $0xa0] sm:$0xff]   ;;  %v5675_v44 = vld [vmem:[%s6034_s26 + $0xa8] sm:$0xff]   ;;  %v5676_v45 = vld [vmem:[%s6034_s26 + $0xb0] sm:$0xff]  }
  0x20   : > { %5275 = vmatmul.mubr.msk.bf16.vlgmr.msra.gmra.mrb[0].mxu0 %vm863_vm1, %v5646_v12  ;;  %v5677_v47 = vld [vmem:[%s6034_s26 + $0xb8] sm:$0xff]   ;;  %v5678_v48 = vld [vmem:[%s6034_s26 + $0xc0] sm:$0xff]   ;;  %v5679_v49 = vld [vmem:[%s6034_s26 + $0xc8] sm:$0xff]  }
  0x21   : > { %5278 = vmatprep.mubr.msk.bf16.mxu0 %vm863_vm1, %v5648_v13  ;;  %v5680_v50 = vld [vmem:[%s6034_s26 + $0xd0] sm:$0xff]   ;;  %v5681_v51 = vld [vmem:[%s6034_s26 + $0xd8] sm:$0xff]   ;;  %v5682_v52 = vld [vmem:[%s6034_s26 + $0xe0] sm:$0xff]  }
  0x22   : > { %v5683_v53 = vld [vmem:[%s6034_s26 + $0xe8] sm:$0xff]   ;;  %v5684_v54 = vld [vmem:[%s6034_s26 + $0xf0] sm:$0xff]   ;;  %v5685_v55 = vld [vmem:[%s6034_s26 + $0xf8] sm:$0xff]  }
  0x23   : > { %5413 = vmatmul.mubr.msk.bf16.gmra.mrb[4].mxu1 %vm1871_vm0, %v5638_v11  ;;  %v5686_v56 = vld [vmem:[%s6034_s26 + $0x100] sm:$0xff]   ;;  %v5687_v57 = vld [vmem:[%s6034_s26 + $0x108] sm:$0xff]   ;;  %v5688_v58 = vld [vmem:[%s6034_s26 + $0x110] sm:$0xff]  }
  0x24   : > { %5416 = vmatprep.mubr.msk.bf16.mxu1 %vm1871_vm0, %v5640_v14  ;;  %v5689_v59 = vld [vmem:[%s6034_s26 + $0x118] sm:$0xff]   ;;  %v5690_v60 = vld [vmem:[%s6034_s26 + $0x120] sm:$0xff]   ;;  %v5691_v61 = vld [vmem:[%s6034_s26 + $0x128] sm:$0xff]  }
  0x25   : > { %v5692_v62 = vld [vmem:[%s6034_s26 + $0x130] sm:$0xff]   ;;  %v5693_v0 = vld [vmem:[%s6034_s26 + $0x138] sm:$0xff]   ;;  %v5694_v1 = vld [vmem:[%s6034_s26 + $0x140] sm:$0xff]  }
  0x26   : > { %v5695_v2 = vld [vmem:[%s6034_s26 + $0x148] sm:$0xff]   ;;  %v5696_v3 = vld [vmem:[%s6034_s26 + $0x150] sm:$0xff]   ;;  %v5697_v4 = vld [vmem:[%s6034_s26 + $0x158] sm:$0xff]  }
  0x27   : > { %v5698_v5 = vld [vmem:[%s6034_s26 + $0x160] sm:$0xff]   ;;  %v5699_v6 = vld [vmem:[%s6034_s26 + $0x168] sm:$0xff]   ;;  %v5700_v7 = vld [vmem:[%s6034_s26 + $0x170] sm:$0xff]  }
  0x28   : > { %5279 = vmatmul.mubr.msk.bf16.gmra.mrb[4].mxu0 %vm863_vm1, %v5650_v16  ;;  %v5701_v8 = vld [vmem:[%s6034_s26 + $0x178] sm:$0xff]   ;;  %v5702_v9 = vld [vmem:[%s6034_s26 + $0x180] sm:$0xff]   ;;  %v5703_v10 = vld [vmem:[%s6034_s26 + $0x188] sm:$0xff]  }
  0x29   : > { %5282 = vmatprep.mubr.msk.bf16.mxu0 %vm863_vm1, %v5652_v17  ;;  %v5704_v11 = vld [vmem:[%s6034_s26 + $0x190] sm:$0xff]   ;;  %v5705_v12 = vld [vmem:[%s6034_s26 + $0x198] sm:$0xff]   ;;  %v5706_v13 = vld [vmem:[%s6034_s26 + $0x1a0] sm:$0xff]  }
  0x2a   : > { %v5708_v17 = vld [vmem:[%s6034_s26 + $0x1b0] sm:$0xff]  }
  0x2b   : > { %5417 = vmatmul.mubr.msk.bf16.gmra.mrb[8].mxu1 %vm1871_vm0, %v5642_v15  ;;  %v5707_v15 = vld [vmem:[%s6034_s26 + $0x1a8] sm:$0xff]  }
  0x2c   : > { %5420 = vmatprep.mubr.msk.bf16.mxu1 %vm1871_vm0, %v5645_v18 }
  0x30   : > { %5283 = vmatmul.mubr.msk.bf16.gmra.mrb[8].mxu0 %vm863_vm1, %v5654_v20 }
  0x31   : > { %5286 = vmatprep.mubr.msk.bf16.mxu0 %vm863_vm1, %v5656_v21 }
  0x33   : > { %5421 = vmatmul.mubr.msk.bf16.gmra.mrb[12].mxu1 %vm1871_vm0, %v5647_v19 }
  0x34   : > { %5424 = vmatprep.mubr.msk.bf16.mxu1 %vm1871_vm0, %v5649_v22 }
  0x38   : > { %5287 = vmatmul.mubr.msk.bf16.gmra.mrb[12].mxu0 %vm863_vm1, %v5658_v24 }
  0x39   : > { %5290 = vmatprep.mubr.msk.bf16.mxu0 %vm863_vm1, %v5660_v25  ;;  %v5710_v25 = vld [vmem:[%s6034_s26 + $0x1c0] sm:$0xff]  }
  0x3b   : > { %5425 = vmatmul.mubr.msk.bf16.gmra.mrb[16].mxu1 %vm1871_vm0, %v5651_v23  ;;  %v5709_v23 = vld [vmem:[%s6034_s26 + $0x1b8] sm:$0xff]  }
  0x3c   : > { %5428 = vmatprep.mubr.msk.bf16.mxu1 %vm1871_vm0, %v5653_v26 }
  0x40   : > { %5291 = vmatmul.mubr.msk.bf16.gmra.mrb[16].mxu0 %vm863_vm1, %v5662_v28 }
  0x41   : > { %5294 = vmatprep.mubr.msk.bf16.mxu0 %vm863_vm1, %v5664_v29 }
  0x43   : > { %5429 = vmatmul.mubr.msk.bf16.gmra.mrb[20].mxu1 %vm1871_vm0, %v5655_v27 }
  0x44   : > { %5432 = vmatprep.mubr.msk.bf16.mxu1 %vm1871_vm0, %v5657_v30 }
  0x48   : > { %5295 = vmatmul.mubr.msk.bf16.gmra.mrb[20].mxu0 %vm863_vm1, %v5665_v32 }
  0x49   : > { %5298 = vmatprep.mubr.msk.bf16.mxu0 %vm863_vm1, %v5666_v33  ;;  %v5712_v33 = vld [vmem:[%s6034_s26 + $0x1d0] sm:$0xff]  }
  0x4b   : > { %5433 = vmatmul.mubr.msk.bf16.gmra.mrb[24].mxu1 %vm1871_vm0, %v5659_v31  ;;  %v5711_v31 = vld [vmem:[%s6034_s26 + $0x1c8] sm:$0xff]  }
  0x4c   : > { %5436 = vmatprep.mubr.msk.bf16.mxu1 %vm1871_vm0, %v5661_v34 }
  0x50   : > { %5299 = vmatmul.mubr.msk.bf16.gmra.mrb[24].mxu0 %vm863_vm1, %v5667_v36 }
  0x51   : > { %5302 = vmatprep.mubr.msk.bf16.mxu0 %vm863_vm1, %v5668_v37 }
  0x53   : > { %5437 = vmatmul.mubr.msk.bf16.gmra.mrb[28].mxu1 %vm1871_vm0, %v5663_v35 }
  0x54   : > { %2921 = vmatprep.mubr.bf16.mxu1 %v5723_v63 }
  0x58   : > { %5303 = vmatmul.mubr.msk.bf16.gmra.mrb[28].mxu0 %vm863_vm1, %v5669_v38 }
  0x59   : > { %5306 = vmatprep.mubr.msk.bf16.mxu0 %vm863_vm1, %v5670_v39 }
  0x60   : > { %5307 = vmatmul.mubr.msk.bf16.gmra.mrb[32].mxu0 %vm863_vm1, %v5671_v40 }
  0x61   : > { %5310 = vmatprep.mubr.msk.bf16.mxu0 %vm863_vm1, %v5672_v41 }
  0x68   : > { %5311 = vmatmul.mubr.msk.bf16.gmra.mrb[36].mxu0 %vm863_vm1, %v5673_v42  ;;  %v5713_v42 = vld [vmem:[%s6034_s26 + $0x1d8] sm:$0xff]  }
  0x69   : > { %5314 = vmatprep.mubr.msk.bf16.mxu0 %vm863_vm1, %v5674_v43 }
  0x70   : > { %5315 = vmatmul.mubr.msk.bf16.gmra.mrb[40].mxu0 %vm863_vm1, %v5675_v44 }
  0x71   : > { %5318 = vmatprep.mubr.msk.bf16.mxu0 %vm863_vm1, %v5676_v45  ;;  %v5714_v45 = vld [vmem:[%s6034_s26 + $0x1e0] sm:$0xff]  }
  0x78   : > { %5319 = vmatmul.mubr.msk.bf16.gmra.mrb[44].mxu0 %vm863_vm1, %v5677_v47 }
  0x79   : > { %5322 = vmatprep.mubr.msk.bf16.mxu0 %vm863_vm1, %v5678_v48 }
  0x80   : > { %5323 = vmatmul.mubr.msk.bf16.gmra.mrb[48].mxu0 %vm863_vm1, %v5679_v49 }
  0x81   : > { %5326 = vmatprep.mubr.msk.bf16.mxu0 %vm863_vm1, %v5680_v50 }
  0x88   : > { %5327 = vmatmul.mubr.msk.bf16.gmra.mrb[52].mxu0 %vm863_vm1, %v5681_v51 }
  0x89   : > { %5330 = vmatprep.mubr.msk.bf16.mxu0 %vm863_vm1, %v5682_v52 }
  0x90   : > { %5331 = vmatmul.mubr.msk.bf16.gmra.mrb[56].mxu0 %vm863_vm1, %v5683_v53 }
  0x91   : > { %5334 = vmatprep.mubr.msk.bf16.mxu0 %vm863_vm1, %v5684_v54 }
  0x98   : > { %5335 = vmatmul.mubr.msk.bf16.gmra.mrb[60].mxu0 %vm863_vm1, %v5685_v55 }
  0x99   : > { %5338 = vmatprep.mubr.msk.bf16.mxu0 %vm863_vm1, %v5686_v56 }
  0xa0   : > { %5339 = vmatmul.mubr.msk.bf16.gmra.mrb[64].mxu0 %vm863_vm1, %v5687_v57  ;;  %v5715_v57 = vld [vmem:[%s6034_s26 + $0x1e8] sm:$0xff]  }
  0xa1   : > { %5342 = vmatprep.mubr.msk.bf16.mxu0 %vm863_vm1, %v5688_v58 }
  0xa8   : > { %5343 = vmatmul.mubr.msk.bf16.gmra.mrb[68].mxu0 %vm863_vm1, %v5689_v59 }
  0xa9   : > { %5346 = vmatprep.mubr.msk.bf16.mxu0 %vm863_vm1, %v5690_v60  ;;  %v5716_v60 = vld [vmem:[%s6034_s26 + $0x1f0] sm:$0xff]  }
  0xb0   : > { %5347 = vmatmul.mubr.msk.bf16.gmra.mrb[72].mxu0 %vm863_vm1, %v5691_v61 }
  0xb1   : > { %5350 = vmatprep.mubr.msk.bf16.mxu0 %vm863_vm1, %v5692_v62 }
  0xb8   : > { %5351 = vmatmul.mubr.msk.bf16.gmra.mrb[76].mxu0 %vm863_vm1, %v5693_v0 }
  0xb9   : > { %5354 = vmatprep.mubr.msk.bf16.mxu0 %vm863_vm1, %v5694_v1 }
  0xc0   : > { %5355 = vmatmul.mubr.msk.bf16.gmra.mrb[80].mxu0 %vm863_vm1, %v5695_v2 }
  0xc1   : > { %5358 = vmatprep.mubr.msk.bf16.mxu0 %vm863_vm1, %v5696_v3 }
  0xc8   : > { %5359 = vmatmul.mubr.msk.bf16.gmra.mrb[84].mxu0 %vm863_vm1, %v5697_v4 }
  0xc9   : > { %5362 = vmatprep.mubr.msk.bf16.mxu0 %vm863_vm1, %v5698_v5 }
  0xd0   : > { %5363 = vmatmul.mubr.msk.bf16.gmra.mrb[88].mxu0 %vm863_vm1, %v5699_v6 }
  0xd1   : > { %5366 = vmatprep.mubr.msk.bf16.mxu0 %vm863_vm1, %v5700_v7 }
  0xd8   : > { %5367 = vmatmul.mubr.msk.bf16.gmra.mrb[92].mxu0 %vm863_vm1, %v5701_v8 }
  0xd9   : > { %5370 = vmatprep.mubr.msk.bf16.mxu0 %vm863_vm1, %v5702_v9  ;;  %v5717_v9 = vld [vmem:[%s6034_s26 + $0x1f8] sm:$0xff]  }
  0xe0   : > { %5371 = vmatmul.mubr.msk.bf16.gmra.mrb[96].mxu0 %vm863_vm1, %v5703_v10 }
  0xe1   : > { %5374 = vmatprep.mubr.msk.bf16.mxu0 %vm863_vm1, %v5704_v11 }
  0xe8   : > { %5375 = vmatmul.mubr.msk.bf16.gmra.mrb[100].mxu0 %vm863_vm1, %v5705_v12  ;;  %v5720_v12 = vld [vmem:[%s7630_s1 + $0x4] ss:$8 sps:$4 sm:$0xff]  }
  0xe9   : > { %5378 = vmatprep.mubr.msk.bf16.mxu0 %vm863_vm1, %v5706_v13 }
  0xee   : > { %v5410_v14 = vpop.f32.mrb[0].mxu1 }
  0xef   : > { %v1954_v16 = vpop.f32.mrb[1].mxu1 }
  0xf0   : > { %v5411_v18 = vpop.f32.mrb[2].mxu1  ;;  %5379 = vmatmul.mubr.msk.bf16.gmra.mrb[104].mxu0 %vm863_vm1, %v5707_v15 }
  0xf1   : > { %v2210_v19 = vpack.c.bf16 %v5411_v18, %v5410_v14  ;;  %v1957_v20 = vpop.f32.mrb[3].mxu1  ;;  %5382 = vmatprep.mubr.msk.bf16.mxu0 %vm863_vm1, %v5708_v17 }
  0xf2   : > { %v2209_v21 = vpack.c.bf16 %v1957_v20, %v1954_v16 }
  0xf3   : > { %v6201_v38 = vpop.f32.mrb[0].mxu0 }
  0xf4   : > { %2866 = vmatpush1.bf16.msra.mxu0 %v2209_v21  ;;  %5590 = vmatpush1.bf16.msra.mxu1 %v2209_v21  ;;  %v6203_v39 = vpop.f32.mrb[1].mxu0 }
  0xf5   : > { %2867 = vmatprep.subr.bf16.mxu0 %v5939_v46  ;;  %5575 = vmatprep.subr.bf16.mxu1 %v5939_v46  ;;  %v6207_v40 = vpop.f32.mrb[2].mxu0 }
  0xf6   : > { %v5414_v22 = vpop.f32.mrb[4].mxu1  ;;  %v6210_v43 = vpop.f32.mrb[3].mxu0 }
  0xf7   : > { %v1970_v24 = vpop.f32.mrb[5].mxu1 }
  0xf8   : > { %v5415_v26 = vpop.f32.mrb[6].mxu1  ;;  %2868 = vmatpush1.bf16.msra.mxu0 %v2210_v19  ;;  %5591 = vmatpush1.bf16.msra.mxu1 %v2210_v19 }
  0xf9   : > { %v2212_v27 = vpack.c.bf16 %v5415_v26, %v5414_v22  ;;  %v1973_v28 = vpop.f32.mrb[7].mxu1  ;;  %2869 = vmatprep.subr.bf16.mxu0 %v5939_v46  ;;  %5576 = vmatprep.subr.bf16.mxu1 %v5939_v46 }
  0xfa   : > { %v2211_v29 = vpack.c.bf16 %v1973_v28, %v1970_v24  ;;  %5383 = vmatmul.mubr.msk.bf16.gmra.mrb[108].mxu0 %vm863_vm1, %v5709_v23 }
  0xfb   : > { %5386 = vmatprep.mubr.msk.bf16.mxu0 %vm863_vm1, %v5710_v25  ;;  %v6213_v47 = vpop.f32.mrb[4].mxu0 }
  0xfc   : > { %2870 = vmatpush1.bf16.msra.mxu0 %v2211_v29  ;;  %5592 = vmatpush1.bf16.msra.mxu1 %v2211_v29  ;;  %v6215_v49 = vpop.f32.mrb[5].mxu0 }
  0xfd   : > { %2871 = vmatprep.subr.bf16.mxu0 %v5939_v46  ;;  %5577 = vmatprep.subr.bf16.mxu1 %v5939_v46  ;;  %v6221_v53 = vpop.f32.mrb[6].mxu0 }
  0xfe   : > { %v5418_v30 = vpop.f32.mrb[8].mxu1  ;;  %v6223_v54 = vpop.f32.mrb[7].mxu0 }
  0xff   : > { %v1986_v32 = vpop.f32.mrb[9].mxu1 }
 0x100   : > { %v5419_v34 = vpop.f32.mrb[10].mxu1  ;;  %2872 = vmatpush1.bf16.msra.mxu0 %v2212_v27  ;;  %5593 = vmatpush1.bf16.msra.mxu1 %v2212_v27 }
 0x101   : > { %v2214_v35 = vpack.c.bf16 %v5419_v34, %v5418_v30  ;;  %v1989_v36 = vpop.f32.mrb[11].mxu1  ;;  %2873 = vmatprep.subr.bf16.mxu0 %v5939_v46  ;;  %5578 = vmatprep.subr.bf16.mxu1 %v5939_v46 }
 0x102   : > { %v2213_v37 = vpack.c.bf16 %v1989_v36, %v1986_v32  ;;  %5387 = vmatmul.mubr.msk.bf16.gmra.mrb[112].mxu0 %vm863_vm1, %v5711_v31 }
 0x103   : > { %5390 = vmatprep.mubr.msk.bf16.mxu0 %vm863_vm1, %v5712_v33  ;;  %v6227_v55 = vpop.f32.mrb[8].mxu0 }
 0x104   : > { %2874 = vmatpush1.bf16.msra.mxu0 %v2213_v37  ;;  %5594 = vmatpush1.bf16.msra.mxu1 %v2213_v37  ;;  %v6230_v58 = vpop.f32.mrb[9].mxu0 }
 0x105   : > { %2875 = vmatprep.subr.bf16.mxu0 %v5939_v46  ;;  %5579 = vmatprep.subr.bf16.mxu1 %v5939_v46  ;;  %v6233_v61 = vpop.f32.mrb[10].mxu0 }
 0x106   : > { %v5422_v41 = vpop.f32.mrb[12].mxu1  ;;  %v6235_v63 = vpop.f32.mrb[11].mxu0 }
 0x107   : > { %v2002_v44 = vpop.f32.mrb[13].mxu1 }
 0x108   : > { %v5423_v48 = vpop.f32.mrb[14].mxu1  ;;  %2876 = vmatpush1.bf16.msra.mxu0 %v2214_v35  ;;  %5595 = vmatpush1.bf16.msra.mxu1 %v2214_v35 }
 0x109   : > { %v2216_v50 = vpack.c.bf16 %v5423_v48, %v5422_v41  ;;  %v2005_v51 = vpop.f32.mrb[15].mxu1  ;;  %2877 = vmatprep.subr.bf16.mxu0 %v5939_v46  ;;  %5580 = vmatprep.subr.bf16.mxu1 %v5939_v46  ;;  %v5721_v48 = vld [vmem:[%s7630_s1 + $0x30] ss:$8 sps:$4 sm:$0xff]  }
 0x10a   : > { %v2215_v52 = vpack.c.bf16 %v2005_v51, %v2002_v44  ;;  %5391 = vmatmul.mubr.msk.bf16.gmra.mrb[116].mxu0 %vm863_vm1, %v5713_v42  ;;  %v5726_v51 = vld [vmem:[%s7630_s1 + $0x44] ss:$8 sps:$4 sm:$0xff]  }
 0x10b   : > { %5394 = vmatprep.mubr.msk.bf16.mxu0 %vm863_vm1, %v5714_v45  ;;  %v6239_v2 = vpop.f32.mrb[12].mxu0  ;;  %v5718_v45 = vld [vmem:[%s7630_s1] ss:$8 sps:$4 sm:$0xff]  }
 0x10c   : > { %2878 = vmatpush1.bf16.msra.mxu0 %v2215_v52  ;;  %5596 = vmatpush1.bf16.msra.mxu1 %v2215_v52  ;;  %v6242_v4 = vpop.f32.mrb[13].mxu0 }
 0x10d   : > { %2879 = vmatprep.subr.bf16.mxu0 %v5939_v46  ;;  %5581 = vmatprep.subr.bf16.mxu1 %v5939_v46  ;;  %v6245_v5 = vpop.f32.mrb[14].mxu0 }
 0x10e   : > { %v5426_v56 = vpop.f32.mrb[16].mxu1  ;;  %v6247_v6 = vpop.f32.mrb[15].mxu0 }
 0x10f   : > { %v2018_v59 = vpop.f32.mrb[17].mxu1 }
 0x110   : > { %v5427_v62 = vpop.f32.mrb[18].mxu1  ;;  %2880 = vmatpush1.bf16.msra.mxu0 %v2216_v50  ;;  %5597 = vmatpush1.bf16.msra.mxu1 %v2216_v50 }
 0x111   : > { %v2218_v0 = vpack.c.bf16 %v5427_v62, %v5426_v56  ;;  %v2021_v1 = vpop.f32.mrb[19].mxu1  ;;  %2881 = vmatprep.subr.bf16.mxu0 %v5939_v46  ;;  %5582 = vmatprep.subr.bf16.mxu1 %v5939_v46 }
 0x112   : > { %v2217_v3 = vpack.c.bf16 %v2021_v1, %v2018_v59  ;;  %5395 = vmatmul.mubr.msk.bf16.gmra.mrb[120].mxu0 %vm863_vm1, %v5715_v57  ;;  %v5728_v59 = vld [vmem:[%s7630_s1 + $0x10] ss:$8 sps:$4 sm:$0xff]   ;;  %v5732_v1 = vld [vmem:[%s7630_s1 + $0x54] ss:$8 sps:$4 sm:$0xff]  }
 0x113   : > { %5398 = vmatprep.mubr.msk.bf16.mxu0 %vm863_vm1, %v5716_v60  ;;  %v6251_v7 = vpop.f32.mrb[16].mxu0  ;;  %v5729_v60 = vld [vmem:[%s7630_s1 + $0x40] ss:$8 sps:$4 sm:$0xff]  }
 0x114   : > { %2882 = vmatpush1.bf16.msra.mxu0 %v2217_v3  ;;  %5598 = vmatpush1.bf16.msra.mxu1 %v2217_v3  ;;  %v6254_v10 = vpop.f32.mrb[17].mxu0 }
 0x115   : > { %2883 = vmatprep.subr.bf16.mxu0 %v5939_v46  ;;  %5583 = vmatprep.subr.bf16.mxu1 %v5939_v46  ;;  %v6259_v13 = vpop.f32.mrb[18].mxu0 }
 0x116   : > { %v5430_v8 = vpop.f32.mrb[20].mxu1  ;;  %v6261_v15 = vpop.f32.mrb[19].mxu0 }
 0x117   : > { %v2034_v11 = vpop.f32.mrb[21].mxu1 }
 0x118   : > { %v5431_v14 = vpop.f32.mrb[22].mxu1  ;;  %2884 = vmatpush1.bf16.msra.mxu0 %v2218_v0  ;;  %5599 = vmatpush1.bf16.msra.mxu1 %v2218_v0  ;;  %v5730_v0 = vld [vmem:[%s7630_s1 + $0x24] ss:$8 sps:$4 sm:$0xff]  }
 0x119   : > { %v2220_v16 = vpack.c.bf16 %v5431_v14, %v5430_v8  ;;  %v2037_v17 = vpop.f32.mrb[23].mxu1  ;;  %2885 = vmatprep.subr.bf16.mxu0 %v5939_v46  ;;  %5584 = vmatprep.subr.bf16.mxu1 %v5939_v46 }
 0x11a   : > { %v2219_v18 = vpack.c.bf16 %v2037_v17, %v2034_v11  ;;  %5399 = vmatmul.mubr.msk.bf16.gmra.mrb[124].mxu0 %vm863_vm1, %v5717_v9  ;;  %v5734_v11 = vld [vmem:[%s7630_s1 + $0x20] ss:$8 sps:$4 sm:$0xff]  }
 0x11b   : > { %2897 = vmatprep.mubr.bf16.mxu0 %v5720_v12  ;;  %v6268_v19 = vpop.f32.mrb[20].mxu0  ;;  %v5735_v12 = vld [vmem:[%s7630_s1 + $0x50] ss:$8 sps:$4 sm:$0xff]  }
 0x11c   : > { %2886 = vmatpush1.bf16.msra.mxu0 %v2219_v18  ;;  %5600 = vmatpush1.bf16.msra.mxu1 %v2219_v18  ;;  %v6270_v21 = vpop.f32.mrb[21].mxu0 }
 0x11d   : > { %2887 = vmatprep.subr.bf16.mxu0 %v5939_v46  ;;  %5585 = vmatprep.subr.bf16.mxu1 %v5939_v46  ;;  %v6272_v23 = vpop.f32.mrb[22].mxu0 }
 0x11e   : > { %v5434_v20 = vpop.f32.mrb[24].mxu1  ;;  %v6274_v25 = vpop.f32.mrb[23].mxu0 }
 0x11f   : > { %v2050_v22 = vpop.f32.mrb[25].mxu1 }
 0x120   : > { %v5435_v24 = vpop.f32.mrb[26].mxu1  ;;  %2888 = vmatpush1.bf16.msra.mxu0 %v2220_v16  ;;  %5601 = vmatpush1.bf16.msra.mxu1 %v2220_v16  ;;  %v5736_v16 = vld [vmem:[%s7630_s1 + $0x64] ss:$8 sps:$4 sm:$0xff]  }
 0x121   : > { %v2222_v26 = vpack.c.bf16 %v5435_v24, %v5434_v20  ;;  %v2053_v27 = vpop.f32.mrb[27].mxu1  ;;  %2889 = vmatprep.subr.bf16.mxu0 %v5939_v46  ;;  %5586 = vmatprep.subr.bf16.mxu1 %v5939_v46 }
 0x122   : > { %v2221_v28 = vpack.c.bf16 %v2053_v27, %v2050_v22  ;;  %v5738_v22 = vld [vmem:[%s7630_s1 + $0x60] ss:$8 sps:$4 sm:$0xff]  }
 0x123   : > { %v6280_v29 = vpop.f32.mrb[24].mxu0 }
 0x124   : > { %2890 = vmatpush1.bf16.msra.mxu0 %v2221_v28  ;;  %5602 = vmatpush1.bf16.msra.mxu1 %v2221_v28  ;;  %v6282_v31 = vpop.f32.mrb[25].mxu0 }
 0x125   : > { %2891 = vmatprep.subr.bf16.mxu0 %v5939_v46  ;;  %5587 = vmatprep.subr.bf16.mxu1 %v5939_v46  ;;  %v6284_v33 = vpop.f32.mrb[26].mxu0 }
 0x126   : > { %v5438_v30 = vpop.f32.mrb[28].mxu1  ;;  %v6286_v35 = vpop.f32.mrb[27].mxu0 }
 0x127   : > { %v2066_v32 = vpop.f32.mrb[29].mxu1 }
 0x128   : > { %v5439_v34 = vpop.f32.mrb[30].mxu1  ;;  %2892 = vmatpush1.bf16.msra.mxu0 %v2222_v26  ;;  %5603 = vmatpush1.bf16.msra.mxu1 %v2222_v26  ;;  %v5739_v26 = vld [vmem:[%s7630_s1 + $0x74] ss:$8 sps:$4 sm:$0xff]  }
 0x129   : > { %v2224_v36 = vpack.c.bf16 %v5439_v34, %v5438_v30  ;;  %v2069_v37 = vpop.f32.mrb[31].mxu1  ;;  %2893 = vmatprep.subr.bf16.mxu0 %v5939_v46  ;;  %5588 = vmatprep.subr.bf16.mxu1 %v5939_v46 }
 0x12a   : > { %v2223_v41 = vpack.c.bf16 %v2069_v37, %v2066_v32  ;;  %v5741_v32 = vld [vmem:[%s7630_s1 + $0x70] ss:$8 sps:$4 sm:$0xff]  }
 0x12b   : > { %v6292_v42 = vpop.f32.mrb[28].mxu0 }
 0x12c   : > { %2894 = vmatpush1.bf16.msra.mxu0 %v2223_v41  ;;  %5604 = vmatpush1.bf16.msra.mxu1 %v2223_v41  ;;  %v6294_v44 = vpop.f32.mrb[29].mxu0 }
 0x12d   : > { %2895 = vmatprep.subr.bf16.mxu0 %v5939_v46  ;;  %5589 = vmatprep.subr.bf16.mxu1 %v5939_v46  ;;  %v6302_v50 = vpop.f32.mrb[30].mxu0  ;;  %v5724_v46 = vld [vmem:[%s7630_s1 + $0x14] ss:$8 sps:$4 sm:$0xff]  }
 0x12e   : > { %v6310_v52 = vpop.f32.mrb[31].mxu0 }
 0x130   : > { %2896 = vmatpush1.bf16.msra.mxu0 %v2224_v36  ;;  %5605 = vmatpush1.bf16.msra.mxu1 %v2224_v36  ;;  %v5742_v36 = vld [vmem:[%s7630_s1 + $0x84] ss:$8 sps:$4 sm:$0xff]  }
 0x133   : > { %2898 = vmatmul.mubr.bf16.vlgmr.msra.gmra.mrb[128].mxu0 %v5718_v45  ;;  %2922 = vmatmul.mubr.bf16.vlgmr.msra.gmra.mrb[32].mxu1 %v5721_v48  ;;  %v6312_v56 = vpop.f32.mrb[32].mxu0  ;;  %v5744_v48 = vld [vmem:[%s7630_s1 + $0x80] ss:$8 sps:$4 sm:$0xff]  }
 0x134   : > { %2905 = vmatprep.mubr.bf16.mxu0 %v5724_v46  ;;  %2929 = vmatprep.mubr.bf16.mxu1 %v5726_v51  ;;  %v6314_v57 = vpop.f32.mrb[33].mxu0  ;;  %v5745_v51 = vld [vmem:[%s7630_s1 + $0x94] ss:$8 sps:$4 sm:$0xff]  }
 0x135   : > { %v6322_v62 = vpop.f32.mrb[34].mxu0 }
 0x136   : > { %v6330_v3 = vpop.f32.mrb[35].mxu0 }
 0x13b   : > { %2906 = vmatmul.mubr.bf16.gmra.mrb[132].mxu0 %v5728_v59  ;;  %2930 = vmatmul.mubr.bf16.gmra.mrb[36].mxu1 %v5729_v60  ;;  %v6332_v8 = vpop.f32.mrb[36].mxu0 }
 0x13c   : > { %2913 = vmatprep.mubr.bf16.mxu0 %v5730_v0  ;;  %2937 = vmatprep.mubr.bf16.mxu1 %v5732_v1  ;;  %v6334_v9 = vpop.f32.mrb[37].mxu0  ;;  %v5747_v1 = vld [vmem:[%s7630_s1 + $0x90] ss:$8 sps:$4 sm:$0xff]  }
 0x13d   : > { %v6342_v14 = vpop.f32.mrb[38].mxu0 }
 0x13e   : > { %v6347_v17 = vpop.f32.mrb[39].mxu0 }
 0x143   : > { %2914 = vmatmul.mubr.bf16.gmra.mrb[136].mxu0 %v5734_v11  ;;  %2938 = vmatmul.mubr.bf16.gmra.mrb[40].mxu1 %v5735_v12  ;;  %v6349_v18 = vpop.f32.mrb[40].mxu0  ;;  %v5748_v12 = vld [vmem:[%s7630_s1 + $0xa4] ss:$8 sps:$4 sm:$0xff]  }
 0x144   : > { %2945 = vmatprep.mubr.bf16.mxu1 %v5736_v16  ;;  %v6351_v20 = vpop.f32.mrb[41].mxu0 }
 0x145   : > { %v6356_v24 = vpop.f32.mrb[42].mxu0 }
 0x146   : > { %v6361_v27 = vpop.f32.mrb[43].mxu0 }
 0x14b   : > { %2946 = vmatmul.mubr.bf16.gmra.mrb[44].mxu1 %v5738_v22  ;;  %v6363_v28 = vpop.f32.mrb[44].mxu0 }
 0x14c   : > { %2953 = vmatprep.mubr.bf16.mxu1 %v5739_v26  ;;  %7638 = vst [vmem:[#allocation2_spill] sm:$0xff] %v6363_v28  ;;  %v6365_v30 = vpop.f32.mrb[45].mxu0 }
 0x14d   : > { %v6370_v34 = vpop.f32.mrb[46].mxu0 }
 0x14e   : > { %7639 = vst [vmem:[#allocation3_spill] sm:$0xff] %v6370_v34  ;;  %v6375_v37 = vpop.f32.mrb[47].mxu0 }
 0x153   : > { %2954 = vmatmul.mubr.bf16.gmra.mrb[48].mxu1 %v5741_v32  ;;  %v6377_v41 = vpop.f32.mrb[48].mxu0  ;;  %v5750_v32 = vld [vmem:[%s7630_s1 + $0xa0] ss:$8 sps:$4 sm:$0xff]  }
 0x154   : > { %2961 = vmatprep.mubr.bf16.mxu1 %v5742_v36  ;;  %7640 = vst [vmem:[#allocation4_spill] sm:$0xff] %v6377_v41  ;;  %v6379_v45 = vpop.f32.mrb[49].mxu0 }
 0x155   : > { %7641 = vst [vmem:[#allocation5_spill] sm:$0xff] %v6379_v45  ;;  %v6384_v46 = vpop.f32.mrb[50].mxu0 }
 0x156   : > { %7642 = vst [vmem:[#allocation6_spill] sm:$0xff] %v6384_v46  ;;  %v6389_v59 = vpop.f32.mrb[51].mxu0 }
 0x157   : > { %7643 = vst [vmem:[#allocation7_spill] sm:$0xff] %v6389_v59 }
 0x15b   : > { %2962 = vmatmul.mubr.bf16.gmra.mrb[52].mxu1 %v5744_v48  ;;  %v6391_v60 = vpop.f32.mrb[52].mxu0  ;;  %v5751_v48 = vld [vmem:[%s7630_s1 + $0xb4] ss:$8 sps:$4 sm:$0xff]  }
 0x15c   : > { %2969 = vmatprep.mubr.bf16.mxu1 %v5745_v51  ;;  %7644 = vst [vmem:[#allocation8_spill] sm:$0xff] %v6391_v60  ;;  %v6393_v0 = vpop.f32.mrb[53].mxu0 }
 0x15d   : > { %7645 = vst [vmem:[#allocation9_spill] sm:$0xff] %v6393_v0  ;;  %v6398_v11 = vpop.f32.mrb[54].mxu0 }
 0x15e   : > { %7646 = vst [vmem:[#allocation10_spill] sm:$0xff] %v6398_v11  ;;  %v6403_v16 = vpop.f32.mrb[55].mxu0 }
 0x15f   : > { %7647 = vst [vmem:[#allocation11_spill] sm:$0xff] %v6403_v16 }
 0x163   : > { %2970 = vmatmul.mubr.bf16.gmra.mrb[56].mxu1 %v5747_v1  ;;  %v6405_v22 = vpop.f32.mrb[56].mxu0 }
 0x164   : > { %2977 = vmatprep.mubr.bf16.mxu1 %v5748_v12  ;;  %7648 = vst [vmem:[#allocation12_spill] sm:$0xff] %v6405_v22  ;;  %v6407_v26 = vpop.f32.mrb[57].mxu0  ;;  %v5753_v22 = vld [vmem:[%s7630_s1 + $0xb0] ss:$8 sps:$4 sm:$0xff]  }
 0x165   : > { %7649 = vst [vmem:[#allocation13_spill] sm:$0xff] %v6407_v26  ;;  %v6412_v36 = vpop.f32.mrb[58].mxu0 }
 0x166   : > { %7650 = vst [vmem:[#allocation14_spill] sm:$0xff] %v6412_v36  ;;  %v6417_v51 = vpop.f32.mrb[59].mxu0  ;;  %v5754_v36 = vld [vmem:[%s7630_s1 + $0xc4] ss:$8 sps:$4 sm:$0xff]  }
 0x167   : > { %7651 = vst [vmem:[#allocation15_spill] sm:$0xff] %v6417_v51 }
 0x16b   : > { %2978 = vmatmul.mubr.bf16.gmra.mrb[60].mxu1 %v5750_v32  ;;  %v6419_v1 = vpop.f32.mrb[60].mxu0 }
 0x16c   : > { %2985 = vmatprep.mubr.bf16.mxu1 %v5751_v48  ;;  %7652 = vst [vmem:[#allocation16_spill] sm:$0xff] %v6419_v1  ;;  %v6421_v12 = vpop.f32.mrb[61].mxu0  ;;  %v5756_v1 = vld [vmem:[%s7630_s1 + $0xc0] ss:$8 sps:$4 sm:$0xff]  }
 0x16d   : > { %7653 = vst [vmem:[#allocation17_spill] sm:$0xff] %v6421_v12  ;;  %v6426_v26 = vpop.f32.mrb[62].mxu0 }
 0x16e   : > { %7654 = vst [vmem:[#allocation18_spill] sm:$0xff] %v6426_v26  ;;  %v6431_v11 = vpop.f32.mrb[63].mxu0  ;;  %v5757_v26 = vld [vmem:[%s7630_s1 + $0xd4] ss:$8 sps:$4 sm:$0xff]  }
 0x16f   : > { %7655 = vst [vmem:[#allocation19_spill] sm:$0xff] %v6431_v11 }
 0x173   : > { %2986 = vmatmul.mubr.bf16.gmra.mrb[64].mxu1 %v5753_v22  ;;  %v6433_v32 = vpop.f32.mrb[64].mxu0 }
 0x174   : > { %2993 = vmatprep.mubr.bf16.mxu1 %v5754_v36  ;;  %7656 = vst [vmem:[#allocation20_spill] sm:$0xff] %v6433_v32  ;;  %v6435_v48 = vpop.f32.mrb[65].mxu0  ;;  %v5759_v32 = vld [vmem:[%s7630_s1 + $0xd0] ss:$8 sps:$4 sm:$0xff]  }
 0x175   : > { %7657 = vst [vmem:[#allocation21_spill] sm:$0xff] %v6435_v48  ;;  %v6440_v12 = vpop.f32.mrb[66].mxu0 }
 0x176   : > { %7658 = vst [vmem:[#allocation22_spill] sm:$0xff] %v6440_v12  ;;  %v6445_v51 = vpop.f32.mrb[67].mxu0  ;;  %v5760_v12 = vld [vmem:[%s7630_s1 + $0xe4] ss:$8 sps:$4 sm:$0xff]  }
 0x177   : > { %7659 = vst [vmem:[#allocation23_spill] sm:$0xff] %v6445_v51 }
 0x17b   : > { %2994 = vmatmul.mubr.bf16.gmra.mrb[68].mxu1 %v5756_v1  ;;  %v6447_v22 = vpop.f32.mrb[68].mxu0 }
 0x17c   : > { %3001 = vmatprep.mubr.bf16.mxu1 %v5757_v26  ;;  %7660 = vst [vmem:[#allocation24_spill] sm:$0xff] %v6447_v22  ;;  %v6449_v36 = vpop.f32.mrb[69].mxu0  ;;  %v5762_v22 = vld [vmem:[%s7630_s1 + $0xe0] ss:$8 sps:$4 sm:$0xff]  }
 0x17d   : > { %7661 = vst [vmem:[#allocation25_spill] sm:$0xff] %v6449_v36  ;;  %v6454_v48 = vpop.f32.mrb[70].mxu0 }
 0x17e   : > { %7662 = vst [vmem:[#allocation26_spill] sm:$0xff] %v6454_v48  ;;  %v6459_v11 = vpop.f32.mrb[71].mxu0  ;;  %v5763_v48 = vld [vmem:[%s7630_s1 + $0xf4] ss:$8 sps:$4 sm:$0xff]  }
 0x17f   : > { %7663 = vst [vmem:[#allocation27_spill] sm:$0xff] %v6459_v11 }
 0x183   : > { %3002 = vmatmul.mubr.bf16.gmra.mrb[72].mxu1 %v5759_v32  ;;  %v6461_v1 = vpop.f32.mrb[72].mxu0 }
 0x184   : > { %3009 = vmatprep.mubr.bf16.mxu1 %v5760_v12  ;;  %7664 = vst [vmem:[#allocation28_spill] sm:$0xff] %v6461_v1  ;;  %v6463_v26 = vpop.f32.mrb[73].mxu0  ;;  %v5811_v12 = vld [vmem:[%s7635_s6] sm:$0xff]  }
 0x185   : > { %7665 = vst [vmem:[#allocation29_spill] sm:$0xff] %v6463_v26  ;;  %v6468_v36 = vpop.f32.mrb[74].mxu0  ;;  %5440 = vmatprep.subr.bf16.mxu0 %v5811_v12 }
 0x186   : > { %7666 = vst [vmem:[#allocation30_spill] sm:$0xff] %v6468_v36  ;;  %v6473_v51 = vpop.f32.mrb[75].mxu0  ;;  %5441 = vmatpush3.bf16.msra.mxu0 %v5811_v12  ;;  %v5812_v36 = vld [vmem:[%s7635_s6 + $0x8] sm:$0xff]   ;;  %v5816_v12 = vld [vmem:[%s7635_s6 + $0x10] sm:$0xff]  }
 0x187   : > { %7667 = vst [vmem:[#allocation31_spill] sm:$0xff] %v6473_v51  ;;  %v5765_v51 = vld [vmem:[%s7630_s1 + $0xf0] ss:$8 sps:$4 sm:$0xff]   ;;  %5442 = vmatprep.subr.bf16.mxu0 %v5812_v36 }
 0x18a   : > { %5443 = vmatpush3.bf16.msra.mxu0 %v5812_v36  ;;  %v5769_v36 = vld [vmem:[%s7630_s1 + $0x114] ss:$8 sps:$4 sm:$0xff]  }
 0x18b   : > { %3010 = vmatmul.mubr.bf16.gmra.mrb[76].mxu1 %v5762_v22  ;;  %v6478_v32 = vpop.f32.mrb[76].mxu0  ;;  %5444 = vmatprep.subr.bf16.mxu0 %v5816_v12 }
 0x18c   : > { %3017 = vmatprep.mubr.bf16.mxu1 %v5763_v48  ;;  %7668 = vst [vmem:[#allocation32_spill] sm:$0xff] %v6478_v32  ;;  %v6483_v1 = vpop.f32.mrb[77].mxu0  ;;  %v5766_v48 = vld [vmem:[%s7630_s1 + $0x104] ss:$8 sps:$4 sm:$0xff]  }
 0x18d   : > { %7669 = vst [vmem:[#allocation33_spill] sm:$0xff] %v6483_v1  ;;  %v6488_v26 = vpop.f32.mrb[78].mxu0 }
 0x18e   : > { %7670 = vst [vmem:[#allocation34_spill] sm:$0xff] %v6488_v26  ;;  %v6493_v22 = vpop.f32.mrb[79].mxu0  ;;  %5445 = vmatpush3.bf16.msra.mxu0 %v5816_v12  ;;  %v5768_v26 = vld [vmem:[%s7630_s1 + $0x100] ss:$8 sps:$4 sm:$0xff]   ;;  %v5771_v12 = vld [vmem:[%s7630_s1 + $0x110] ss:$8 sps:$4 sm:$0xff]  }
 0x18f   : > { %7671 = vst [vmem:[#allocation35_spill] sm:$0xff] %v6493_v22 }
 0x193   : > { %3018 = vmatmul.mubr.bf16.gmra.mrb[80].mxu1 %v5765_v51  ;;  %v6498_v32 = vpop.f32.mrb[80].mxu0 }
 0x194   : > { %3025 = vmatprep.mubr.bf16.mxu1 %v5766_v48  ;;  %7672 = vst [vmem:[#allocation36_spill] sm:$0xff] %v6498_v32  ;;  %v6500_v1 = vpop.f32.mrb[81].mxu0 }
 0x195   : > { %7673 = vst [vmem:[#allocation37_spill] sm:$0xff] %v6500_v1  ;;  %v6505_v11 = vpop.f32.mrb[82].mxu0 }
 0x196   : > { %7674 = vst [vmem:[#allocation38_spill] sm:$0xff] %v6505_v11  ;;  %v6510_v22 = vpop.f32.mrb[83].mxu0  ;;  %v5772_v11 = vld [vmem:[%s7630_s1 + $0x124] ss:$8 sps:$4 sm:$0xff]  }
 0x197   : > { %7675 = vst [vmem:[#allocation39_spill] sm:$0xff] %v6510_v22 }
 0x19b   : > { %3026 = vmatmul.mubr.bf16.gmra.mrb[84].mxu1 %v5768_v26  ;;  %v6512_v51 = vpop.f32.mrb[84].mxu0 }
 0x19c   : > { %3033 = vmatprep.mubr.bf16.mxu1 %v5769_v36  ;;  %7676 = vst [vmem:[#allocation40_spill] sm:$0xff] %v6512_v51  ;;  %v6514_v48 = vpop.f32.mrb[85].mxu0  ;;  %v5774_v51 = vld [vmem:[%s7630_s1 + $0x120] ss:$8 sps:$4 sm:$0xff]  }
 0x19d   : > { %7677 = vst [vmem:[#allocation41_spill] sm:$0xff] %v6514_v48  ;;  %v6519_v32 = vpop.f32.mrb[86].mxu0 }
 0x19e   : > { %7678 = vst [vmem:[#allocation42_spill] sm:$0xff] %v6519_v32  ;;  %v6524_v1 = vpop.f32.mrb[87].mxu0  ;;  %v5775_v32 = vld [vmem:[%s7630_s1 + $0x134] ss:$8 sps:$4 sm:$0xff]  }
 0x19f   : > { %7679 = vst [vmem:[#allocation43_spill] sm:$0xff] %v6524_v1 }
 0x1a3   : > { %3034 = vmatmul.mubr.bf16.gmra.mrb[88].mxu1 %v5771_v12  ;;  %v6526_v26 = vpop.f32.mrb[88].mxu0 }
 0x1a4   : > { %3041 = vmatprep.mubr.bf16.mxu1 %v5772_v11  ;;  %7680 = vst [vmem:[#allocation44_spill] sm:$0xff] %v6526_v26  ;;  %v6528_v36 = vpop.f32.mrb[89].mxu0  ;;  %v5777_v26 = vld [vmem:[%s7630_s1 + $0x130] ss:$8 sps:$4 sm:$0xff]  }
 0x1a5   : > { %7681 = vst [vmem:[#allocation45_spill] sm:$0xff] %v6528_v36  ;;  %v6533_v48 = vpop.f32.mrb[90].mxu0 }
 0x1a6   : > { %7682 = vst [vmem:[#allocation46_spill] sm:$0xff] %v6533_v48  ;;  %v6538_v22 = vpop.f32.mrb[91].mxu0  ;;  %v5778_v48 = vld [vmem:[%s7630_s1 + $0x144] ss:$8 sps:$4 sm:$0xff]  }
 0x1a7   : > { %7683 = vst [vmem:[#allocation47_spill] sm:$0xff] %v6538_v22 }
 0x1ab   : > { %3042 = vmatmul.mubr.bf16.gmra.mrb[92].mxu1 %v5774_v51  ;;  %v6540_v12 = vpop.f32.mrb[92].mxu0 }
 0x1ac   : > { %3049 = vmatprep.mubr.bf16.mxu1 %v5775_v32  ;;  %7684 = vst [vmem:[#allocation48_spill] sm:$0xff] %v6540_v12  ;;  %v6542_v11 = vpop.f32.mrb[93].mxu0  ;;  %v5780_v12 = vld [vmem:[%s7630_s1 + $0x140] ss:$8 sps:$4 sm:$0xff]  }
 0x1ad   : > { %7685 = vst [vmem:[#allocation49_spill] sm:$0xff] %v6542_v11  ;;  %v6547_v36 = vpop.f32.mrb[94].mxu0 }
 0x1ae   : > { %7686 = vst [vmem:[#allocation50_spill] sm:$0xff] %v6547_v36  ;;  %v6552_v1 = vpop.f32.mrb[95].mxu0  ;;  %v5781_v36 = vld [vmem:[%s7630_s1 + $0x154] ss:$8 sps:$4 sm:$0xff]  }
 0x1af   : > { %7687 = vst [vmem:[#allocation51_spill] sm:$0xff] %v6552_v1 }
 0x1b3   : > { %3050 = vmatmul.mubr.bf16.gmra.mrb[96].mxu1 %v5777_v26  ;;  %v6554_v51 = vpop.f32.mrb[96].mxu0 }
 0x1b4   : > { %3057 = vmatprep.mubr.bf16.mxu1 %v5778_v48  ;;  %7688 = vst [vmem:[#allocation52_spill] sm:$0xff] %v6554_v51  ;;  %v6556_v32 = vpop.f32.mrb[97].mxu0  ;;  %v5783_v51 = vld [vmem:[%s7630_s1 + $0x150] ss:$8 sps:$4 sm:$0xff]  }
 0x1b5   : > { %7689 = vst [vmem:[#allocation53_spill] sm:$0xff] %v6556_v32  ;;  %v6561_v11 = vpop.f32.mrb[98].mxu0 }
 0x1b6   : > { %7690 = vst [vmem:[#allocation54_spill] sm:$0xff] %v6561_v11  ;;  %v6566_v22 = vpop.f32.mrb[99].mxu0  ;;  %v5784_v11 = vld [vmem:[%s7630_s1 + $0x164] ss:$8 sps:$4 sm:$0xff]  }
 0x1b7   : > { %7691 = vst [vmem:[#allocation55_spill] sm:$0xff] %v6566_v22 }
 0x1bb   : > { %3058 = vmatmul.mubr.bf16.gmra.mrb[100].mxu1 %v5780_v12  ;;  %v6568_v26 = vpop.f32.mrb[100].mxu0 }
 0x1bc   : > { %3065 = vmatprep.mubr.bf16.mxu1 %v5781_v36  ;;  %7692 = vst [vmem:[#allocation56_spill] sm:$0xff] %v6568_v26  ;;  %v6570_v48 = vpop.f32.mrb[101].mxu0  ;;  %v5786_v26 = vld [vmem:[%s7630_s1 + $0x160] ss:$8 sps:$4 sm:$0xff]  }
 0x1bd   : > { %7693 = vst [vmem:[#allocation57_spill] sm:$0xff] %v6570_v48  ;;  %v6575_v32 = vpop.f32.mrb[102].mxu0 }
 0x1be   : > { %7694 = vst [vmem:[#allocation58_spill] sm:$0xff] %v6575_v32  ;;  %v6580_v1 = vpop.f32.mrb[103].mxu0  ;;  %v5787_v32 = vld [vmem:[%s7630_s1 + $0x174] ss:$8 sps:$4 sm:$0xff]  }
 0x1bf   : > { %7695 = vst [vmem:[#allocation59_spill] sm:$0xff] %v6580_v1 }
 0x1c3   : > { %3066 = vmatmul.mubr.bf16.gmra.mrb[104].mxu1 %v5783_v51  ;;  %v6582_v12 = vpop.f32.mrb[104].mxu0 }
 0x1c4   : > { %3073 = vmatprep.mubr.bf16.mxu1 %v5784_v11  ;;  %7696 = vst [vmem:[#allocation60_spill] sm:$0xff] %v6582_v12  ;;  %v6584_v36 = vpop.f32.mrb[105].mxu0  ;;  %v5789_v12 = vld [vmem:[%s7630_s1 + $0x170] ss:$8 sps:$4 sm:$0xff]  }
 0x1c5   : > { %7697 = vst [vmem:[#allocation61_spill] sm:$0xff] %v6584_v36  ;;  %v6589_v48 = vpop.f32.mrb[106].mxu0 }
 0x1c6   : > { %7698 = vst [vmem:[#allocation62_spill] sm:$0xff] %v6589_v48  ;;  %v6594_v22 = vpop.f32.mrb[107].mxu0  ;;  %v5790_v48 = vld [vmem:[%s7630_s1 + $0x184] ss:$8 sps:$4 sm:$0xff]  }
 0x1c7   : > { %7699 = vst [vmem:[#allocation63_spill] sm:$0xff] %v6594_v22 }
 0x1cb   : > { %3074 = vmatmul.mubr.bf16.gmra.mrb[108].mxu1 %v5786_v26 }
 0x1cc   : > { %3081 = vmatprep.mubr.bf16.mxu1 %v5787_v32 }
 0x1cd   : > { %v6596_v51 = vpop.f32.mrb[108].mxu0 }
 0x1ce   : > { %7700 = vst [vmem:[#allocation64_spill] sm:$0xff] %v6596_v51  ;;  %v6598_v11 = vpop.f32.mrb[109].mxu0  ;;  %v5792_v51 = vld [vmem:[%s7630_s1 + $0x180] ss:$8 sps:$4 sm:$0xff]  }
 0x1cf   : > { %7701 = vst [vmem:[#allocation65_spill] sm:$0xff] %v6598_v11  ;;  %v6603_v36 = vpop.f32.mrb[110].mxu0 }
 0x1d0   : > { %7702 = vst [vmem:[#allocation66_spill] sm:$0xff] %v6603_v36  ;;  %v6608_v1 = vpop.f32.mrb[111].mxu0  ;;  %v5793_v36 = vld [vmem:[%s7630_s1 + $0x194] ss:$8 sps:$4 sm:$0xff]  }
 0x1d1   : > { %7703 = vst [vmem:[#allocation67_spill] sm:$0xff] %v6608_v1 }
 0x1d3   : > { %3082 = vmatmul.mubr.bf16.gmra.mrb[112].mxu1 %v5789_v12 }
 0x1d4   : > { %3089 = vmatprep.mubr.bf16.mxu1 %v5790_v48 }
 0x1d5   : > { %v6610_v26 = vpop.f32.mrb[112].mxu0 }
 0x1d6   : > { %7704 = vst [vmem:[#allocation68_spill] sm:$0xff] %v6610_v26  ;;  %v6612_v32 = vpop.f32.mrb[113].mxu0  ;;  %v5795_v26 = vld [vmem:[%s7630_s1 + $0x190] ss:$8 sps:$4 sm:$0xff]  }
 0x1d7   : > { %7705 = vst [vmem:[#allocation69_spill] sm:$0xff] %v6612_v32  ;;  %v6617_v11 = vpop.f32.mrb[114].mxu0 }
 0x1d8   : > { %7706 = vst [vmem:[#allocation70_spill] sm:$0xff] %v6617_v11  ;;  %v6622_v22 = vpop.f32.mrb[115].mxu0  ;;  %v5796_v11 = vld [vmem:[%s7630_s1 + $0x1a4] ss:$8 sps:$4 sm:$0xff]  }
 0x1d9   : > { %7707 = vst [vmem:[#allocation71_spill] sm:$0xff] %v6622_v22 }
 0x1db   : > { %3090 = vmatmul.mubr.bf16.gmra.mrb[116].mxu1 %v5792_v51 }
 0x1dc   : > { %3097 = vmatprep.mubr.bf16.mxu1 %v5793_v36 }
 0x1dd   : > { %v6624_v12 = vpop.f32.mrb[116].mxu0 }
 0x1de   : > { %7708 = vst [vmem:[#allocation72_spill] sm:$0xff] %v6624_v12  ;;  %v6626_v48 = vpop.f32.mrb[117].mxu0  ;;  %v5798_v12 = vld [vmem:[%s7630_s1 + $0x1a0] ss:$8 sps:$4 sm:$0xff]  }
 0x1df   : > { %7709 = vst [vmem:[#allocation73_spill] sm:$0xff] %v6626_v48  ;;  %v6631_v32 = vpop.f32.mrb[118].mxu0 }
 0x1e0   : > { %7710 = vst [vmem:[#allocation74_spill] sm:$0xff] %v6631_v32  ;;  %v6636_v1 = vpop.f32.mrb[119].mxu0  ;;  %v5799_v32 = vld [vmem:[%s7630_s1 + $0x1b4] ss:$8 sps:$4 sm:$0xff]  }
 0x1e1   : > { %7711 = vst [vmem:[#allocation75_spill] sm:$0xff] %v6636_v1 }
 0x1e3   : > { %3098 = vmatmul.mubr.bf16.gmra.mrb[120].mxu1 %v5795_v26 }
 0x1e4   : > { %3105 = vmatprep.mubr.bf16.mxu1 %v5796_v11 }
 0x1e5   : > { %v6638_v51 = vpop.f32.mrb[120].mxu0 }
 0x1e6   : > { %7712 = vst [vmem:[#allocation76_spill] sm:$0xff] %v6638_v51  ;;  %v6640_v36 = vpop.f32.mrb[121].mxu0  ;;  %v5801_v51 = vld [vmem:[%s7630_s1 + $0x1b0] ss:$8 sps:$4 sm:$0xff]  }
 0x1e7   : > { %7713 = vst [vmem:[#allocation77_spill] sm:$0xff] %v6640_v36  ;;  %v6645_v48 = vpop.f32.mrb[122].mxu0 }
 0x1e8   : > { %7714 = vst [vmem:[#allocation78_spill] sm:$0xff] %v6645_v48  ;;  %v6650_v22 = vpop.f32.mrb[123].mxu0  ;;  %v5802_v48 = vld [vmem:[%s7630_s1 + $0x1c4] ss:$8 sps:$4 sm:$0xff]  }
 0x1e9   : > { %7715 = vst [vmem:[#allocation79_spill] sm:$0xff] %v6650_v22 }
 0x1eb   : > { %3106 = vmatmul.mubr.bf16.gmra.mrb[124].mxu1 %v5798_v12  ;;  %v5805_v12 = vld [vmem:[%s7630_s1 + $0x1d4] ss:$8 sps:$4 sm:$0xff]  }
 0x1ec   : > { %3113 = vmatprep.mubr.bf16.mxu1 %v5799_v32  ;;  %v5804_v32 = vld [vmem:[%s7630_s1 + $0x1c0] ss:$8 sps:$4 sm:$0xff]  }
 0x1ed   : > { %v6652_v26 = vpop.f32.mrb[124].mxu0 }
 0x1ee   : > { %7716 = vst [vmem:[#allocation80_spill] sm:$0xff] %v6652_v26  ;;  %v6654_v11 = vpop.f32.mrb[125].mxu0  ;;  %v5808_v26 = vld [vmem:[%s7630_s1 + $0x1e4] ss:$8 sps:$4 sm:$0xff]  }
 0x1ef   : > { %7717 = vst [vmem:[#allocation81_spill] sm:$0xff] %v6654_v11  ;;  %v6659_v36 = vpop.f32.mrb[126].mxu0 }
 0x1f0   : > { %7718 = vst [vmem:[#allocation82_spill] sm:$0xff] %v6659_v36  ;;  %v6664_v1 = vpop.f32.mrb[127].mxu0  ;;  %v5807_v36 = vld [vmem:[%s7630_s1 + $0x1d0] ss:$8 sps:$4 sm:$0xff]  }
 0x1f1   : > { %7719 = vst [vmem:[#allocation83_spill] sm:$0xff] %v6664_v1 }
 0x1f3   : > { %3114 = vmatmul.mubr.bf16.gmra.mrb[128].mxu1 %v5801_v51 }
 0x1f4   : > { %3121 = vmatprep.mubr.bf16.mxu1 %v5802_v48  ;;  %v6681_v48 = vld [vmem:[%s7634_s5] ss:$0 sm:$0xff] }
 0x1f5   : > { %v1607_v51 = vadd.f32 %v6681_v48, %v6203_v39  ;;  %v1608_v0 = vadd.f32 %v6681_v48, %v6210_v43  ;;  %v1614_v46 = vadd.f32 %v6221_v53, %v6681_v48  ;;  %v1609_v45 = vadd.f32 %v6201_v38, %v6681_v48  ;;  %v5815_v38 = vld [vmem:[%s7630_s1 + $0x1f0] ss:$8 sps:$4 sm:$0xff]  }
 0x1f6   : > { %v1615_v34 = vadd.f32 %v6681_v48, %v6230_v58 }
 0x1fb   : > { %3122 = vmatmul.mubr.bf16.gmra.mrb[132].mxu1 %v5804_v32  ;;  %v1613_v32 = vadd.f32 %v6213_v47, %v6681_v48  ;;  %v5813_v47 = vld [vmem:[%s7630_s1 + $0x1f4] ss:$8 sps:$4 sm:$0xff]  }
 0x1fc   : > { %3129 = vmatprep.mubr.bf16.mxu1 %v5805_v12 }
 0x203   : > { %3130 = vmatmul.mubr.bf16.gmra.mrb[136].mxu1 %v5807_v36  ;;  %v5810_v36 = vld [vmem:[%s7630_s1 + $0x1e0] ss:$8 sps:$4 sm:$0xff]  }
 0x204   : > { %3137 = vmatprep.mubr.bf16.mxu1 %v5808_v26 }
 0x206   : > { %v2899_v12 = vpop.f32.mrb[128].mxu0  ;;  %v2923_v1 = vpop.f32.mrb[32].mxu1 }
 0x207   : > { %v3410_v11 = vadd.f32 %v2899_v12, %v1607_v51  ;;  %v3416_v22 = vadd.f32 %v2923_v1, %v1613_v32  ;;  %v2901_v60 = vpop.f32.mrb[129].mxu0  ;;  %v2925_v16 = vpop.f32.mrb[33].mxu1 }
 0x208   : > { %v2902_v39 = vpop.f32.mrb[130].mxu0  ;;  %v2926_v26 = vpop.f32.mrb[34].mxu1 }
 0x209   : > { %v3411_v51 = vadd.f32 %v2902_v39, %v1608_v0  ;;  %v3417_v1 = vadd.f32 %v2926_v26, %v1614_v46  ;;  %v2928_v60 = vpop.f32.mrb[35].mxu1  ;;  %v2904_v16 = vpop.f32.mrb[131].mxu0  ;;  %v3538_v32 = vmax.f32 %v3410_v11, 0.0  ;;  %v3544_v12 = vmax.f32 %v3416_v22, 0.0 }
 0x20a   : > { %v1610_v22 = vadd.f32 %v6207_v40, %v6681_v48 }
 0x20b   : > { %v3539_v43 = vmax.f32 %v3411_v51, 0.0  ;;  %v3545_v41 = vmax.f32 %v3417_v1, 0.0  ;;  %3138 = vmatmul.mubr.bf16.gmra.mrb[140].mxu1 %v5810_v36 }
 0x20c   : > { %3145 = vmatprep.mubr.bf16.mxu1 %v5813_v47 }
 0x20d   : > { %v3666_v53 = vpack.c.bf16 %v3539_v43, %v3538_v32  ;;  %v6697_v59 = vpack.c.bf16 %v3545_v41, %v3544_v12  ;;  %v1616_v41 = vadd.f32 %v6681_v48, %v6235_v63  ;;  %v1611_v12 = vadd.f32 %v6681_v48, %v6215_v49  ;;  %v5819_v49 = vld [vmem:[%s7630_s1 + $0x200] ss:$8 sps:$4 sm:$0xff]  }
 0x20e   : > { %v2907_v28 = vpop.f32.mrb[132].mxu0  ;;  %v2931_v0 = vpop.f32.mrb[36].mxu1  ;;  %v1617_v43 = vadd.f32 %v6227_v55, %v6681_v48 }
 0x20f   : > { %v3412_v46 = vadd.f32 %v2907_v28, %v1609_v45  ;;  %v3418_v39 = vadd.f32 %v2931_v0, %v1615_v34  ;;  %v2909_v26 = vpop.f32.mrb[133].mxu0  ;;  %v2933_v11 = vpop.f32.mrb[37].mxu1  ;;  %5446 = vmatprep.mubr.msk.bf16.mxu0 %vm1871_vm0, %v3666_v53  ;;  %v5817_v28 = vld [vmem:[%s7630_s1 + $0x204] ss:$8 sps:$4 sm:$0xff]  }
 0x210   : > { %v2910_v36 = vpop.f32.mrb[134].mxu0  ;;  %v2934_v58 = vpop.f32.mrb[38].mxu1 }
 0x211   : > { %v3413_v34 = vadd.f32 %v2910_v36, %v1610_v22  ;;  %v3419_v45 = vadd.f32 %v2934_v58, %v1616_v41  ;;  %v2936_v47 = vpop.f32.mrb[39].mxu1  ;;  %v2912_v51 = vpop.f32.mrb[135].mxu0  ;;  %v3540_v1 = vmax.f32 %v3412_v46, 0.0  ;;  %v3546_v60 = vmax.f32 %v3418_v39, 0.0  ;;  %v5820_v36 = vld [vmem:[%s7630_s1 + $0x214] ss:$8 sps:$4 sm:$0xff]  }
 0x212   : > { %v1612_v46 = vadd.f32 %v6681_v48, %v6223_v54  ;;  %v1618_v39 = vadd.f32 %v6233_v61, %v6681_v48  ;;  %v1619_v61 = vadd.f32 %v6681_v48, %v6242_v4  ;;  %v5823_v4 = vld [vmem:[%s7630_s1 + $0x224] ss:$8 sps:$4 sm:$0xff]  }
 0x213   : > { %v3541_v40 = vmax.f32 %v3413_v34, 0.0  ;;  %v3547_v16 = vmax.f32 %v3419_v45, 0.0  ;;  %3146 = vmatmul.mubr.bf16.gmra.mrb[144].mxu1 %v5815_v38 }
 0x214   : > { %3153 = vmatprep.mubr.bf16.mxu1 %v5817_v28 }
 0x215   : > { %v3667_v63 = vpack.c.bf16 %v3541_v40, %v3540_v1  ;;  %v3670_v32 = vpack.c.bf16 %v3547_v16, %v3546_v60 }
 0x216   : > { %v2915_v53 = vpop.f32.mrb[136].mxu0  ;;  %v2939_v0 = vpop.f32.mrb[40].mxu1 }
 0x217   : > { %v3414_v26 = vadd.f32 %v2915_v53, %v1611_v12  ;;  %v3420_v11 = vadd.f32 %v2939_v0, %v1617_v43  ;;  %v2917_v22 = vpop.f32.mrb[137].mxu0  ;;  %v2941_v41 = vpop.f32.mrb[41].mxu1  ;;  %5447 = vmatmul.mubr.msk.bf16.vlgmr.msra.gmra.mrb[140].mxu0 %vm1871_vm0, %v3667_v63  ;;  %v1620_v63 = vadd.f32 %v6681_v48, %v6247_v6  ;;  %v5822_v53 = vld [vmem:[%s7630_s1 + $0x210] ss:$8 sps:$4 sm:$0xff]  }
 0x218   : > { %v2918_v38 = vpop.f32.mrb[138].mxu0  ;;  %v2942_v55 = vpop.f32.mrb[42].mxu1  ;;  %v1621_v41 = vadd.f32 %v6239_v2, %v6681_v48 }
 0x219   : > { %v3415_v58 = vadd.f32 %v2918_v38, %v1612_v46  ;;  %v3421_v28 = vadd.f32 %v2942_v55, %v1618_v39  ;;  %v2944_v34 = vpop.f32.mrb[43].mxu1  ;;  %v2920_v45 = vpop.f32.mrb[139].mxu0  ;;  %v3542_v47 = vmax.f32 %v3414_v26, 0.0  ;;  %v3548_v51 = vmax.f32 %v3420_v11, 0.0  ;;  %v5825_v55 = vld [vmem:[%s7630_s1 + $0x220] ss:$8 sps:$4 sm:$0xff]  }
 0x21b   : > { %v3543_v54 = vmax.f32 %v3415_v58, 0.0  ;;  %v3549_v1 = vmax.f32 %v3421_v28, 0.0  ;;  %3154 = vmatmul.mubr.bf16.gmra.mrb[148].mxu1 %v5819_v49 }
 0x21c   : > { %3161 = vmatprep.mubr.bf16.mxu1 %v5820_v36 }
 0x21d   : > { %v3668_v60 = vpack.c.bf16 %v3543_v54, %v3542_v47  ;;  %v3671_v40 = vpack.c.bf16 %v3549_v1, %v3548_v51  ;;  %v1624_v51 = vadd.f32 %v6681_v48, %v6261_v15  ;;  %v1625_v15 = vadd.f32 %v6251_v7, %v6681_v48 }
 0x21e   : > { %v2947_v16 = vpop.f32.mrb[44].mxu1 }
 0x21f   : > { %v3422_v12 = vadd.f32 %v2947_v16, %v1619_v61  ;;  %v2949_v43 = vpop.f32.mrb[45].mxu1  ;;  %5450 = vmatprep.mubr.msk.bf16.mxu0 %vm1871_vm0, %v3668_v60  ;;  %v5828_v61 = vld [vmem:[%s7630_s1 + $0x230] ss:$8 sps:$4 sm:$0xff]  }
 0x220   : > { %v2950_v0 = vpop.f32.mrb[46].mxu1  ;;  %5451 = vmatmul.mubr.msk.bf16.gmra.mrb[144].mxu0 %vm1871_vm0, %v6697_v59  ;;  %v1622_v59 = vadd.f32 %v6245_v5, %v6681_v48  ;;  %v1623_v5 = vadd.f32 %v6681_v48, %v6254_v10 }
 0x221   : > { %v3423_v26 = vadd.f32 %v2950_v0, %v1620_v63  ;;  %v2952_v11 = vpop.f32.mrb[47].mxu1  ;;  %5454 = vmatprep.mubr.msk.bf16.mxu0 %vm1871_vm0, %v3670_v32  ;;  %v3550_v6 = vmax.f32 %v3422_v12, 0.0  ;;  %v5826_v32 = vld [vmem:[%s7630_s1 + $0x234] ss:$8 sps:$4 sm:$0xff]   ;;  %v1626_v0 = vadd.f32 %v6259_v13, %v6681_v48  ;;  %v1627_v13 = vadd.f32 %v6681_v48, %v6270_v21 }
 0x222   : > { %v5831_v11 = vld [vmem:[%s7630_s1 + $0x240] ss:$8 sps:$4 sm:$0xff]  }
 0x223   : > { %v3551_v22 = vmax.f32 %v3423_v26, 0.0  ;;  %3162 = vmatmul.mubr.bf16.gmra.mrb[152].mxu1 %v5822_v53 }
 0x224   : > { %3169 = vmatprep.mubr.bf16.mxu1 %v5823_v4 }
 0x225   : > { %v3672_v46 = vpack.c.bf16 %v3551_v22, %v3550_v6  ;;  %v5832_v22 = vld [vmem:[%s7630_s1 + $0x254] ss:$8 sps:$4 sm:$0xff]  }
 0x226   : > { %v2955_v39 = vpop.f32.mrb[48].mxu1 }
 0x227   : > { %v3424_v49 = vadd.f32 %v2955_v39, %v1621_v41  ;;  %v2957_v38 = vpop.f32.mrb[49].mxu1 }
 0x228   : > { %v2958_v36 = vpop.f32.mrb[50].mxu1  ;;  %5455 = vmatmul.mubr.msk.bf16.gmra.mrb[148].mxu0 %vm1871_vm0, %v3671_v40  ;;  %v5829_v40 = vld [vmem:[%s7630_s1 + $0x244] ss:$8 sps:$4 sm:$0xff]   ;;  %v1628_v38 = vadd.f32 %v6681_v48, %v6274_v25  ;;  %v1629_v25 = vadd.f32 %v6268_v19, %v6681_v48 }
 0x229   : > { %v3425_v58 = vadd.f32 %v2958_v36, %v1622_v59  ;;  %v2960_v2 = vpop.f32.mrb[51].mxu1  ;;  %5458 = vmatprep.mubr.msk.bf16.mxu0 %vm1871_vm0, %v3672_v46  ;;  %v3552_v28 = vmax.f32 %v3424_v49, 0.0 }
 0x22a   : > { %v5835_v2 = vld [vmem:[%s7630_s1 + $0x264] ss:$8 sps:$4 sm:$0xff]  }
 0x22b   : > { %v3553_v34 = vmax.f32 %v3425_v58, 0.0  ;;  %3170 = vmatmul.mubr.bf16.gmra.mrb[156].mxu1 %v5825_v55 }
 0x22c   : > { %3177 = vmatprep.mubr.bf16.mxu1 %v5826_v32  ;;  %v5834_v32 = vld [vmem:[%s7630_s1 + $0x250] ss:$8 sps:$4 sm:$0xff]  }
 0x22d   : > { %v3673_v45 = vpack.c.bf16 %v3553_v34, %v3552_v28 }
 0x22e   : > { %v2963_v47 = vpop.f32.mrb[52].mxu1 }
 0x22f   : > { %v3426_v54 = vadd.f32 %v2963_v47, %v1623_v5  ;;  %v2965_v1 = vpop.f32.mrb[53].mxu1 }
 0x230   : > { %v2966_v60 = vpop.f32.mrb[54].mxu1  ;;  %5459 = vmatmul.mubr.msk.bf16.gmra.mrb[152].mxu0 %vm1871_vm0, %v3673_v45 }
 0x231   : > { %v3427_v16 = vadd.f32 %v2966_v60, %v1624_v51  ;;  %v2968_v10 = vpop.f32.mrb[55].mxu1  ;;  %v3554_v63 = vmax.f32 %v3426_v54, 0.0  ;;  %v1630_v51 = vadd.f32 %v6272_v23, %v6681_v48  ;;  %v1631_v23 = vadd.f32 %v6681_v48, %v6282_v31 }
 0x233   : > { %v3555_v12 = vmax.f32 %v3427_v16, 0.0  ;;  %3178 = vmatmul.mubr.bf16.gmra.mrb[160].mxu1 %v5828_v61  ;;  %v5837_v61 = vld [vmem:[%s7630_s1 + $0x260] ss:$8 sps:$4 sm:$0xff]  }
 0x234   : > { %3185 = vmatprep.mubr.bf16.mxu1 %v5829_v40  ;;  %v5838_v40 = vld [vmem:[%s7630_s1 + $0x274] ss:$8 sps:$4 sm:$0xff]  }
 0x235   : > { %v3674_v43 = vpack.c.bf16 %v3555_v12, %v3554_v63 }
 0x236   : > { %v2971_v53 = vpop.f32.mrb[56].mxu1 }
 0x237   : > { %v3428_v4 = vadd.f32 %v2971_v53, %v1625_v15  ;;  %v2973_v26 = vpop.f32.mrb[57].mxu1  ;;  %5462 = vmatprep.mubr.msk.bf16.mxu0 %vm1871_vm0, %v3674_v43  ;;  %v1632_v43 = vadd.f32 %v6681_v48, %v6286_v35  ;;  %v1633_v35 = vadd.f32 %v6280_v29, %v6681_v48 }
 0x238   : > { %v2974_v6 = vpop.f32.mrb[58].mxu1 }
 0x239   : > { %v3429_v41 = vadd.f32 %v2974_v6, %v1626_v0  ;;  %v2976_v7 = vpop.f32.mrb[59].mxu1  ;;  %v3556_v46 = vmax.f32 %v3428_v4, 0.0  ;;  %v5840_v4 = vld [vmem:[%s7630_s1 + $0x270] ss:$8 sps:$4 sm:$0xff]  }
 0x23b   : > { %v3557_v39 = vmax.f32 %v3429_v41, 0.0  ;;  %3186 = vmatmul.mubr.bf16.gmra.mrb[164].mxu1 %v5831_v11  ;;  %v5841_v11 = vld [vmem:[%s7630_s1 + $0x284] ss:$8 sps:$4 sm:$0xff]  }
 0x23c   : > { %3193 = vmatprep.mubr.bf16.mxu1 %v5832_v22 }
 0x23d   : > { %v3675_v59 = vpack.c.bf16 %v3557_v39, %v3556_v46  ;;  %v1634_v39 = vadd.f32 %v6284_v33, %v6681_v48  ;;  %v1635_v33 = vadd.f32 %v6681_v48, %v6294_v44 }
 0x23e   : > { %v2979_v49 = vpop.f32.mrb[60].mxu1 }
 0x23f   : > { %v3430_v55 = vadd.f32 %v2979_v49, %v1627_v13  ;;  %v2981_v36 = vpop.f32.mrb[61].mxu1  ;;  %5463 = vmatmul.mubr.msk.bf16.gmra.mrb[156].mxu0 %vm1871_vm0, %v3675_v59  ;;  %v5843_v49 = vld [vmem:[%s7630_s1 + $0x280] ss:$8 sps:$4 sm:$0xff]  }
 0x240   : > { %v2982_v58 = vpop.f32.mrb[62].mxu1 }
 0x241   : > { %v3431_v28 = vadd.f32 %v2982_v58, %v1628_v38  ;;  %v2984_v21 = vpop.f32.mrb[63].mxu1  ;;  %v3558_v34 = vmax.f32 %v3430_v55, 0.0  ;;  %v5844_v55 = vld [vmem:[%s7630_s1 + $0x294] ss:$8 sps:$4 sm:$0xff]  }
 0x242   : > { %v1636_v21 = vadd.f32 %v6681_v48, %v6310_v52  ;;  %v1637_v52 = vadd.f32 %v6292_v42, %v6681_v48 }
 0x243   : > { %v3559_v5 = vmax.f32 %v3431_v28, 0.0  ;;  %3194 = vmatmul.mubr.bf16.gmra.mrb[168].mxu1 %v5834_v32 }
 0x244   : > { %3201 = vmatprep.mubr.bf16.mxu1 %v5835_v2 }
 0x245   : > { %v3676_v45 = vpack.c.bf16 %v3559_v5, %v3558_v34 }
 0x246   : > { %v2987_v47 = vpop.f32.mrb[64].mxu1 }
 0x247   : > { %v3432_v54 = vadd.f32 %v2987_v47, %v1629_v25  ;;  %v2989_v1 = vpop.f32.mrb[65].mxu1  ;;  %5466 = vmatprep.mubr.msk.bf16.mxu0 %vm1871_vm0, %v3676_v45  ;;  %v5846_v25 = vld [vmem:[%s7630_s1 + $0x290] ss:$8 sps:$4 sm:$0xff]   ;;  %v5847_v47 = vld [vmem:[%s7630_s1 + $0x2a4] ss:$8 sps:$4 sm:$0xff]  }
 0x248   : > { %v2990_v60 = vpop.f32.mrb[66].mxu1 }
 0x249   : > { %v3433_v16 = vadd.f32 %v2990_v60, %v1630_v51  ;;  %v2992_v19 = vpop.f32.mrb[67].mxu1  ;;  %v3560_v10 = vmax.f32 %v3432_v54, 0.0 }
 0x24b   : > { %v3561_v63 = vmax.f32 %v3433_v16, 0.0  ;;  %3202 = vmatmul.mubr.bf16.gmra.mrb[172].mxu1 %v5837_v61 }
 0x24c   : > { %3209 = vmatprep.mubr.bf16.mxu1 %v5838_v40  ;;  %v1638_v40 = vadd.f32 %v6302_v50, %v6681_v48  ;;  %v1639_v50 = vadd.f32 %v6681_v48, %v6314_v57 }
 0x24d   : > { %v3677_v12 = vpack.c.bf16 %v3561_v63, %v3560_v10  ;;  %v5849_v10 = vld [vmem:[%s7630_s1 + $0x2a0] ss:$8 sps:$4 sm:$0xff]  }
 0x24e   : > { %v2995_v15 = vpop.f32.mrb[68].mxu1 }
 0x24f   : > { %v3434_v53 = vadd.f32 %v2995_v15, %v1631_v23  ;;  %v2997_v0 = vpop.f32.mrb[69].mxu1  ;;  %5467 = vmatmul.mubr.msk.bf16.gmra.mrb[160].mxu0 %vm1871_vm0, %v3677_v12  ;;  %v5850_v23 = vld [vmem:[%s7630_s1 + $0x2b4] ss:$8 sps:$4 sm:$0xff]  }
 0x250   : > { %v2998_v26 = vpop.f32.mrb[70].mxu1 }
 0x251   : > { %v3435_v6 = vadd.f32 %v2998_v26, %v1632_v43  ;;  %v3000_v31 = vpop.f32.mrb[71].mxu1  ;;  %v3562_v22 = vmax.f32 %v3434_v53, 0.0 }
 0x253   : > { %v3563_v41 = vmax.f32 %v3435_v6, 0.0  ;;  %3210 = vmatmul.mubr.bf16.gmra.mrb[176].mxu1 %v5840_v4  ;;  %v1640_v4 = vadd.f32 %v6681_v48, %v6330_v3  ;;  %v5852_v6 = vld [vmem:[%s7630_s1 + $0x2b0] ss:$8 sps:$4 sm:$0xff]   ;;  %v1641_v3 = vadd.f32 %v6312_v56, %v6681_v48 }
 0x254   : > { %3217 = vmatprep.mubr.bf16.mxu1 %v5841_v11 }
 0x255   : > { %v3678_v7 = vpack.c.bf16 %v3563_v41, %v3562_v22  ;;  %v5853_v22 = vld [vmem:[%s7630_s1 + $0x2c4] ss:$8 sps:$4 sm:$0xff]  }
 0x256   : > { %v3003_v46 = vpop.f32.mrb[72].mxu1 }
 0x257   : > { %v3436_v13 = vadd.f32 %v3003_v46, %v1633_v35  ;;  %v3005_v59 = vpop.f32.mrb[73].mxu1  ;;  %5470 = vmatprep.mubr.msk.bf16.mxu0 %vm1871_vm0, %v3678_v7 }
 0x258   : > { %v3006_v38 = vpop.f32.mrb[74].mxu1 }
 0x259   : > { %v3437_v36 = vadd.f32 %v3006_v38, %v1634_v39  ;;  %v3008_v29 = vpop.f32.mrb[75].mxu1  ;;  %v3564_v32 = vmax.f32 %v3436_v13, 0.0  ;;  %v1642_v13 = vadd.f32 %v6322_v62, %v6681_v48  ;;  %v5855_v38 = vld [vmem:[%s7630_s1 + $0x2c0] ss:$8 sps:$4 sm:$0xff]   ;;  %v1643_v62 = vadd.f32 %v6681_v48, %v6334_v9 }
 0x25b   : > { %v3565_v58 = vmax.f32 %v3437_v36, 0.0  ;;  %3218 = vmatmul.mubr.bf16.gmra.mrb[180].mxu1 %v5843_v49  ;;  %v5856_v36 = vld [vmem:[%s7630_s1 + $0x2d4] ss:$8 sps:$4 sm:$0xff]  }
 0x25c   : > { %3225 = vmatprep.mubr.bf16.mxu1 %v5844_v55 }
 0x25d   : > { %v3679_v2 = vpack.c.bf16 %v3565_v58, %v3564_v32 }
 0x25e   : > { %v3011_v28 = vpop.f32.mrb[76].mxu1 }
 0x25f   : > { %v3438_v34 = vadd.f32 %v3011_v28, %v1635_v33  ;;  %v3013_v5 = vpop.f32.mrb[77].mxu1  ;;  %5471 = vmatmul.mubr.msk.bf16.gmra.mrb[164].mxu0 %vm1871_vm0, %v3679_v2  ;;  %v1644_v28 = vadd.f32 %v6681_v48, %v6347_v17  ;;  %v1645_v17 = vadd.f32 %v6332_v8, %v6681_v48 }
 0x260   : > { %v3014_v45 = vpop.f32.mrb[78].mxu1  ;;  %v5858_v5 = vld [vmem:[%s7630_s1 + $0x2d0] ss:$8 sps:$4 sm:$0xff]  }
 0x261   : > { %v3439_v51 = vadd.f32 %v3014_v45, %v1636_v21  ;;  %v3016_v44 = vpop.f32.mrb[79].mxu1  ;;  %v3566_v54 = vmax.f32 %v3438_v34, 0.0  ;;  %v5859_v45 = vld [vmem:[%s7630_s1 + $0x2e4] ss:$8 sps:$4 sm:$0xff]  }
 0x263   : > { %v3567_v1 = vmax.f32 %v3439_v51, 0.0  ;;  %3226 = vmatmul.mubr.bf16.gmra.mrb[184].mxu1 %v5846_v25 }
 0x264   : > { %3233 = vmatprep.mubr.bf16.mxu1 %v5847_v47 }
 0x265   : > { %v3680_v61 = vpack.c.bf16 %v3567_v1, %v3566_v54 }
 0x266   : > { %v3019_v60 = vpop.f32.mrb[80].mxu1 }
 0x267   : > { %v3440_v16 = vadd.f32 %v3019_v60, %v1637_v52  ;;  %v3021_v19 = vpop.f32.mrb[81].mxu1  ;;  %5474 = vmatprep.mubr.msk.bf16.mxu0 %vm1871_vm0, %v3680_v61  ;;  %v1646_v52 = vadd.f32 %v6342_v14, %v6681_v48  ;;  %v1647_v14 = vadd.f32 %v6681_v48, %v6351_v20 }
 0x268   : > { %v3022_v63 = vpop.f32.mrb[82].mxu1  ;;  %v5862_v19 = vld [vmem:[%s7630_s1 + $0x2f4] ss:$8 sps:$4 sm:$0xff]  }
 0x269   : > { %v3441_v12 = vadd.f32 %v3022_v63, %v1638_v40  ;;  %v3024_v42 = vpop.f32.mrb[83].mxu1  ;;  %v3568_v15 = vmax.f32 %v3440_v16, 0.0  ;;  %v5861_v40 = vld [vmem:[%s7630_s1 + $0x2e0] ss:$8 sps:$4 sm:$0xff]  }
 0x26b   : > { %v3569_v43 = vmax.f32 %v3441_v12, 0.0  ;;  %3234 = vmatmul.mubr.bf16.gmra.mrb[188].mxu1 %v5849_v10 }
 0x26c   : > { %3241 = vmatprep.mubr.bf16.mxu1 %v5850_v23 }
 0x26d   : > { %v3681_v53 = vpack.c.bf16 %v3569_v43, %v3568_v15  ;;  %v1648_v15 = vadd.f32 %v6681_v48, %v6361_v27  ;;  %v1649_v27 = vadd.f32 %v6349_v18, %v6681_v48 }
 0x26e   : > { %v3027_v0 = vpop.f32.mrb[84].mxu1 }
 0x26f   : > { %v3442_v26 = vadd.f32 %v3027_v0, %v1639_v50  ;;  %v3029_v11 = vpop.f32.mrb[85].mxu1  ;;  %5475 = vmatmul.mubr.msk.bf16.gmra.mrb[168].mxu0 %vm1871_vm0, %v3681_v53  ;;  %v5864_v53 = vld [vmem:[%s7630_s1 + $0x2f0] ss:$8 sps:$4 sm:$0xff]  }
 0x270   : > { %v3030_v31 = vpop.f32.mrb[86].mxu1 }
 0x271   : > { %v3443_v41 = vadd.f32 %v3030_v31, %v1640_v4  ;;  %v3032_v57 = vpop.f32.mrb[87].mxu1  ;;  %v3570_v35 = vmax.f32 %v3442_v26, 0.0  ;;  %v5865_v4 = vld [vmem:[%s7630_s1 + $0x304] ss:$8 sps:$4 sm:$0xff]  }
 0x273   : > { %v3571_v7 = vmax.f32 %v3443_v41, 0.0  ;;  %3242 = vmatmul.mubr.bf16.gmra.mrb[192].mxu1 %v5852_v6  ;;  %v1650_v41 = vadd.f32 %v6356_v24, %v6681_v48  ;;  %v1651_v24 = vadd.f32 %v6681_v48, %v6365_v30 }
 0x274   : > { %3249 = vmatprep.mubr.bf16.mxu1 %v5853_v22 }
 0x275   : > { %v3682_v46 = vpack.c.bf16 %v3571_v7, %v3570_v35  ;;  %v5867_v7 = vld [vmem:[%s7630_s1 + $0x300] ss:$8 sps:$4 sm:$0xff]  }
 0x276   : > { %v3035_v39 = vpop.f32.mrb[88].mxu1 }
 0x277   : > { %v3444_v59 = vadd.f32 %v3035_v39, %v1641_v3  ;;  %v3037_v49 = vpop.f32.mrb[89].mxu1  ;;  %5478 = vmatprep.mubr.msk.bf16.mxu0 %vm1871_vm0, %v3682_v46  ;;  %v5868_v46 = vld [vmem:[%s7630_s1 + $0x314] ss:$8 sps:$4 sm:$0xff]  }
 0x278   : > { %v3038_v55 = vpop.f32.mrb[90].mxu1 }
 0x279   : > { %v3445_v29 = vadd.f32 %v3038_v55, %v1642_v13  ;;  %v3040_v56 = vpop.f32.mrb[91].mxu1  ;;  %v3572_v32 = vmax.f32 %v3444_v59, 0.0  ;;  %v1652_v55 = vadd.f32 %v6681_v48, %v6375_v37  ;;  %v7720_v37 = vld [vmem:[#allocation2_spill] sm:$0xff] }
 0x27a   : > { %v5870_v56 = vld [vmem:[%s7630_s1 + $0x310] ss:$8 sps:$4 sm:$0xff]  }
 0x27b   : > { %v3573_v58 = vmax.f32 %v3445_v29, 0.0  ;;  %3250 = vmatmul.mubr.bf16.gmra.mrb[196].mxu1 %v5855_v38 }
 0x27c   : > { %3257 = vmatprep.mubr.bf16.mxu1 %v5856_v36 }
 0x27d   : > { %v3683_v33 = vpack.c.bf16 %v3573_v58, %v3572_v32  ;;  %v5871_v58 = vld [vmem:[%s7630_s1 + $0x324] ss:$8 sps:$4 sm:$0xff]  }
 0x27e   : > { %v3043_v2 = vpop.f32.mrb[92].mxu1 }
 0x27f   : > { %v3446_v21 = vadd.f32 %v3043_v2, %v1643_v62  ;;  %v3045_v34 = vpop.f32.mrb[93].mxu1  ;;  %5479 = vmatmul.mubr.msk.bf16.gmra.mrb[172].mxu0 %vm1871_vm0, %v3683_v33 }
 0x280   : > { %v3046_v25 = vpop.f32.mrb[94].mxu1 }
 0x281   : > { %v3447_v47 = vadd.f32 %v3046_v25, %v1644_v28  ;;  %v3048_v9 = vpop.f32.mrb[95].mxu1  ;;  %v3574_v51 = vmax.f32 %v3446_v21, 0.0  ;;  %v1653_v28 = vadd.f32 %v7720_v37, %v6681_v48 }
 0x282   : > { %v5873_v9 = vld [vmem:[%s7630_s1 + $0x320] ss:$8 sps:$4 sm:$0xff]  }
 0x283   : > { %v3575_v44 = vmax.f32 %v3447_v47, 0.0  ;;  %3258 = vmatmul.mubr.bf16.gmra.mrb[200].mxu1 %v5858_v5  ;;  %v7721_v5 = vld [vmem:[#allocation3_spill] sm:$0xff] }
 0x284   : > { %3265 = vmatprep.mubr.bf16.mxu1 %v5859_v45  ;;  %v1654_v25 = vadd.f32 %v7721_v5, %v6681_v48 }
 0x285   : > { %v3684_v54 = vpack.c.bf16 %v3575_v44, %v3574_v51  ;;  %v5874_v44 = vld [vmem:[%s7630_s1 + $0x334] ss:$8 sps:$4 sm:$0xff]  }
 0x286   : > { %v3051_v1 = vpop.f32.mrb[96].mxu1 }
 0x287   : > { %v3448_v61 = vadd.f32 %v3051_v1, %v1645_v17  ;;  %v3053_v60 = vpop.f32.mrb[97].mxu1  ;;  %5482 = vmatprep.mubr.msk.bf16.mxu0 %vm1871_vm0, %v3684_v54 }
 0x288   : > { %v3054_v16 = vpop.f32.mrb[98].mxu1 }
 0x289   : > { %v3449_v10 = vadd.f32 %v3054_v16, %v1646_v52  ;;  %v3056_v8 = vpop.f32.mrb[99].mxu1  ;;  %v3576_v63 = vmax.f32 %v3448_v61, 0.0  ;;  %v7722_v61 = vld [vmem:[#allocation5_spill] sm:$0xff] }
 0x28a   : > { %v1655_v60 = vadd.f32 %v6681_v48, %v7722_v61 }
 0x28b   : > { %v3577_v23 = vmax.f32 %v3449_v10, 0.0  ;;  %3266 = vmatmul.mubr.bf16.gmra.mrb[204].mxu1 %v5861_v40 }
 0x28c   : > { %3273 = vmatprep.mubr.bf16.mxu1 %v5862_v19  ;;  %v7723_v19 = vld [vmem:[#allocation7_spill] sm:$0xff] }
 0x28d   : > { %v3685_v12 = vpack.c.bf16 %v3577_v23, %v3576_v63  ;;  %v1656_v10 = vadd.f32 %v6681_v48, %v7723_v19  ;;  %v5876_v23 = vld [vmem:[%s7630_s1 + $0x330] ss:$8 sps:$4 sm:$0xff]  }
 0x28e   : > { %v3059_v42 = vpop.f32.mrb[100].mxu1 }
 0x28f   : > { %v3450_v43 = vadd.f32 %v3059_v42, %v1647_v14  ;;  %v3061_v50 = vpop.f32.mrb[101].mxu1  ;;  %5483 = vmatmul.mubr.msk.bf16.gmra.mrb[176].mxu0 %vm1871_vm0, %v3685_v12  ;;  %v5877_v12 = vld [vmem:[%s7630_s1 + $0x344] ss:$8 sps:$4 sm:$0xff]  }
 0x290   : > { %v3062_v0 = vpop.f32.mrb[102].mxu1 }
 0x291   : > { %v3451_v26 = vadd.f32 %v3062_v0, %v1648_v15  ;;  %v3064_v20 = vpop.f32.mrb[103].mxu1  ;;  %v3578_v11 = vmax.f32 %v3450_v43, 0.0 }
 0x292   : > { %v7725_v20 = vld [vmem:[#allocation6_spill] sm:$0xff] }
 0x293   : > { %v3579_v6 = vmax.f32 %v3451_v26, 0.0  ;;  %3274 = vmatmul.mubr.bf16.gmra.mrb[208].mxu1 %v5864_v53  ;;  %v7724_v53 = vld [vmem:[#allocation4_spill] sm:$0xff] }
 0x294   : > { %3281 = vmatprep.mubr.bf16.mxu1 %v5865_v4  ;;  %v1657_v0 = vadd.f32 %v7724_v53, %v6681_v48 }
 0x295   : > { %v3686_v31 = vpack.c.bf16 %v3579_v6, %v3578_v11  ;;  %v1658_v11 = vadd.f32 %v7725_v20, %v6681_v48 }
 0x296   : > { %v3067_v22 = vpop.f32.mrb[104].mxu1 }
 0x297   : > { %v3452_v57 = vadd.f32 %v3067_v22, %v1649_v27  ;;  %v3069_v35 = vpop.f32.mrb[105].mxu1  ;;  %5486 = vmatprep.mubr.msk.bf16.mxu0 %vm1871_vm0, %v3686_v31  ;;  %v5879_v31 = vld [vmem:[%s7630_s1 + $0x340] ss:$8 sps:$4 sm:$0xff]  }
 0x298   : > { %v3070_v3 = vpop.f32.mrb[106].mxu1 }
 0x299   : > { %v3453_v39 = vadd.f32 %v3070_v3, %v1650_v41  ;;  %v3072_v18 = vpop.f32.mrb[107].mxu1  ;;  %v3580_v13 = vmax.f32 %v3452_v57, 0.0  ;;  %v5880_v41 = vld [vmem:[%s7630_s1 + $0x354] ss:$8 sps:$4 sm:$0xff]  }
 0x29b   : > { %v3581_v59 = vmax.f32 %v3453_v39, 0.0  ;;  %3282 = vmatmul.mubr.bf16.gmra.mrb[212].mxu1 %v5867_v7 }
 0x29c   : > { %3289 = vmatprep.mubr.bf16.mxu1 %v5868_v46  ;;  %v7726_v46 = vld [vmem:[#allocation9_spill] sm:$0xff] }
 0x29d   : > { %v3687_v49 = vpack.c.bf16 %v3581_v59, %v3580_v13  ;;  %v1659_v39 = vadd.f32 %v6681_v48, %v7726_v46  ;;  %v7727_v59 = vld [vmem:[#allocation11_spill] sm:$0xff] }
 0x29e   : > { %v3075_v38 = vpop.f32.mrb[108].mxu1 }
 0x29f   : > { %v3454_v36 = vadd.f32 %v3075_v38, %v1651_v24  ;;  %v3077_v29 = vpop.f32.mrb[109].mxu1  ;;  %5487 = vmatmul.mubr.msk.bf16.gmra.mrb[180].mxu0 %vm1871_vm0, %v3687_v49  ;;  %v1660_v24 = vadd.f32 %v6681_v48, %v7727_v59 }
 0x2a0   : > { %v3078_v32 = vpop.f32.mrb[110].mxu1  ;;  %v5883_v29 = vld [vmem:[%s7630_s1 + $0x364] ss:$8 sps:$4 sm:$0xff]  }
 0x2a1   : > { %v3455_v62 = vadd.f32 %v3078_v32, %v1652_v55  ;;  %v3080_v30 = vpop.f32.mrb[111].mxu1  ;;  %v3582_v33 = vmax.f32 %v3454_v36, 0.0  ;;  %v5882_v55 = vld [vmem:[%s7630_s1 + $0x350] ss:$8 sps:$4 sm:$0xff]  }
 0x2a2   : > { %v7728_v30 = vld [vmem:[#allocation8_spill] sm:$0xff] }
 0x2a3   : > { %v3583_v2 = vmax.f32 %v3455_v62, 0.0  ;;  %3290 = vmatmul.mubr.bf16.gmra.mrb[216].mxu1 %v5870_v56 }
 0x2a4   : > { %3297 = vmatprep.mubr.bf16.mxu1 %v5871_v58 }
 0x2a5   : > { %v3688_v21 = vpack.c.bf16 %v3583_v2, %v3582_v33  ;;  %v1661_v33 = vadd.f32 %v7728_v30, %v6681_v48 }
 0x2a6   : > { %v3083_v34 = vpop.f32.mrb[112].mxu1 }
 0x2a7   : > { %v3456_v45 = vadd.f32 %v3083_v34, %v1653_v28  ;;  %v3085_v47 = vpop.f32.mrb[113].mxu1  ;;  %5490 = vmatprep.mubr.msk.bf16.mxu0 %vm1871_vm0, %v3688_v21  ;;  %v7729_v28 = vld [vmem:[#allocation10_spill] sm:$0xff] }
 0x2a8   : > { %v3086_v51 = vpop.f32.mrb[114].mxu1  ;;  %v1662_v21 = vadd.f32 %v7729_v28, %v6681_v48  ;;  %v5886_v47 = vld [vmem:[%s7630_s1 + $0x374] ss:$8 sps:$4 sm:$0xff]  }
 0x2a9   : > { %v3457_v17 = vadd.f32 %v3086_v51, %v1654_v25  ;;  %v3088_v54 = vpop.f32.mrb[115].mxu1  ;;  %v3584_v1 = vmax.f32 %v3456_v45, 0.0  ;;  %v5885_v25 = vld [vmem:[%s7630_s1 + $0x360] ss:$8 sps:$4 sm:$0xff]  }
 0x2aa   : > { %v7730_v54 = vld [vmem:[#allocation13_spill] sm:$0xff] }
 0x2ab   : > { %v3585_v52 = vmax.f32 %v3457_v17, 0.0  ;;  %3298 = vmatmul.mubr.bf16.gmra.mrb[220].mxu1 %v5873_v9 }
 0x2ac   : > { %3305 = vmatprep.mubr.bf16.mxu1 %v5874_v44 }
 0x2ad   : > { %v3689_v40 = vpack.c.bf16 %v3585_v52, %v3584_v1  ;;  %v1663_v1 = vadd.f32 %v6681_v48, %v7730_v54 }
 0x2ae   : > { %v3091_v16 = vpop.f32.mrb[116].mxu1 }
 0x2af   : > { %v3458_v8 = vadd.f32 %v3091_v16, %v1655_v60  ;;  %v3093_v63 = vpop.f32.mrb[117].mxu1  ;;  %5491 = vmatmul.mubr.msk.bf16.gmra.mrb[184].mxu0 %vm1871_vm0, %v3689_v40  ;;  %v7731_v60 = vld [vmem:[#allocation15_spill] sm:$0xff] }
 0x2b0   : > { %v3094_v14 = vpop.f32.mrb[118].mxu1  ;;  %v1664_v40 = vadd.f32 %v6681_v48, %v7731_v60  ;;  %v5889_v63 = vld [vmem:[%s7630_s1 + $0x384] ss:$8 sps:$4 sm:$0xff]   ;;  %v7038_v60 = vld [vmem:[%s7634_s5] ss:$0 sm:$0xff] }
 0x2b1   : > { %v3459_v42 = vadd.f32 %v3094_v14, %v1656_v10  ;;  %v3096_v15 = vpop.f32.mrb[119].mxu1  ;;  %v3586_v43 = vmax.f32 %v3458_v8, 0.0  ;;  %v5888_v10 = vld [vmem:[%s7630_s1 + $0x370] ss:$8 sps:$4 sm:$0xff]  }
 0x2b2   : > { %v7732_v15 = vld [vmem:[#allocation12_spill] sm:$0xff] }
 0x2b3   : > { %v3587_v50 = vmax.f32 %v3459_v42, 0.0  ;;  %3306 = vmatmul.mubr.bf16.gmra.mrb[224].mxu1 %v5876_v23 }
 0x2b4   : > { %3313 = vmatprep.mubr.bf16.mxu1 %v5877_v12 }
 0x2b5   : > { %v3690_v4 = vpack.c.bf16 %v3587_v50, %v3586_v43  ;;  %v1665_v43 = vadd.f32 %v7732_v15, %v6681_v48 }
 0x2b6   : > { %v3099_v26 = vpop.f32.mrb[120].mxu1 }
 0x2b7   : > { %v3460_v6 = vadd.f32 %v3099_v26, %v1657_v0  ;;  %v3101_v27 = vpop.f32.mrb[121].mxu1  ;;  %5494 = vmatprep.mubr.msk.bf16.mxu0 %vm1871_vm0, %v3690_v4  ;;  %v7733_v0 = vld [vmem:[#allocation14_spill] sm:$0xff] }
 0x2b8   : > { %v3102_v22 = vpop.f32.mrb[122].mxu1  ;;  %v1666_v4 = vadd.f32 %v7733_v0, %v6681_v48  ;;  %v5892_v27 = vld [vmem:[%s7630_s1 + $0x394] ss:$8 sps:$4 sm:$0xff]  }
 0x2b9   : > { %v3461_v57 = vadd.f32 %v3102_v22, %v1658_v11  ;;  %v3104_v35 = vpop.f32.mrb[123].mxu1  ;;  %v3588_v7 = vmax.f32 %v3460_v6, 0.0  ;;  %v5891_v11 = vld [vmem:[%s7630_s1 + $0x380] ss:$8 sps:$4 sm:$0xff]  }
 0x2ba   : > { %v7734_v35 = vld [vmem:[#allocation17_spill] sm:$0xff] }
 0x2bb   : > { %v3589_v3 = vmax.f32 %v3461_v57, 0.0  ;;  %3314 = vmatmul.mubr.bf16.gmra.mrb[228].mxu1 %v5879_v31 }
 0x2bc   : > { %3321 = vmatprep.mubr.bf16.mxu1 %v5880_v41 }
 0x2bd   : > { %v3691_v18 = vpack.c.bf16 %v3589_v3, %v3588_v7  ;;  %v1667_v7 = vadd.f32 %v6681_v48, %v7734_v35 }
 0x2be   : > { %v3107_v13 = vpop.f32.mrb[124].mxu1 }
 0x2bf   : > { %v3462_v49 = vadd.f32 %v3107_v13, %v1659_v39  ;;  %v3109_v38 = vpop.f32.mrb[125].mxu1  ;;  %5495 = vmatmul.mubr.msk.bf16.gmra.mrb[188].mxu0 %vm1871_vm0, %v3691_v18  ;;  %v7735_v39 = vld [vmem:[#allocation19_spill] sm:$0xff] }
 0x2c0   : > { %v3110_v36 = vpop.f32.mrb[126].mxu1  ;;  %v1668_v18 = vadd.f32 %v6681_v48, %v7735_v39  ;;  %v5895_v38 = vld [vmem:[%s7630_s1 + $0x3a4] ss:$8 sps:$4 sm:$0xff]  }
 0x2c1   : > { %v3463_v56 = vadd.f32 %v3110_v36, %v1660_v24  ;;  %v3112_v32 = vpop.f32.mrb[127].mxu1  ;;  %v3590_v58 = vmax.f32 %v3462_v49, 0.0  ;;  %v5894_v24 = vld [vmem:[%s7630_s1 + $0x390] ss:$8 sps:$4 sm:$0xff]   ;;  %v7741_v39 = vld [vmem:[#allocation22_spill] sm:$0xff] }
 0x2c2   : > { %v2197_v32 = vld [vmem:[%s7630_s1 + $0x3a0] sm:$0xff] }
 0x2c3   : > { %v3591_v62 = vmax.f32 %v3463_v56, 0.0  ;;  %3322 = vmatmul.mubr.bf16.gmra.mrb[232].mxu1 %v5882_v55 }
 0x2c4   : > { %3329 = vmatprep.mubr.bf16.mxu1 %v5883_v29 }
 0x2c5   : > { %v3692_v2 = vpack.c.bf16 %v3591_v62, %v3590_v58  ;;  %v2198_v58 = vld [vmem:[%s7630_s1 + $0x3a8] sm:$0xff]  ;;  %v7736_v62 = vld [vmem:[#allocation16_spill] sm:$0xff] }
 0x2c6   : > { %v3115_v37 = vpop.f32.mrb[128].mxu1  ;;  %v1669_v30 = vadd.f32 %v7736_v62, %v6681_v48 }
 0x2c7   : > { %v3464_v34 = vadd.f32 %v3115_v37, %v1661_v33  ;;  %v3117_v5 = vpop.f32.mrb[129].mxu1  ;;  %5498 = vmatprep.mubr.msk.bf16.mxu0 %vm1871_vm0, %v3692_v2  ;;  %v7737_v37 = vld [vmem:[#allocation18_spill] sm:$0xff] }
 0x2c8   : > { %v3118_v45 = vpop.f32.mrb[130].mxu1  ;;  %v1670_v28 = vadd.f32 %v7737_v37, %v6681_v48  ;;  %v5027_v5 = vcombine.low %v2197_v32, %v2198_v58 }
 0x2c9   : > { %v3465_v9 = vadd.f32 %v3118_v45, %v1662_v21  ;;  %v3120_v51 = vpop.f32.mrb[131].mxu1  ;;  %v3592_v44 = vmax.f32 %v3464_v34, 0.0  ;;  %v7023_v45 = vld [vmem:[%s7636_s7] ss:$0 sm:$0xff] }
 0x2cb   : > { %v3593_v17 = vmax.f32 %v3465_v9, 0.0  ;;  %3330 = vmatmul.mubr.bf16.gmra.mrb[236].mxu1 %v5885_v25 }
 0x2cc   : > { %3337 = vmatprep.mubr.bf16.mxu1 %v5886_v47  ;;  %v5899_v47 = vld [vmem:[%s7630_s1 + $0x3b4] ss:$8 sps:$4 sm:$0xff]  }
 0x2cd   : > { %v3693_v52 = vpack.c.bf16 %v3593_v17, %v3592_v44 }
 0x2ce   : > { %v3123_v61 = vpop.f32.mrb[132].mxu1 }
 0x2cf   : > { %v3466_v16 = vadd.f32 %v3123_v61, %v1663_v1  ;;  %v3125_v19 = vpop.f32.mrb[133].mxu1  ;;  %5499 = vmatmul.mubr.msk.bf16.gmra.mrb[192].mxu0 %vm1871_vm0, %v3693_v52 }
 0x2d0   : > { %v3126_v8 = vpop.f32.mrb[134].mxu1 }
 0x2d1   : > { %v3467_v23 = vadd.f32 %v3126_v8, %v1664_v40  ;;  %v3128_v14 = vpop.f32.mrb[135].mxu1  ;;  %v3594_v12 = vmax.f32 %v3466_v16, 0.0  ;;  %v7738_v40 = vld [vmem:[#allocation21_spill] sm:$0xff] }
 0x2d2   : > { %v1671_v16 = vadd.f32 %v7038_v60, %v7738_v40  ;;  %v7739_v14 = vld [vmem:[#allocation23_spill] sm:$0xff] }
 0x2d3   : > { %v3595_v42 = vmax.f32 %v3467_v23, 0.0  ;;  %3338 = vmatmul.mubr.bf16.gmra.mrb[240].mxu1 %v5888_v10 }
 0x2d4   : > { %3345 = vmatprep.mubr.bf16.mxu1 %v5889_v63 }
 0x2d5   : > { %v3694_v50 = vpack.c.bf16 %v3595_v42, %v3594_v12  ;;  %v1672_v12 = vadd.f32 %v7038_v60, %v7739_v14 }
 0x2d6   : > { %v3131_v53 = vpop.f32.mrb[136].mxu1 }
 0x2d7   : > { %v3468_v26 = vadd.f32 %v3131_v53, %v1665_v43  ;;  %v3133_v20 = vpop.f32.mrb[137].mxu1  ;;  %5502 = vmatprep.mubr.msk.bf16.mxu0 %vm1871_vm0, %v3694_v50  ;;  %v5897_v43 = vld [vmem:[%s7630_s1 + $0x3b0] ss:$8 sps:$4 sm:$0xff]   ;;  %v5902_v53 = vld [vmem:[%s7630_s1 + $0x3c4] ss:$8 sps:$4 sm:$0xff]  }
 0x2d8   : > { %v3134_v6 = vpop.f32.mrb[138].mxu1 }
 0x2d9   : > { %v3469_v31 = vadd.f32 %v3134_v6, %v1666_v4  ;;  %v3136_v22 = vpop.f32.mrb[139].mxu1  ;;  %v3596_v41 = vmax.f32 %v3468_v26, 0.0 }
 0x2db   : > { %v3597_v57 = vmax.f32 %v3469_v31, 0.0  ;;  %3346 = vmatmul.mubr.bf16.gmra.mrb[244].mxu1 %v5891_v11  ;;  %v7740_v31 = vld [vmem:[#allocation20_spill] sm:$0xff] }
 0x2dc   : > { %3353 = vmatprep.mubr.bf16.mxu1 %v5892_v27  ;;  %v1673_v22 = vadd.f32 %v7038_v60, %v7740_v31 }
 0x2dd   : > { %v3695_v3 = vpack.c.bf16 %v3597_v57, %v3596_v41 }
 0x2de   : > { %v3139_v46 = vpop.f32.mrb[140].mxu1 }
 0x2df   : > { %v3470_v13 = vadd.f32 %v3139_v46, %v1667_v7  ;;  %v3141_v59 = vpop.f32.mrb[141].mxu1  ;;  %5503 = vmatmul.mubr.msk.bf16.gmra.mrb[196].mxu0 %vm1871_vm0, %v3695_v3 }
 0x2e0   : > { %v3142_v49 = vpop.f32.mrb[142].mxu1 }
 0x2e1   : > { %v3471_v55 = vadd.f32 %v3142_v49, %v1668_v18  ;;  %v3144_v36 = vpop.f32.mrb[143].mxu1  ;;  %v3598_v29 = vmax.f32 %v3470_v13, 0.0  ;;  %v1674_v18 = vadd.f32 %v7038_v60, %v7741_v39  ;;  %v5900_v49 = vld [vmem:[%s7630_s1 + $0x3c0] ss:$8 sps:$4 sm:$0xff]  }
 0x2e2   : > { %v7747_v39 = vld [vmem:[#allocation31_spill] sm:$0xff] }
 0x2e3   : > { %v3599_v56 = vmax.f32 %v3471_v55, 0.0  ;;  %3354 = vmatmul.mubr.bf16.gmra.mrb[248].mxu1 %v5894_v24  ;;  %v5905_v55 = vld [vmem:[%s7630_s1 + $0x3d4] ss:$8 sps:$4 sm:$0xff]  }
 0x2e4   : > { %3361 = vmatprep.mubr.bf16.mxu1 %v5895_v38 }
 0x2e5   : > { %v3696_v33 = vpack.c.bf16 %v3599_v56, %v3598_v29 }
 0x2e6   : > { %v3147_v2 = vpop.f32.mrb[144].mxu1 }
 0x2e7   : > { %v3472_v21 = vadd.f32 %v3147_v2, %v1669_v30  ;;  %v3149_v34 = vpop.f32.mrb[145].mxu1  ;;  %5506 = vmatprep.mubr.msk.bf16.mxu0 %vm1871_vm0, %v3696_v33  ;;  %v7742_v33 = vld [vmem:[#allocation25_spill] sm:$0xff] }
 0x2e8   : > { %v3150_v25 = vpop.f32.mrb[146].mxu1  ;;  %v1675_v2 = vadd.f32 %v7038_v60, %v7742_v33  ;;  %v7748_v33 = vld [vmem:[#allocation28_spill] sm:$0xff] }
 0x2e9   : > { %v3473_v9 = vadd.f32 %v3150_v25, %v1670_v28  ;;  %v3152_v51 = vpop.f32.mrb[147].mxu1  ;;  %v3600_v44 = vmax.f32 %v3472_v21, 0.0 }
 0x2ea   : > { %v5448_v48 = vpop.f32.mrb[140].mxu0 }
 0x2eb   : > { %v3601_v17 = vmax.f32 %v3473_v9, 0.0  ;;  %v3996_v54 = vadd.f32 %v5448_v48, %v7023_v45  ;;  %3362 = vmatmul.mubr.bf16.gmra.mrb[252].mxu1 %v5027_v5  ;;  %v3987_v1 = vpop.f32.mrb[141].mxu0 }
 0x2ec   : > { %v3988_v52 = vadd.f32 %v7023_v45, %v3987_v1  ;;  %v5449_v61 = vpop.f32.mrb[142].mxu0  ;;  %3369 = vmatprep.mubr.bf16.mxu1 %v5899_v47  ;;  %v7743_v47 = vld [vmem:[#allocation27_spill] sm:$0xff] }
 0x2ed   : > { %v3697_v19 = vpack.c.bf16 %v3601_v17, %v3600_v44  ;;  %4501 = vst.msk [vmem:[%s7031_s13 + $0x10] sm:$0xff] %vm4498_vm2, %v3996_v54  ;;  %v3999_v10 = vadd.f32 %v5449_v61, %v7023_v45  ;;  %v3990_v8 = vpop.f32.mrb[143].mxu0  ;;  %v1676_v9 = vadd.f32 %v7038_v60, %v7743_v47  ;;  %v5903_v17 = vld [vmem:[%s7630_s1 + $0x3d0] ss:$8 sps:$4 sm:$0xff]   ;;  %v5908_v1 = vld [vmem:[%s7630_s1 + $0x3e4] ss:$8 sps:$4 sm:$0xff]  }
 0x2ee   : > { %4499 = vst.msk [vmem:[%s7031_s13] sm:$0xff] %vm4498_vm2, %v3988_v52  ;;  %v3991_v63 = vadd.f32 %v7023_v45, %v3990_v8  ;;  %v3155_v23 = vpop.f32.mrb[148].mxu1 }
 0x2ef   : > { %4502 = vst.msk [vmem:[%s7031_s13 + $0x18] sm:$0xff] %vm4498_vm2, %v3999_v10  ;;  %v3474_v42 = vadd.f32 %v3155_v23, %v1671_v16  ;;  %v3157_v15 = vpop.f32.mrb[149].mxu1  ;;  %5507 = vmatmul.mubr.msk.bf16.gmra.mrb[200].mxu0 %vm1871_vm0, %v3697_v19 }
 0x2f0   : > { %4500 = vst.msk [vmem:[%s7031_s13 + $0x8] sm:$0xff] %vm4498_vm2, %v3991_v63  ;;  %v3158_v50 = vpop.f32.mrb[150].mxu1  ;;  %v7744_v63 = vld [vmem:[#allocation24_spill] sm:$0xff] }
 0x2f1   : > { %v3475_v0 = vadd.f32 %v3158_v50, %v1672_v12  ;;  %v3160_v4 = vpop.f32.mrb[151].mxu1  ;;  %v3602_v26 = vmax.f32 %v3474_v42, 0.0  ;;  %v1677_v23 = vadd.f32 %v7038_v60, %v7744_v63 }
 0x2f3   : > { %v3603_v20 = vmax.f32 %v3475_v0, 0.0  ;;  %3370 = vmatmul.mubr.bf16.gmra.mrb[0].mxu1 %v5897_v43  ;;  %v5452_v11 = vpop.f32.mrb[144].mxu0 }
 0x2f4   : > { %v4012_v6 = vadd.f32 %v5452_v11, %v7023_v45  ;;  %v4003_v27 = vpop.f32.mrb[145].mxu0  ;;  %3377 = vmatprep.mubr.bf16.mxu1 %v5902_v53  ;;  %v7745_v53 = vld [vmem:[#allocation26_spill] sm:$0xff] }
 0x2f5   : > { %v3698_v41 = vpack.c.bf16 %v3603_v20, %v3602_v26  ;;  %v4004_v57 = vadd.f32 %v7023_v45, %v4003_v27  ;;  %v5453_v35 = vpop.f32.mrb[146].mxu0  ;;  %v1678_v0 = vadd.f32 %v7038_v60, %v7745_v53  ;;  %v5906_v11 = vld [vmem:[%s7630_s1 + $0x3e0] ss:$8 sps:$4 sm:$0xff]   ;;  %v5911_v27 = vld [vmem:[%s7630_s1 + $0x3f4] ss:$8 sps:$4 sm:$0xff]  }
 0x2f6   : > { %4505 = vst.msk [vmem:[%s7031_s13 + $0x30] sm:$0xff] %vm4498_vm2, %v4012_v6  ;;  %v4015_v7 = vadd.f32 %v5453_v35, %v7023_v45  ;;  %v3163_v3 = vpop.f32.mrb[152].mxu1  ;;  %v4006_v46 = vpop.f32.mrb[147].mxu0  ;;  %v7746_v35 = vld [vmem:[#allocation29_spill] sm:$0xff] }
 0x2f7   : > { %4503 = vst.msk [vmem:[%s7031_s13 + $0x20] sm:$0xff] %vm4498_vm2, %v4004_v57  ;;  %v3476_v13 = vadd.f32 %v3163_v3, %v1673_v22  ;;  %v4007_v59 = vadd.f32 %v7023_v45, %v4006_v46  ;;  %v3165_v24 = vpop.f32.mrb[153].mxu1  ;;  %5510 = vmatprep.mubr.msk.bf16.mxu0 %vm1871_vm0, %v3698_v41 }
 0x2f8   : > { %4506 = vst.msk [vmem:[%s7031_s13 + $0x38] sm:$0xff] %vm4498_vm2, %v4015_v7  ;;  %v3166_v38 = vpop.f32.mrb[154].mxu1  ;;  %v1679_v7 = vadd.f32 %v7038_v60, %v7746_v35  ;;  %v5909_v24 = vld [vmem:[%s7630_s1 + $0x3f0] ss:$8 sps:$4 sm:$0xff]  }
 0x2f9   : > { %4504 = vst.msk [vmem:[%s7031_s13 + $0x28] sm:$0xff] %vm4498_vm2, %v4007_v59  ;;  %v3477_v36 = vadd.f32 %v3166_v38, %v1674_v18  ;;  %v3168_v29 = vpop.f32.mrb[155].mxu1  ;;  %v3604_v56 = vmax.f32 %v3476_v13, 0.0  ;;  %v1680_v18 = vadd.f32 %v7038_v60, %v7747_v39 }
 0x2fb   : > { %v3605_v32 = vmax.f32 %v3477_v36, 0.0  ;;  %3378 = vmatmul.mubr.bf16.gmra.mrb[4].mxu1 %v5900_v49  ;;  %v5456_v58 = vpop.f32.mrb[148].mxu0 }
 0x2fc   : > { %v4028_v62 = vadd.f32 %v5456_v58, %v7023_v45  ;;  %v4019_v30 = vpop.f32.mrb[149].mxu0  ;;  %3385 = vmatprep.mubr.bf16.mxu1 %v5905_v55 }
 0x2fd   : > { %v3699_v37 = vpack.c.bf16 %v3605_v32, %v3604_v56  ;;  %v4020_v28 = vadd.f32 %v7023_v45, %v4019_v30  ;;  %v5457_v21 = vpop.f32.mrb[150].mxu0 }
 0x2fe   : > { %4509 = vst.msk [vmem:[%s7031_s13 + $0x50] sm:$0xff] %vm4498_vm2, %v4028_v62  ;;  %v4031_v34 = vadd.f32 %v5457_v21, %v7023_v45  ;;  %v3171_v5 = vpop.f32.mrb[156].mxu1  ;;  %v4022_v25 = vpop.f32.mrb[151].mxu0 }
 0x2ff   : > { %4507 = vst.msk [vmem:[%s7031_s13 + $0x40] sm:$0xff] %vm4498_vm2, %v4020_v28  ;;  %v3478_v51 = vadd.f32 %v3171_v5, %v1675_v2  ;;  %v4023_v48 = vadd.f32 %v7023_v45, %v4022_v25  ;;  %v3173_v44 = vpop.f32.mrb[157].mxu1  ;;  %5511 = vmatmul.mubr.msk.bf16.gmra.mrb[204].mxu0 %vm1871_vm0, %v3699_v37  ;;  %v1681_v2 = vadd.f32 %v7038_v60, %v7748_v33  ;;  %v7749_v25 = vld [vmem:[#allocation30_spill] sm:$0xff] }
 0x300   : > { %4510 = vst.msk [vmem:[%s7031_s13 + $0x58] sm:$0xff] %vm4498_vm2, %v4031_v34  ;;  %v3174_v54 = vpop.f32.mrb[158].mxu1  ;;  %v1682_v47 = vadd.f32 %v7038_v60, %v7749_v25 }
 0x301   : > { %4508 = vst.msk [vmem:[%s7031_s13 + $0x48] sm:$0xff] %vm4498_vm2, %v4023_v48  ;;  %v3479_v52 = vadd.f32 %v3174_v54, %v1676_v9  ;;  %v3176_v61 = vpop.f32.mrb[159].mxu1  ;;  %v3606_v40 = vmax.f32 %v3478_v51, 0.0 }
 0x303   : > { %v3607_v16 = vmax.f32 %v3479_v52, 0.0  ;;  %3386 = vmatmul.mubr.bf16.gmra.mrb[8].mxu1 %v5903_v17  ;;  %v5460_v19 = vpop.f32.mrb[152].mxu0  ;;  %v7750_v52 = vld [vmem:[#allocation33_spill] sm:$0xff] }
 0x304   : > { %v4044_v10 = vadd.f32 %v5460_v19, %v7023_v45  ;;  %v4035_v8 = vpop.f32.mrb[153].mxu0  ;;  %3393 = vmatprep.mubr.bf16.mxu1 %v5908_v1  ;;  %v1683_v61 = vadd.f32 %v7038_v60, %v7750_v52  ;;  %v7751_v19 = vld [vmem:[#allocation35_spill] sm:$0xff] }
 0x305   : > { %v3700_v14 = vpack.c.bf16 %v3607_v16, %v3606_v40  ;;  %v4036_v12 = vadd.f32 %v7023_v45, %v4035_v8  ;;  %v5461_v42 = vpop.f32.mrb[154].mxu0 }
 0x306   : > { %4513 = vst.msk [vmem:[%s7031_s13 + $0x70] sm:$0xff] %vm4498_vm2, %v4044_v10  ;;  %v4047_v15 = vadd.f32 %v5461_v42, %v7023_v45  ;;  %v3179_v43 = vpop.f32.mrb[160].mxu1  ;;  %v4038_v50 = vpop.f32.mrb[155].mxu0  ;;  %v1684_v10 = vadd.f32 %v7038_v60, %v7751_v19 }
 0x307   : > { %4511 = vst.msk [vmem:[%s7031_s13 + $0x60] sm:$0xff] %vm4498_vm2, %v4036_v12  ;;  %v3480_v4 = vadd.f32 %v3179_v43, %v1677_v23  ;;  %v4039_v26 = vadd.f32 %v7023_v45, %v4038_v50  ;;  %v3181_v20 = vpop.f32.mrb[161].mxu1  ;;  %5514 = vmatprep.mubr.msk.bf16.mxu0 %vm1871_vm0, %v3700_v14 }
 0x308   : > { %4514 = vst.msk [vmem:[%s7031_s13 + $0x78] sm:$0xff] %vm4498_vm2, %v4047_v15  ;;  %v3182_v6 = vpop.f32.mrb[162].mxu1 }
 0x309   : > { %4512 = vst.msk [vmem:[%s7031_s13 + $0x68] sm:$0xff] %vm4498_vm2, %v4039_v26  ;;  %v3481_v31 = vadd.f32 %v3182_v6, %v1678_v0  ;;  %v3184_v22 = vpop.f32.mrb[163].mxu1  ;;  %v3608_v41 = vmax.f32 %v3480_v4, 0.0  ;;  %v7752_v26 = vld [vmem:[#allocation32_spill] sm:$0xff] }
 0x30a   : > { %v1685_v20 = vadd.f32 %v7038_v60, %v7752_v26 }
 0x30b   : > { %v3609_v57 = vmax.f32 %v3481_v31, 0.0  ;;  %3394 = vmatmul.mubr.bf16.gmra.mrb[12].mxu1 %v5906_v11 }
 0x30c   : > { %3401 = vmatprep.mubr.bf16.mxu1 %v5911_v27 }
 0x30d   : > { %v3701_v3 = vpack.c.bf16 %v3609_v57, %v3608_v41  ;;  %v7753_v41 = vld [vmem:[#allocation34_spill] sm:$0xff] }
 0x30e   : > { %v3187_v46 = vpop.f32.mrb[164].mxu1  ;;  %v1686_v57 = vadd.f32 %v7038_v60, %v7753_v41 }
 0x30f   : > { %v3482_v13 = vadd.f32 %v3187_v46, %v1679_v7  ;;  %v3189_v59 = vpop.f32.mrb[165].mxu1  ;;  %5515 = vmatmul.mubr.msk.bf16.gmra.mrb[208].mxu0 %vm1871_vm0, %v3701_v3 }
 0x310   : > { %v3190_v49 = vpop.f32.mrb[166].mxu1  ;;  %v7754_v59 = vld [vmem:[#allocation37_spill] sm:$0xff] }
 0x311   : > { %v3483_v38 = vadd.f32 %v3190_v49, %v1680_v18  ;;  %v3192_v55 = vpop.f32.mrb[167].mxu1  ;;  %v3610_v29 = vmax.f32 %v3482_v13, 0.0 }
 0x312   : > { %v5464_v36 = vpop.f32.mrb[156].mxu0  ;;  %v7755_v55 = vld [vmem:[#allocation39_spill] sm:$0xff] }
 0x313   : > { %v3611_v56 = vmax.f32 %v3483_v38, 0.0  ;;  %v4060_v32 = vadd.f32 %v5464_v36, %v7023_v45  ;;  %3402 = vmatmul.mubr.bf16.gmra.mrb[16].mxu1 %v5909_v24  ;;  %v4051_v58 = vpop.f32.mrb[157].mxu0  ;;  %v1687_v24 = vadd.f32 %v7038_v60, %v7754_v59  ;;  %v1688_v36 = vadd.f32 %v7038_v60, %v7755_v55 }
 0x314   : > { %v4052_v62 = vadd.f32 %v7023_v45, %v4051_v58  ;;  %v5465_v30 = vpop.f32.mrb[158].mxu0 }
 0x315   : > { %v3702_v37 = vpack.c.bf16 %v3611_v56, %v3610_v29  ;;  %4517 = vst.msk [vmem:[%s7031_s13 + $0x90] sm:$0xff] %vm4498_vm2, %v4060_v32  ;;  %v4063_v28 = vadd.f32 %v5465_v30, %v7023_v45  ;;  %v4054_v21 = vpop.f32.mrb[159].mxu0 }
 0x316   : > { %4515 = vst.msk [vmem:[%s7031_s13 + $0x80] sm:$0xff] %vm4498_vm2, %v4052_v62  ;;  %v4055_v34 = vadd.f32 %v7023_v45, %v4054_v21  ;;  %v3195_v5 = vpop.f32.mrb[168].mxu1 }
 0x317   : > { %4518 = vst.msk [vmem:[%s7031_s13 + $0x98] sm:$0xff] %vm4498_vm2, %v4063_v28  ;;  %v3484_v9 = vadd.f32 %v3195_v5, %v1681_v2  ;;  %v3197_v51 = vpop.f32.mrb[169].mxu1  ;;  %5518 = vmatprep.mubr.msk.bf16.mxu0 %vm1871_vm0, %v3702_v37  ;;  %v7756_v5 = vld [vmem:[#allocation36_spill] sm:$0xff] }
 0x318   : > { %4516 = vst.msk [vmem:[%s7031_s13 + $0x88] sm:$0xff] %vm4498_vm2, %v4055_v34  ;;  %v3198_v48 = vpop.f32.mrb[170].mxu1  ;;  %v1689_v25 = vadd.f32 %v7038_v60, %v7756_v5 }
 0x319   : > { %v3485_v44 = vadd.f32 %v3198_v48, %v1682_v47  ;;  %v3200_v17 = vpop.f32.mrb[171].mxu1  ;;  %v3612_v54 = vmax.f32 %v3484_v9, 0.0 }
 0x31a   : > { %v7757_v17 = vld [vmem:[#allocation38_spill] sm:$0xff] }
 0x31b   : > { %v3613_v1 = vmax.f32 %v3485_v44, 0.0 }
 0x31d   : > { %v3703_v40 = vpack.c.bf16 %v3613_v1, %v3612_v54  ;;  %v1690_v54 = vadd.f32 %v7038_v60, %v7757_v17 }
 0x31e   : > { %v3203_v16 = vpop.f32.mrb[172].mxu1 }
 0x31f   : > { %v3486_v8 = vadd.f32 %v3203_v16, %v1683_v61  ;;  %v3205_v63 = vpop.f32.mrb[173].mxu1  ;;  %5519 = vmatmul.mubr.msk.bf16.gmra.mrb[212].mxu0 %vm1871_vm0, %v3703_v40 }
 0x320   : > { %v3206_v23 = vpop.f32.mrb[174].mxu1 }
 0x321   : > { %v3487_v14 = vadd.f32 %v3206_v23, %v1684_v10  ;;  %v3208_v12 = vpop.f32.mrb[175].mxu1  ;;  %v3614_v15 = vmax.f32 %v3486_v8, 0.0  ;;  %v7758_v8 = vld [vmem:[#allocation41_spill] sm:$0xff] }
 0x322   : > { %v5468_v42 = vpop.f32.mrb[160].mxu0  ;;  %v1691_v63 = vadd.f32 %v7038_v60, %v7758_v8  ;;  %v7759_v12 = vld [vmem:[#allocation43_spill] sm:$0xff] }
 0x323   : > { %v3615_v43 = vmax.f32 %v3487_v14, 0.0  ;;  %v4076_v50 = vadd.f32 %v5468_v42, %v7023_v45  ;;  %v4067_v53 = vpop.f32.mrb[161].mxu0  ;;  %v1692_v42 = vadd.f32 %v7038_v60, %v7759_v12 }
 0x324   : > { %v4068_v0 = vadd.f32 %v7023_v45, %v4067_v53  ;;  %v5469_v4 = vpop.f32.mrb[162].mxu0 }
 0x325   : > { %v3704_v11 = vpack.c.bf16 %v3615_v43, %v3614_v15  ;;  %4521 = vst.msk [vmem:[%s7031_s13 + $0xb0] sm:$0xff] %vm4498_vm2, %v4076_v50  ;;  %v4079_v6 = vadd.f32 %v5469_v4, %v7023_v45  ;;  %v4070_v27 = vpop.f32.mrb[163].mxu0 }
 0x326   : > { %4519 = vst.msk [vmem:[%s7031_s13 + $0xa0] sm:$0xff] %vm4498_vm2, %v4068_v0  ;;  %v4071_v31 = vadd.f32 %v7023_v45, %v4070_v27  ;;  %v3211_v22 = vpop.f32.mrb[176].mxu1 }
 0x327   : > { %4522 = vst.msk [vmem:[%s7031_s13 + $0xb8] sm:$0xff] %vm4498_vm2, %v4079_v6  ;;  %v3488_v35 = vadd.f32 %v3211_v22, %v1685_v20  ;;  %v3213_v7 = vpop.f32.mrb[177].mxu1  ;;  %5522 = vmatprep.mubr.msk.bf16.mxu0 %vm1871_vm0, %v3704_v11  ;;  %v7760_v22 = vld [vmem:[#allocation40_spill] sm:$0xff] }
 0x328   : > { %4520 = vst.msk [vmem:[%s7031_s13 + $0xa8] sm:$0xff] %vm4498_vm2, %v4071_v31  ;;  %v3214_v3 = vpop.f32.mrb[178].mxu1  ;;  %v1693_v41 = vadd.f32 %v7038_v60, %v7760_v22 }
 0x329   : > { %v3489_v46 = vadd.f32 %v3214_v3, %v1686_v57  ;;  %v3216_v39 = vpop.f32.mrb[179].mxu1  ;;  %v3616_v18 = vmax.f32 %v3488_v35, 0.0 }
 0x32a   : > { %v7761_v39 = vld [vmem:[#allocation42_spill] sm:$0xff] }
 0x32b   : > { %v3617_v13 = vmax.f32 %v3489_v46, 0.0 }
 0x32d   : > { %v3705_v49 = vpack.c.bf16 %v3617_v13, %v3616_v18  ;;  %v1694_v18 = vadd.f32 %v7038_v60, %v7761_v39 }
 0x32e   : > { %v3219_v38 = vpop.f32.mrb[180].mxu1 }
 0x32f   : > { %v3490_v29 = vadd.f32 %v3219_v38, %v1687_v24  ;;  %v3221_v56 = vpop.f32.mrb[181].mxu1  ;;  %5523 = vmatmul.mubr.msk.bf16.gmra.mrb[216].mxu0 %vm1871_vm0, %v3705_v49 }
 0x330   : > { %v3222_v32 = vpop.f32.mrb[182].mxu1 }
 0x331   : > { %v3491_v58 = vadd.f32 %v3222_v32, %v1688_v36  ;;  %v3224_v62 = vpop.f32.mrb[183].mxu1  ;;  %v3618_v33 = vmax.f32 %v3490_v29, 0.0  ;;  %v7762_v29 = vld [vmem:[#allocation45_spill] sm:$0xff] }
 0x332   : > { %v5472_v30 = vpop.f32.mrb[164].mxu0  ;;  %v1695_v56 = vadd.f32 %v7038_v60, %v7762_v29  ;;  %v7763_v62 = vld [vmem:[#allocation47_spill] sm:$0xff] }
 0x333   : > { %v3619_v2 = vmax.f32 %v3491_v58, 0.0  ;;  %v4092_v37 = vadd.f32 %v5472_v30, %v7023_v45  ;;  %v4083_v28 = vpop.f32.mrb[165].mxu0  ;;  %v1696_v30 = vadd.f32 %v7038_v60, %v7763_v62 }
 0x334   : > { %v4084_v21 = vadd.f32 %v7023_v45, %v4083_v28  ;;  %v5473_v34 = vpop.f32.mrb[166].mxu0 }
 0x335   : > { %v3706_v47 = vpack.c.bf16 %v3619_v2, %v3618_v33  ;;  %4525 = vst.msk [vmem:[%s7031_s13 + $0xd0] sm:$0xff] %vm4498_vm2, %v4092_v37  ;;  %v4095_v9 = vadd.f32 %v5473_v34, %v7023_v45  ;;  %v4086_v51 = vpop.f32.mrb[167].mxu0 }
 0x336   : > { %4523 = vst.msk [vmem:[%s7031_s13 + $0xc0] sm:$0xff] %vm4498_vm2, %v4084_v21  ;;  %v4087_v48 = vadd.f32 %v7023_v45, %v4086_v51  ;;  %v3227_v44 = vpop.f32.mrb[184].mxu1 }
 0x337   : > { %4526 = vst.msk [vmem:[%s7031_s13 + $0xd8] sm:$0xff] %vm4498_vm2, %v4095_v9  ;;  %v3492_v1 = vadd.f32 %v3227_v44, %v1689_v25  ;;  %v3229_v52 = vpop.f32.mrb[185].mxu1  ;;  %5526 = vmatprep.mubr.msk.bf16.mxu0 %vm1871_vm0, %v3706_v47  ;;  %v7764_v44 = vld [vmem:[#allocation44_spill] sm:$0xff] }
 0x338   : > { %4524 = vst.msk [vmem:[%s7031_s13 + $0xc8] sm:$0xff] %vm4498_vm2, %v4087_v48  ;;  %v3230_v61 = vpop.f32.mrb[186].mxu1  ;;  %v1697_v17 = vadd.f32 %v7038_v60, %v7764_v44 }
 0x339   : > { %v3493_v40 = vadd.f32 %v3230_v61, %v1690_v54  ;;  %v3232_v16 = vpop.f32.mrb[187].mxu1  ;;  %v3620_v19 = vmax.f32 %v3492_v1, 0.0 }
 0x33a   : > { %v7765_v16 = vld [vmem:[#allocation46_spill] sm:$0xff] }
 0x33b   : > { %v3621_v10 = vmax.f32 %v3493_v40, 0.0 }
 0x33d   : > { %v3707_v23 = vpack.c.bf16 %v3621_v10, %v3620_v19  ;;  %v1698_v19 = vadd.f32 %v7038_v60, %v7765_v16 }
 0x33e   : > { %v3235_v14 = vpop.f32.mrb[188].mxu1 }
 0x33f   : > { %v3494_v15 = vadd.f32 %v3235_v14, %v1691_v63  ;;  %v3237_v43 = vpop.f32.mrb[189].mxu1  ;;  %5527 = vmatmul.mubr.msk.bf16.gmra.mrb[220].mxu0 %vm1871_vm0, %v3707_v23 }
 0x340   : > { %v3238_v50 = vpop.f32.mrb[190].mxu1 }
 0x341   : > { %v3495_v53 = vadd.f32 %v3238_v50, %v1692_v42  ;;  %v3240_v0 = vpop.f32.mrb[191].mxu1  ;;  %v3622_v26 = vmax.f32 %v3494_v15, 0.0  ;;  %v7766_v15 = vld [vmem:[#allocation49_spill] sm:$0xff] }
 0x342   : > { %v5476_v4 = vpop.f32.mrb[168].mxu0  ;;  %v1699_v43 = vadd.f32 %v7038_v60, %v7766_v15  ;;  %v7767_v0 = vld [vmem:[#allocation51_spill] sm:$0xff] }
 0x343   : > { %v3623_v20 = vmax.f32 %v3495_v53, 0.0  ;;  %v4108_v11 = vadd.f32 %v5476_v4, %v7023_v45  ;;  %v4099_v6 = vpop.f32.mrb[169].mxu0  ;;  %v1700_v4 = vadd.f32 %v7038_v60, %v7767_v0 }
 0x344   : > { %v4100_v27 = vadd.f32 %v7023_v45, %v4099_v6  ;;  %v5477_v31 = vpop.f32.mrb[170].mxu0 }
 0x345   : > { %v3708_v57 = vpack.c.bf16 %v3623_v20, %v3622_v26  ;;  %4529 = vst.msk [vmem:[%s7031_s13 + $0xf0] sm:$0xff] %vm4498_vm2, %v4108_v11  ;;  %v4111_v35 = vadd.f32 %v5477_v31, %v7023_v45  ;;  %v4102_v7 = vpop.f32.mrb[171].mxu0 }
 0x346   : > { %4527 = vst.msk [vmem:[%s7031_s13 + $0xe0] sm:$0xff] %vm4498_vm2, %v4100_v27  ;;  %v4103_v3 = vadd.f32 %v7023_v45, %v4102_v7  ;;  %v3243_v46 = vpop.f32.mrb[192].mxu1 }
 0x347   : > { %4530 = vst.msk [vmem:[%s7031_s13 + $0xf8] sm:$0xff] %vm4498_vm2, %v4111_v35  ;;  %v3496_v13 = vadd.f32 %v3243_v46, %v1693_v41  ;;  %v3245_v59 = vpop.f32.mrb[193].mxu1  ;;  %5530 = vmatprep.mubr.msk.bf16.mxu0 %vm1871_vm0, %v3708_v57  ;;  %v7768_v46 = vld [vmem:[#allocation48_spill] sm:$0xff] }
 0x348   : > { %4528 = vst.msk [vmem:[%s7031_s13 + $0xe8] sm:$0xff] %vm4498_vm2, %v4103_v3  ;;  %v3246_v24 = vpop.f32.mrb[194].mxu1  ;;  %v1701_v39 = vadd.f32 %v7038_v60, %v7768_v46 }
 0x349   : > { %v3497_v49 = vadd.f32 %v3246_v24, %v1694_v18  ;;  %v3248_v38 = vpop.f32.mrb[195].mxu1  ;;  %v3624_v55 = vmax.f32 %v3496_v13, 0.0 }
 0x34a   : > { %v7769_v38 = vld [vmem:[#allocation50_spill] sm:$0xff] }
 0x34b   : > { %v3625_v36 = vmax.f32 %v3497_v49, 0.0 }
 0x34d   : > { %v3709_v32 = vpack.c.bf16 %v3625_v36, %v3624_v55  ;;  %v1702_v55 = vadd.f32 %v7038_v60, %v7769_v38 }
 0x34e   : > { %v3251_v58 = vpop.f32.mrb[196].mxu1 }
 0x34f   : > { %v3498_v33 = vadd.f32 %v3251_v58, %v1695_v56  ;;  %v3253_v2 = vpop.f32.mrb[197].mxu1  ;;  %5531 = vmatmul.mubr.msk.bf16.gmra.mrb[224].mxu0 %vm1871_vm0, %v3709_v32 }
 0x350   : > { %v3254_v37 = vpop.f32.mrb[198].mxu1 }
 0x351   : > { %v3499_v28 = vadd.f32 %v3254_v37, %v1696_v30  ;;  %v3256_v21 = vpop.f32.mrb[199].mxu1  ;;  %v3626_v5 = vmax.f32 %v3498_v33, 0.0  ;;  %v7770_v33 = vld [vmem:[#allocation53_spill] sm:$0xff] }
 0x352   : > { %v5480_v34 = vpop.f32.mrb[172].mxu0  ;;  %v1703_v2 = vadd.f32 %v7038_v60, %v7770_v33  ;;  %v7771_v21 = vld [vmem:[#allocation55_spill] sm:$0xff] }
 0x353   : > { %v3627_v25 = vmax.f32 %v3499_v28, 0.0  ;;  %v4124_v47 = vadd.f32 %v5480_v34, %v7023_v45  ;;  %v4115_v9 = vpop.f32.mrb[173].mxu0  ;;  %v1704_v34 = vadd.f32 %v7038_v60, %v7771_v21 }
 0x354   : > { %v4116_v51 = vadd.f32 %v7023_v45, %v4115_v9  ;;  %v5481_v48 = vpop.f32.mrb[174].mxu0 }
 0x355   : > { %v3710_v54 = vpack.c.bf16 %v3627_v25, %v3626_v5  ;;  %4533 = vst.msk [vmem:[%s7031_s13 + $0x110] sm:$0xff] %vm4498_vm2, %v4124_v47  ;;  %v4127_v1 = vadd.f32 %v5481_v48, %v7023_v45  ;;  %v4118_v52 = vpop.f32.mrb[175].mxu0 }
 0x356   : > { %4531 = vst.msk [vmem:[%s7031_s13 + $0x100] sm:$0xff] %vm4498_vm2, %v4116_v51  ;;  %v4119_v61 = vadd.f32 %v7023_v45, %v4118_v52  ;;  %v3259_v40 = vpop.f32.mrb[200].mxu1 }
 0x357   : > { %4534 = vst.msk [vmem:[%s7031_s13 + $0x118] sm:$0xff] %vm4498_vm2, %v4127_v1  ;;  %v3500_v10 = vadd.f32 %v3259_v40, %v1697_v17  ;;  %v3261_v8 = vpop.f32.mrb[201].mxu1  ;;  %5534 = vmatprep.mubr.msk.bf16.mxu0 %vm1871_vm0, %v3710_v54  ;;  %v7772_v40 = vld [vmem:[#allocation52_spill] sm:$0xff] }
 0x358   : > { %4532 = vst.msk [vmem:[%s7031_s13 + $0x108] sm:$0xff] %vm4498_vm2, %v4119_v61  ;;  %v3262_v63 = vpop.f32.mrb[202].mxu1  ;;  %v1705_v16 = vadd.f32 %v7038_v60, %v7772_v40 }
 0x359   : > { %v3501_v23 = vadd.f32 %v3262_v63, %v1698_v19  ;;  %v3264_v14 = vpop.f32.mrb[203].mxu1  ;;  %v3628_v12 = vmax.f32 %v3500_v10, 0.0 }
 0x35a   : > { %v7773_v14 = vld [vmem:[#allocation54_spill] sm:$0xff] }
 0x35b   : > { %v3629_v42 = vmax.f32 %v3501_v23, 0.0 }
 0x35d   : > { %v3711_v50 = vpack.c.bf16 %v3629_v42, %v3628_v12  ;;  %v1706_v12 = vadd.f32 %v7038_v60, %v7773_v14 }
 0x35e   : > { %v3267_v53 = vpop.f32.mrb[204].mxu1 }
 0x35f   : > { %v3502_v26 = vadd.f32 %v3267_v53, %v1699_v43  ;;  %v3269_v20 = vpop.f32.mrb[205].mxu1  ;;  %5535 = vmatmul.mubr.msk.bf16.gmra.mrb[228].mxu0 %vm1871_vm0, %v3711_v50 }
 0x360   : > { %v3270_v11 = vpop.f32.mrb[206].mxu1 }
 0x361   : > { %v3503_v6 = vadd.f32 %v3270_v11, %v1700_v4  ;;  %v3272_v27 = vpop.f32.mrb[207].mxu1  ;;  %v3630_v22 = vmax.f32 %v3502_v26, 0.0  ;;  %v7774_v26 = vld [vmem:[#allocation57_spill] sm:$0xff] }
 0x362   : > { %v5484_v31 = vpop.f32.mrb[176].mxu0  ;;  %v1707_v20 = vadd.f32 %v7038_v60, %v7774_v26  ;;  %v7775_v27 = vld [vmem:[#allocation59_spill] sm:$0xff] }
 0x363   : > { %v3631_v41 = vmax.f32 %v3503_v6, 0.0  ;;  %v4140_v57 = vadd.f32 %v5484_v31, %v7023_v45  ;;  %v4131_v35 = vpop.f32.mrb[177].mxu0  ;;  %v1708_v31 = vadd.f32 %v7038_v60, %v7775_v27 }
 0x364   : > { %v4132_v7 = vadd.f32 %v7023_v45, %v4131_v35  ;;  %v5485_v3 = vpop.f32.mrb[178].mxu0 }
 0x365   : > { %v3712_v18 = vpack.c.bf16 %v3631_v41, %v3630_v22  ;;  %4537 = vst.msk [vmem:[%s7031_s13 + $0x130] sm:$0xff] %vm4498_vm2, %v4140_v57  ;;  %v4143_v13 = vadd.f32 %v5485_v3, %v7023_v45  ;;  %v4134_v59 = vpop.f32.mrb[179].mxu0 }
 0x366   : > { %4535 = vst.msk [vmem:[%s7031_s13 + $0x120] sm:$0xff] %vm4498_vm2, %v4132_v7  ;;  %v4135_v24 = vadd.f32 %v7023_v45, %v4134_v59  ;;  %v3275_v49 = vpop.f32.mrb[208].mxu1 }
 0x367   : > { %4538 = vst.msk [vmem:[%s7031_s13 + $0x138] sm:$0xff] %vm4498_vm2, %v4143_v13  ;;  %v3504_v36 = vadd.f32 %v3275_v49, %v1701_v39  ;;  %v3277_v29 = vpop.f32.mrb[209].mxu1  ;;  %5538 = vmatprep.mubr.msk.bf16.mxu0 %vm1871_vm0, %v3712_v18  ;;  %v7776_v49 = vld [vmem:[#allocation56_spill] sm:$0xff] }
 0x368   : > { %4536 = vst.msk [vmem:[%s7031_s13 + $0x128] sm:$0xff] %vm4498_vm2, %v4135_v24  ;;  %v3278_v56 = vpop.f32.mrb[210].mxu1  ;;  %v1709_v38 = vadd.f32 %v7038_v60, %v7776_v49 }
 0x369   : > { %v3505_v32 = vadd.f32 %v3278_v56, %v1702_v55  ;;  %v3280_v58 = vpop.f32.mrb[211].mxu1  ;;  %v3632_v62 = vmax.f32 %v3504_v36, 0.0 }
 0x36a   : > { %v7777_v58 = vld [vmem:[#allocation58_spill] sm:$0xff] }
 0x36b   : > { %v3633_v30 = vmax.f32 %v3505_v32, 0.0 }
 0x36d   : > { %v3713_v37 = vpack.c.bf16 %v3633_v30, %v3632_v62  ;;  %v1710_v62 = vadd.f32 %v7038_v60, %v7777_v58 }
 0x36e   : > { %v3283_v28 = vpop.f32.mrb[212].mxu1 }
 0x36f   : > { %v3506_v5 = vadd.f32 %v3283_v28, %v1703_v2  ;;  %v3285_v25 = vpop.f32.mrb[213].mxu1  ;;  %5539 = vmatmul.mubr.msk.bf16.gmra.mrb[232].mxu0 %vm1871_vm0, %v3713_v37 }
 0x370   : > { %v3286_v47 = vpop.f32.mrb[214].mxu1 }
 0x371   : > { %v3507_v9 = vadd.f32 %v3286_v47, %v1704_v34  ;;  %v3288_v51 = vpop.f32.mrb[215].mxu1  ;;  %v3634_v44 = vmax.f32 %v3506_v5, 0.0  ;;  %v7778_v5 = vld [vmem:[#allocation61_spill] sm:$0xff] }
 0x372   : > { %v5488_v48 = vpop.f32.mrb[180].mxu0  ;;  %v1711_v25 = vadd.f32 %v7038_v60, %v7778_v5  ;;  %v7779_v51 = vld [vmem:[#allocation63_spill] sm:$0xff] }
 0x373   : > { %v3635_v17 = vmax.f32 %v3507_v9, 0.0  ;;  %v4156_v54 = vadd.f32 %v5488_v48, %v7023_v45  ;;  %v4147_v1 = vpop.f32.mrb[181].mxu0  ;;  %v1712_v48 = vadd.f32 %v7038_v60, %v7779_v51 }
 0x374   : > { %v4148_v52 = vadd.f32 %v7023_v45, %v4147_v1  ;;  %v5489_v61 = vpop.f32.mrb[182].mxu0 }
 0x375   : > { %v3714_v19 = vpack.c.bf16 %v3635_v17, %v3634_v44  ;;  %4541 = vst.msk [vmem:[%s7031_s13 + $0x150] sm:$0xff] %vm4498_vm2, %v4156_v54  ;;  %v4159_v10 = vadd.f32 %v5489_v61, %v7023_v45  ;;  %v4150_v8 = vpop.f32.mrb[183].mxu0 }
 0x376   : > { %4539 = vst.msk [vmem:[%s7031_s13 + $0x140] sm:$0xff] %vm4498_vm2, %v4148_v52  ;;  %v4151_v63 = vadd.f32 %v7023_v45, %v4150_v8  ;;  %v3291_v23 = vpop.f32.mrb[216].mxu1 }
 0x377   : > { %4542 = vst.msk [vmem:[%s7031_s13 + $0x158] sm:$0xff] %vm4498_vm2, %v4159_v10  ;;  %v3508_v42 = vadd.f32 %v3291_v23, %v1705_v16  ;;  %v3293_v15 = vpop.f32.mrb[217].mxu1  ;;  %5542 = vmatprep.mubr.msk.bf16.mxu0 %vm1871_vm0, %v3714_v19  ;;  %v7780_v23 = vld [vmem:[#allocation60_spill] sm:$0xff] }
 0x378   : > { %4540 = vst.msk [vmem:[%s7031_s13 + $0x148] sm:$0xff] %vm4498_vm2, %v4151_v63  ;;  %v3294_v43 = vpop.f32.mrb[218].mxu1  ;;  %v1713_v14 = vadd.f32 %v7038_v60, %v7780_v23 }
 0x379   : > { %v3509_v50 = vadd.f32 %v3294_v43, %v1706_v12  ;;  %v3296_v53 = vpop.f32.mrb[219].mxu1  ;;  %v3636_v0 = vmax.f32 %v3508_v42, 0.0 }
 0x37a   : > { %v7781_v53 = vld [vmem:[#allocation62_spill] sm:$0xff] }
 0x37b   : > { %v3637_v4 = vmax.f32 %v3509_v50, 0.0 }
 0x37d   : > { %v3715_v11 = vpack.c.bf16 %v3637_v4, %v3636_v0  ;;  %v1714_v0 = vadd.f32 %v7038_v60, %v7781_v53 }
 0x37e   : > { %v3299_v6 = vpop.f32.mrb[220].mxu1 }
 0x37f   : > { %v3510_v22 = vadd.f32 %v3299_v6, %v1707_v20  ;;  %v3301_v41 = vpop.f32.mrb[221].mxu1  ;;  %5543 = vmatmul.mubr.msk.bf16.gmra.mrb[236].mxu0 %vm1871_vm0, %v3715_v11 }
 0x380   : > { %v3302_v57 = vpop.f32.mrb[222].mxu1 }
 0x381   : > { %v3511_v35 = vadd.f32 %v3302_v57, %v1708_v31  ;;  %v3304_v7 = vpop.f32.mrb[223].mxu1  ;;  %v3638_v46 = vmax.f32 %v3510_v22, 0.0  ;;  %v7782_v22 = vld [vmem:[#allocation65_spill] sm:$0xff] }
 0x382   : > { %v5492_v3 = vpop.f32.mrb[184].mxu0  ;;  %v1715_v41 = vadd.f32 %v7038_v60, %v7782_v22  ;;  %v7783_v7 = vld [vmem:[#allocation67_spill] sm:$0xff] }
 0x383   : > { %v3639_v39 = vmax.f32 %v3511_v35, 0.0  ;;  %v4172_v18 = vadd.f32 %v5492_v3, %v7023_v45  ;;  %v4163_v13 = vpop.f32.mrb[185].mxu0  ;;  %v1716_v3 = vadd.f32 %v7038_v60, %v7783_v7 }
 0x384   : > { %v4164_v59 = vadd.f32 %v7023_v45, %v4163_v13  ;;  %v5493_v24 = vpop.f32.mrb[186].mxu0 }
 0x385   : > { %v3716_v55 = vpack.c.bf16 %v3639_v39, %v3638_v46  ;;  %4545 = vst.msk [vmem:[%s7031_s13 + $0x170] sm:$0xff] %vm4498_vm2, %v4172_v18  ;;  %v4175_v36 = vadd.f32 %v5493_v24, %v7023_v45  ;;  %v4166_v29 = vpop.f32.mrb[187].mxu0 }
 0x386   : > { %4543 = vst.msk [vmem:[%s7031_s13 + $0x160] sm:$0xff] %vm4498_vm2, %v4164_v59  ;;  %v4167_v56 = vadd.f32 %v7023_v45, %v4166_v29  ;;  %v3307_v32 = vpop.f32.mrb[224].mxu1 }
 0x387   : > { %4546 = vst.msk [vmem:[%s7031_s13 + $0x178] sm:$0xff] %vm4498_vm2, %v4175_v36  ;;  %v3512_v30 = vadd.f32 %v3307_v32, %v1709_v38  ;;  %v3309_v33 = vpop.f32.mrb[225].mxu1  ;;  %5546 = vmatprep.mubr.msk.bf16.mxu0 %vm1871_vm0, %v3716_v55  ;;  %v7784_v32 = vld [vmem:[#allocation64_spill] sm:$0xff] }
 0x388   : > { %4544 = vst.msk [vmem:[%s7031_s13 + $0x168] sm:$0xff] %vm4498_vm2, %v4167_v56  ;;  %v3310_v2 = vpop.f32.mrb[226].mxu1  ;;  %v1717_v58 = vadd.f32 %v7038_v60, %v7784_v32 }
 0x389   : > { %v3513_v37 = vadd.f32 %v3310_v2, %v1710_v62  ;;  %v3312_v28 = vpop.f32.mrb[227].mxu1  ;;  %v3640_v21 = vmax.f32 %v3512_v30, 0.0 }
 0x38a   : > { %v7785_v28 = vld [vmem:[#allocation66_spill] sm:$0xff] }
 0x38b   : > { %v3641_v34 = vmax.f32 %v3513_v37, 0.0 }
 0x38d   : > { %v3717_v47 = vpack.c.bf16 %v3641_v34, %v3640_v21  ;;  %v1718_v21 = vadd.f32 %v7038_v60, %v7785_v28 }
 0x38e   : > { %v3315_v9 = vpop.f32.mrb[228].mxu1 }
 0x38f   : > { %v3514_v44 = vadd.f32 %v3315_v9, %v1711_v25  ;;  %v3317_v17 = vpop.f32.mrb[229].mxu1  ;;  %5547 = vmatmul.mubr.msk.bf16.gmra.mrb[240].mxu0 %vm1871_vm0, %v3717_v47 }
 0x390   : > { %v3318_v54 = vpop.f32.mrb[230].mxu1 }
 0x391   : > { %v3515_v1 = vadd.f32 %v3318_v54, %v1712_v48  ;;  %v3320_v52 = vpop.f32.mrb[231].mxu1  ;;  %v3642_v40 = vmax.f32 %v3514_v44, 0.0  ;;  %v7786_v44 = vld [vmem:[#allocation69_spill] sm:$0xff] }
 0x392   : > { %v5496_v61 = vpop.f32.mrb[188].mxu0  ;;  %v1719_v17 = vadd.f32 %v7038_v60, %v7786_v44  ;;  %v7787_v52 = vld [vmem:[#allocation71_spill] sm:$0xff] }
 0x393   : > { %v3643_v16 = vmax.f32 %v3515_v1, 0.0  ;;  %v4188_v19 = vadd.f32 %v5496_v61, %v7023_v45  ;;  %v4179_v10 = vpop.f32.mrb[189].mxu0  ;;  %v1720_v61 = vadd.f32 %v7038_v60, %v7787_v52 }
 0x394   : > { %v4180_v8 = vadd.f32 %v7023_v45, %v4179_v10  ;;  %v5497_v63 = vpop.f32.mrb[190].mxu0 }
 0x395   : > { %v3718_v12 = vpack.c.bf16 %v3643_v16, %v3642_v40  ;;  %4549 = vst.msk [vmem:[%s7031_s13 + $0x190] sm:$0xff] %vm4498_vm2, %v4188_v19  ;;  %v4191_v42 = vadd.f32 %v5497_v63, %v7023_v45  ;;  %v4182_v15 = vpop.f32.mrb[191].mxu0 }
 0x396   : > { %4547 = vst.msk [vmem:[%s7031_s13 + $0x180] sm:$0xff] %vm4498_vm2, %v4180_v8  ;;  %v4183_v43 = vadd.f32 %v7023_v45, %v4182_v15  ;;  %v3323_v50 = vpop.f32.mrb[232].mxu1 }
 0x397   : > { %4550 = vst.msk [vmem:[%s7031_s13 + $0x198] sm:$0xff] %vm4498_vm2, %v4191_v42  ;;  %v3516_v4 = vadd.f32 %v3323_v50, %v1713_v14  ;;  %v3325_v26 = vpop.f32.mrb[233].mxu1  ;;  %5550 = vmatprep.mubr.msk.bf16.mxu0 %vm1871_vm0, %v3718_v12  ;;  %v7788_v50 = vld [vmem:[#allocation68_spill] sm:$0xff] }
 0x398   : > { %4548 = vst.msk [vmem:[%s7031_s13 + $0x188] sm:$0xff] %vm4498_vm2, %v4183_v43  ;;  %v3326_v20 = vpop.f32.mrb[234].mxu1  ;;  %v1721_v53 = vadd.f32 %v7038_v60, %v7788_v50 }
 0x399   : > { %v3517_v11 = vadd.f32 %v3326_v20, %v1714_v0  ;;  %v3328_v6 = vpop.f32.mrb[235].mxu1  ;;  %v3644_v27 = vmax.f32 %v3516_v4, 0.0 }
 0x39a   : > { %v7789_v6 = vld [vmem:[#allocation70_spill] sm:$0xff] }
 0x39b   : > { %v3645_v31 = vmax.f32 %v3517_v11, 0.0 }
 0x39d   : > { %v3719_v57 = vpack.c.bf16 %v3645_v31, %v3644_v27  ;;  %v1722_v27 = vadd.f32 %v7038_v60, %v7789_v6 }
 0x39e   : > { %v3331_v35 = vpop.f32.mrb[236].mxu1 }
 0x39f   : > { %v3518_v46 = vadd.f32 %v3331_v35, %v1715_v41  ;;  %v3333_v39 = vpop.f32.mrb[237].mxu1  ;;  %5551 = vmatmul.mubr.msk.bf16.gmra.mrb[244].mxu0 %vm1871_vm0, %v3719_v57 }
 0x3a0   : > { %v3334_v18 = vpop.f32.mrb[238].mxu1 }
 0x3a1   : > { %v3519_v13 = vadd.f32 %v3334_v18, %v1716_v3  ;;  %v3336_v59 = vpop.f32.mrb[239].mxu1  ;;  %v3646_v49 = vmax.f32 %v3518_v46, 0.0  ;;  %v7790_v46 = vld [vmem:[#allocation73_spill] sm:$0xff] }
 0x3a2   : > { %v5500_v24 = vpop.f32.mrb[192].mxu0 }
 0x3a3   : > { %v3647_v38 = vmax.f32 %v3519_v13, 0.0  ;;  %v4204_v55 = vadd.f32 %v5500_v24, %v7023_v45  ;;  %v4195_v36 = vpop.f32.mrb[193].mxu0  ;;  %v7791_v13 = vld [vmem:[#allocation75_spill] sm:$0xff] }
 0x3a4   : > { %v4196_v29 = vadd.f32 %v7023_v45, %v4195_v36  ;;  %v5501_v56 = vpop.f32.mrb[194].mxu0  ;;  %v1724_v59 = vadd.f32 %v7038_v60, %v7791_v13 }
 0x3a5   : > { %v3720_v62 = vpack.c.bf16 %v3647_v38, %v3646_v49  ;;  %4553 = vst.msk [vmem:[%s7031_s13 + $0x1b0] sm:$0xff] %vm4498_vm2, %v4204_v55  ;;  %v4207_v30 = vadd.f32 %v5501_v56, %v7023_v45  ;;  %v4198_v33 = vpop.f32.mrb[195].mxu0 }
 0x3a6   : > { %4551 = vst.msk [vmem:[%s7031_s13 + $0x1a0] sm:$0xff] %vm4498_vm2, %v4196_v29  ;;  %v4199_v2 = vadd.f32 %v7023_v45, %v4198_v33  ;;  %v3339_v37 = vpop.f32.mrb[240].mxu1 }
 0x3a7   : > { %4554 = vst.msk [vmem:[%s7031_s13 + $0x1b8] sm:$0xff] %vm4498_vm2, %v4207_v30  ;;  %v3520_v34 = vadd.f32 %v3339_v37, %v1717_v58  ;;  %v3341_v5 = vpop.f32.mrb[241].mxu1  ;;  %5554 = vmatprep.mubr.msk.bf16.mxu0 %vm1871_vm0, %v3720_v62  ;;  %v7383_v58 = vld [vmem:[%s7636_s7] ss:$0 sm:$0xff]  ;;  %v7792_v37 = vld [vmem:[#allocation72_spill] sm:$0xff] }
 0x3a8   : > { %4552 = vst.msk [vmem:[%s7031_s13 + $0x1a8] sm:$0xff] %vm4498_vm2, %v4199_v2  ;;  %v3342_v25 = vpop.f32.mrb[242].mxu1  ;;  %v7390_v2 = vld [vmem:[%s7634_s5] ss:$0 sm:$0xff] }
 0x3a9   : > { %v3521_v47 = vadd.f32 %v3342_v25, %v1718_v21  ;;  %v3344_v9 = vpop.f32.mrb[243].mxu1  ;;  %v3648_v51 = vmax.f32 %v3520_v34, 0.0  ;;  %v1725_v28 = vadd.f32 %v7390_v2, %v7792_v37 }
 0x3aa   : > { %v7793_v9 = vld [vmem:[#allocation74_spill] sm:$0xff] }
 0x3ab   : > { %v3649_v48 = vmax.f32 %v3521_v47, 0.0 }
 0x3ad   : > { %v3721_v54 = vpack.c.bf16 %v3649_v48, %v3648_v51  ;;  %v1726_v51 = vadd.f32 %v7390_v2, %v7793_v9 }
 0x3ae   : > { %v3347_v1 = vpop.f32.mrb[244].mxu1 }
 0x3af   : > { %v3522_v40 = vadd.f32 %v3347_v1, %v1719_v17  ;;  %v3349_v16 = vpop.f32.mrb[245].mxu1  ;;  %5555 = vmatmul.mubr.msk.bf16.gmra.mrb[248].mxu0 %vm1871_vm0, %v3721_v54 }
 0x3b0   : > { %v3350_v19 = vpop.f32.mrb[246].mxu1 }
 0x3b1   : > { %v3523_v10 = vadd.f32 %v3350_v19, %v1720_v61  ;;  %v3352_v8 = vpop.f32.mrb[247].mxu1  ;;  %v3650_v23 = vmax.f32 %v3522_v40, 0.0  ;;  %v7794_v40 = vld [vmem:[#allocation77_spill] sm:$0xff] }
 0x3b2   : > { %v5504_v63 = vpop.f32.mrb[196].mxu0  ;;  %v1727_v16 = vadd.f32 %v7390_v2, %v7794_v40  ;;  %v7795_v8 = vld [vmem:[#allocation79_spill] sm:$0xff] }
 0x3b3   : > { %v3651_v14 = vmax.f32 %v3523_v10, 0.0  ;;  %v4220_v12 = vadd.f32 %v5504_v63, %v7023_v45  ;;  %v4211_v42 = vpop.f32.mrb[197].mxu0  ;;  %v1728_v63 = vadd.f32 %v7390_v2, %v7795_v8 }
 0x3b4   : > { %v4212_v15 = vadd.f32 %v7023_v45, %v4211_v42  ;;  %v5505_v43 = vpop.f32.mrb[198].mxu0 }
 0x3b5   : > { %v3722_v0 = vpack.c.bf16 %v3651_v14, %v3650_v23  ;;  %4557 = vst.msk [vmem:[%s7031_s13 + $0x1d0] sm:$0xff] %vm4498_vm2, %v4220_v12  ;;  %v4223_v4 = vadd.f32 %v5505_v43, %v7023_v45  ;;  %v4214_v26 = vpop.f32.mrb[199].mxu0 }
 0x3b6   : > { %4555 = vst.msk [vmem:[%s7031_s13 + $0x1c0] sm:$0xff] %vm4498_vm2, %v4212_v15  ;;  %v4215_v20 = vadd.f32 %v7023_v45, %v4214_v26  ;;  %v3355_v11 = vpop.f32.mrb[248].mxu1  ;;  %v1723_v45 = vadd.f32 %v7038_v60, %v7790_v46 }
 0x3b7   : > { %4558 = vst.msk [vmem:[%s7031_s13 + $0x1d8] sm:$0xff] %vm4498_vm2, %v4223_v4  ;;  %v3524_v31 = vadd.f32 %v3355_v11, %v1721_v53  ;;  %v3357_v22 = vpop.f32.mrb[249].mxu1  ;;  %5558 = vmatprep.mubr.msk.bf16.mxu0 %vm1871_vm0, %v3722_v0  ;;  %v7796_v11 = vld [vmem:[#allocation76_spill] sm:$0xff] }
 0x3b8   : > { %4556 = vst.msk [vmem:[%s7031_s13 + $0x1c8] sm:$0xff] %vm4498_vm2, %v4215_v20  ;;  %v3358_v41 = vpop.f32.mrb[250].mxu1  ;;  %v1729_v6 = vadd.f32 %v7390_v2, %v7796_v11 }
 0x3b9   : > { %v3525_v57 = vadd.f32 %v3358_v41, %v1722_v27  ;;  %v3360_v35 = vpop.f32.mrb[251].mxu1  ;;  %v3652_v7 = vmax.f32 %v3524_v31, 0.0 }
 0x3ba   : > { %v7797_v35 = vld [vmem:[#allocation78_spill] sm:$0xff] }
 0x3bb   : > { %v3653_v3 = vmax.f32 %v3525_v57, 0.0 }
 0x3bd   : > { %v3723_v39 = vpack.c.bf16 %v3653_v3, %v3652_v7  ;;  %v1730_v7 = vadd.f32 %v7390_v2, %v7797_v35 }
 0x3be   : > { %v3363_v18 = vpop.f32.mrb[252].mxu1 }
 0x3bf   : > { %v3526_v24 = vadd.f32 %v3363_v18, %v1723_v45  ;;  %v3365_v49 = vpop.f32.mrb[253].mxu1  ;;  %5559 = vmatmul.mubr.msk.bf16.gmra.mrb[252].mxu0 %vm1871_vm0, %v3723_v39 }
 0x3c0   : > { %v3366_v38 = vpop.f32.mrb[254].mxu1 }
 0x3c1   : > { %v3527_v55 = vadd.f32 %v3366_v38, %v1724_v59  ;;  %v3368_v36 = vpop.f32.mrb[255].mxu1  ;;  %v3654_v56 = vmax.f32 %v3526_v24, 0.0  ;;  %v7798_v24 = vld [vmem:[#allocation81_spill] sm:$0xff] }
 0x3c2   : > { %v5508_v29 = vpop.f32.mrb[200].mxu0  ;;  %v1731_v49 = vadd.f32 %v7390_v2, %v7798_v24  ;;  %v7799_v36 = vld [vmem:[#allocation83_spill] sm:$0xff] }
 0x3c3   : > { %v3655_v32 = vmax.f32 %v3527_v55, 0.0  ;;  %v4236_v60 = vadd.f32 %v7383_v58, %v5508_v29  ;;  %v4227_v62 = vpop.f32.mrb[201].mxu0  ;;  %v1732_v29 = vadd.f32 %v7390_v2, %v7799_v36 }
 0x3c4   : > { %v4228_v30 = vadd.f32 %v7383_v58, %v4227_v62  ;;  %v5509_v33 = vpop.f32.mrb[202].mxu0 }
 0x3c5   : > { %v3724_v21 = vpack.c.bf16 %v3655_v32, %v3654_v56  ;;  %4561 = vst.msk [vmem:[%s7031_s13 + $0x1f0] sm:$0xff] %vm4498_vm2, %v4236_v60  ;;  %v4239_v34 = vadd.f32 %v7383_v58, %v5509_v33  ;;  %v4230_v5 = vpop.f32.mrb[203].mxu0 }
 0x3c6   : > { %4559 = vst.msk [vmem:[%s7031_s13 + $0x1e0] sm:$0xff] %vm4498_vm2, %v4228_v30  ;;  %v4231_v25 = vadd.f32 %v7383_v58, %v4230_v5  ;;  %v3371_v47 = vpop.f32.mrb[0].mxu1 }
 0x3c7   : > { %4562 = vst.msk [vmem:[%s7031_s13 + $0x1f8] sm:$0xff] %vm4498_vm2, %v4239_v34  ;;  %v3528_v48 = vadd.f32 %v3371_v47, %v1725_v28  ;;  %v3373_v44 = vpop.f32.mrb[1].mxu1  ;;  %5562 = vmatprep.mubr.msk.bf16.mxu0 %vm1871_vm0, %v3724_v21  ;;  %v7800_v47 = vld [vmem:[#allocation80_spill] sm:$0xff] }
 0x3c8   : > { %4560 = vst.msk [vmem:[%s7031_s13 + $0x1e8] sm:$0xff] %vm4498_vm2, %v4231_v25  ;;  %v3374_v17 = vpop.f32.mrb[2].mxu1  ;;  %v1733_v9 = vadd.f32 %v7390_v2, %v7800_v47 }
 0x3c9   : > { %v3529_v54 = vadd.f32 %v3374_v17, %v1726_v51  ;;  %v3376_v1 = vpop.f32.mrb[3].mxu1  ;;  %v3656_v52 = vmax.f32 %v3528_v48, 0.0 }
 0x3ca   : > { %v7801_v1 = vld [vmem:[#allocation82_spill] sm:$0xff] }
 0x3cb   : > { %v3657_v61 = vmax.f32 %v3529_v54, 0.0 }
 0x3cd   : > { %v3725_v19 = vpack.c.bf16 %v3657_v61, %v3656_v52  ;;  %v1734_v52 = vadd.f32 %v7390_v2, %v7801_v1 }
 0x3ce   : > { %v3379_v10 = vpop.f32.mrb[4].mxu1 }
 0x3cf   : > { %v3530_v23 = vadd.f32 %v3379_v10, %v1727_v16  ;;  %v3381_v14 = vpop.f32.mrb[5].mxu1  ;;  %5563 = vmatmul.mubr.msk.bf16.gmra.mrb[0].mxu0 %vm1871_vm0, %v3725_v19 }
 0x3d0   : > { %v3382_v12 = vpop.f32.mrb[6].mxu1 }
 0x3d1   : > { %v3531_v42 = vadd.f32 %v3382_v12, %v1728_v63  ;;  %v3384_v15 = vpop.f32.mrb[7].mxu1  ;;  %v3658_v50 = vmax.f32 %v3530_v23, 0.0 }
 0x3d2   : > { %v5512_v43 = vpop.f32.mrb[204].mxu0 }
 0x3d3   : > { %v3659_v53 = vmax.f32 %v3531_v42, 0.0  ;;  %v4252_v0 = vadd.f32 %v7383_v58, %v5512_v43  ;;  %v4243_v4 = vpop.f32.mrb[205].mxu0 }
 0x3d4   : > { %v4244_v26 = vadd.f32 %v7383_v58, %v4243_v4  ;;  %v5513_v20 = vpop.f32.mrb[206].mxu0 }
 0x3d5   : > { %v3726_v27 = vpack.c.bf16 %v3659_v53, %v3658_v50  ;;  %4565 = vst.msk [vmem:[%s7031_s13 + $0x210] sm:$0xff] %vm4498_vm2, %v4252_v0  ;;  %v4255_v31 = vadd.f32 %v7383_v58, %v5513_v20  ;;  %v4246_v22 = vpop.f32.mrb[207].mxu0 }
 0x3d6   : > { %4563 = vst.msk [vmem:[%s7031_s13 + $0x200] sm:$0xff] %vm4498_vm2, %v4244_v26  ;;  %v4247_v41 = vadd.f32 %v7383_v58, %v4246_v22  ;;  %v3387_v57 = vpop.f32.mrb[8].mxu1 }
 0x3d7   : > { %4566 = vst.msk [vmem:[%s7031_s13 + $0x218] sm:$0xff] %vm4498_vm2, %v4255_v31  ;;  %v3532_v3 = vadd.f32 %v3387_v57, %v1729_v6  ;;  %v3389_v46 = vpop.f32.mrb[9].mxu1  ;;  %5566 = vmatprep.mubr.msk.bf16.mxu0 %vm1871_vm0, %v3726_v27 }
 0x3d8   : > { %4564 = vst.msk [vmem:[%s7031_s13 + $0x208] sm:$0xff] %vm4498_vm2, %v4247_v41  ;;  %v3390_v45 = vpop.f32.mrb[10].mxu1 }
 0x3d9   : > { %v3533_v39 = vadd.f32 %v3390_v45, %v1730_v7  ;;  %v3392_v18 = vpop.f32.mrb[11].mxu1  ;;  %v3660_v13 = vmax.f32 %v3532_v3, 0.0 }
 0x3db   : > { %v3661_v59 = vmax.f32 %v3533_v39, 0.0 }
 0x3dd   : > { %v3727_v38 = vpack.c.bf16 %v3661_v59, %v3660_v13 }
 0x3de   : > { %v3395_v55 = vpop.f32.mrb[12].mxu1 }
 0x3df   : > { %v3534_v56 = vadd.f32 %v3395_v55, %v1731_v49  ;;  %v3397_v32 = vpop.f32.mrb[13].mxu1  ;;  %5567 = vmatmul.mubr.msk.bf16.gmra.mrb[4].mxu0 %vm1871_vm0, %v3727_v38 }
 0x3e0   : > { %v3398_v60 = vpop.f32.mrb[14].mxu1 }
 0x3e1   : > { %v3535_v62 = vadd.f32 %v3398_v60, %v1732_v29  ;;  %v3400_v30 = vpop.f32.mrb[15].mxu1  ;;  %v3662_v37 = vmax.f32 %v3534_v56, 0.0 }
 0x3e2   : > { %v5516_v33 = vpop.f32.mrb[208].mxu0 }
 0x3e3   : > { %v3663_v28 = vmax.f32 %v3535_v62, 0.0  ;;  %v4268_v21 = vadd.f32 %v7383_v58, %v5516_v33  ;;  %v4259_v34 = vpop.f32.mrb[209].mxu0 }
 0x3e4   : > { %v4260_v5 = vadd.f32 %v7383_v58, %v4259_v34  ;;  %v5517_v25 = vpop.f32.mrb[210].mxu0 }
 0x3e5   : > { %v3728_v51 = vpack.c.bf16 %v3663_v28, %v3662_v37  ;;  %4569 = vst.msk [vmem:[%s7031_s13 + $0x230] sm:$0xff] %vm4498_vm2, %v4268_v21  ;;  %v4271_v48 = vadd.f32 %v7383_v58, %v5517_v25  ;;  %v4262_v44 = vpop.f32.mrb[211].mxu0 }
 0x3e6   : > { %4567 = vst.msk [vmem:[%s7031_s13 + $0x220] sm:$0xff] %vm4498_vm2, %v4260_v5  ;;  %v4263_v17 = vadd.f32 %v7383_v58, %v4262_v44  ;;  %v3403_v54 = vpop.f32.mrb[16].mxu1 }
 0x3e7   : > { %4570 = vst.msk [vmem:[%s7031_s13 + $0x238] sm:$0xff] %vm4498_vm2, %v4271_v48  ;;  %v3536_v61 = vadd.f32 %v3403_v54, %v1733_v9  ;;  %v3405_v40 = vpop.f32.mrb[17].mxu1  ;;  %5570 = vmatprep.mubr.msk.bf16.mxu0 %vm1871_vm0, %v3728_v51 }
 0x3e8   : > { %4568 = vst.msk [vmem:[%s7031_s13 + $0x228] sm:$0xff] %vm4498_vm2, %v4263_v17  ;;  %v3406_v16 = vpop.f32.mrb[18].mxu1 }
 0x3e9   : > { %v3537_v19 = vadd.f32 %v3406_v16, %v1734_v52  ;;  %v3408_v10 = vpop.f32.mrb[19].mxu1  ;;  %v3664_v8 = vmax.f32 %v3536_v61, 0.0 }
 0x3eb   : > { %v3665_v63 = vmax.f32 %v3537_v19, 0.0 }
 0x3ed   : > { %v3729_v23 = vpack.c.bf16 %v3665_v63, %v3664_v8 }
 0x3ef   : > { %5571 = vmatmul.mubr.msk.bf16.gmra.mrb[8].mxu0 %vm1871_vm0, %v3729_v23 }
 0x3f2   : > { %v5520_v2 = vpop.f32.mrb[212].mxu0 }
 0x3f3   : > { %v4284_v14 = vadd.f32 %v7383_v58, %v5520_v2  ;;  %v4275_v12 = vpop.f32.mrb[213].mxu0 }
 0x3f4   : > { %v4276_v42 = vadd.f32 %v7383_v58, %v4275_v12  ;;  %v5521_v15 = vpop.f32.mrb[214].mxu0 }
 0x3f5   : > { %4573 = vst.msk [vmem:[%s7031_s13 + $0x250] sm:$0xff] %vm4498_vm2, %v4284_v14  ;;  %v4287_v43 = vadd.f32 %v7383_v58, %v5521_v15  ;;  %v4278_v50 = vpop.f32.mrb[215].mxu0 }
 0x3f6   : > { %4571 = vst.msk [vmem:[%s7031_s13 + $0x240] sm:$0xff] %vm4498_vm2, %v4276_v42  ;;  %v4279_v53 = vadd.f32 %v7383_v58, %v4278_v50 }
 0x3f7   : > { %4574 = vst.msk [vmem:[%s7031_s13 + $0x258] sm:$0xff] %vm4498_vm2, %v4287_v43 }
 0x3f8   : > { %4572 = vst.msk [vmem:[%s7031_s13 + $0x248] sm:$0xff] %vm4498_vm2, %v4279_v53 }
 0x402   : > { %v5524_v0 = vpop.f32.mrb[216].mxu0 }
 0x403   : > { %v4300_v4 = vadd.f32 %v7383_v58, %v5524_v0  ;;  %v4291_v26 = vpop.f32.mrb[217].mxu0 }
 0x404   : > { %v4292_v20 = vadd.f32 %v7383_v58, %v4291_v26  ;;  %v5525_v11 = vpop.f32.mrb[218].mxu0 }
 0x405   : > { %4577 = vst.msk [vmem:[%s7031_s13 + $0x270] sm:$0xff] %vm4498_vm2, %v4300_v4  ;;  %v4303_v6 = vadd.f32 %v7383_v58, %v5525_v11  ;;  %v4294_v27 = vpop.f32.mrb[219].mxu0 }
 0x406   : > { %4575 = vst.msk [vmem:[%s7031_s13 + $0x260] sm:$0xff] %vm4498_vm2, %v4292_v20  ;;  %v4295_v31 = vadd.f32 %v7383_v58, %v4294_v27 }
 0x407   : > { %4578 = vst.msk [vmem:[%s7031_s13 + $0x278] sm:$0xff] %vm4498_vm2, %v4303_v6 }
 0x408   : > { %4576 = vst.msk [vmem:[%s7031_s13 + $0x268] sm:$0xff] %vm4498_vm2, %v4295_v31 }
 0x412   : > { %v5528_v22 = vpop.f32.mrb[220].mxu0 }
 0x413   : > { %v4316_v41 = vadd.f32 %v7383_v58, %v5528_v22  ;;  %v4307_v57 = vpop.f32.mrb[221].mxu0 }
 0x414   : > { %v4308_v35 = vadd.f32 %v7383_v58, %v4307_v57  ;;  %v5529_v7 = vpop.f32.mrb[222].mxu0 }
 0x415   : > { %4581 = vst.msk [vmem:[%s7031_s13 + $0x290] sm:$0xff] %vm4498_vm2, %v4316_v41  ;;  %v4319_v3 = vadd.f32 %v7383_v58, %v5529_v7  ;;  %v4310_v46 = vpop.f32.mrb[223].mxu0 }
 0x416   : > { %4579 = vst.msk [vmem:[%s7031_s13 + $0x280] sm:$0xff] %vm4498_vm2, %v4308_v35  ;;  %v4311_v45 = vadd.f32 %v7383_v58, %v4310_v46 }
 0x417   : > { %4582 = vst.msk [vmem:[%s7031_s13 + $0x298] sm:$0xff] %vm4498_vm2, %v4319_v3 }
 0x418   : > { %4580 = vst.msk [vmem:[%s7031_s13 + $0x288] sm:$0xff] %vm4498_vm2, %v4311_v45 }
 0x422   : > { %v5532_v39 = vpop.f32.mrb[224].mxu0 }
 0x423   : > { %v4332_v18 = vadd.f32 %v7383_v58, %v5532_v39  ;;  %v4323_v13 = vpop.f32.mrb[225].mxu0 }
 0x424   : > { %v4324_v59 = vadd.f32 %v7383_v58, %v4323_v13  ;;  %v5533_v24 = vpop.f32.mrb[226].mxu0 }
 0x425   : > { %4585 = vst.msk [vmem:[%s7031_s13 + $0x2b0] sm:$0xff] %vm4498_vm2, %v4332_v18  ;;  %v4335_v49 = vadd.f32 %v7383_v58, %v5533_v24  ;;  %v4326_v38 = vpop.f32.mrb[227].mxu0 }
 0x426   : > { %4583 = vst.msk [vmem:[%s7031_s13 + $0x2a0] sm:$0xff] %vm4498_vm2, %v4324_v59  ;;  %v4327_v55 = vadd.f32 %v7383_v58, %v4326_v38 }
 0x427   : > { %4586 = vst.msk [vmem:[%s7031_s13 + $0x2b8] sm:$0xff] %vm4498_vm2, %v4335_v49 }
 0x428   : > { %4584 = vst.msk [vmem:[%s7031_s13 + $0x2a8] sm:$0xff] %vm4498_vm2, %v4327_v55 }
 0x432   : > { %v5536_v36 = vpop.f32.mrb[228].mxu0 }
 0x433   : > { %v4348_v29 = vadd.f32 %v7383_v58, %v5536_v36  ;;  %v4339_v56 = vpop.f32.mrb[229].mxu0 }
 0x434   : > { %v4340_v32 = vadd.f32 %v7383_v58, %v4339_v56  ;;  %v5537_v60 = vpop.f32.mrb[230].mxu0 }
 0x435   : > { %4589 = vst.msk [vmem:[%s7031_s13 + $0x2d0] sm:$0xff] %vm4498_vm2, %v4348_v29  ;;  %v4351_v62 = vadd.f32 %v7383_v58, %v5537_v60  ;;  %v4342_v30 = vpop.f32.mrb[231].mxu0 }
 0x436   : > { %4587 = vst.msk [vmem:[%s7031_s13 + $0x2c0] sm:$0xff] %vm4498_vm2, %v4340_v32  ;;  %v4343_v33 = vadd.f32 %v7383_v58, %v4342_v30 }
 0x437   : > { %4590 = vst.msk [vmem:[%s7031_s13 + $0x2d8] sm:$0xff] %vm4498_vm2, %v4351_v62 }
 0x438   : > { %4588 = vst.msk [vmem:[%s7031_s13 + $0x2c8] sm:$0xff] %vm4498_vm2, %v4343_v33 }
 0x442   : > { %v5540_v37 = vpop.f32.mrb[232].mxu0 }
 0x443   : > { %v4364_v28 = vadd.f32 %v7383_v58, %v5540_v37  ;;  %v4355_v21 = vpop.f32.mrb[233].mxu0 }
 0x444   : > { %v4356_v34 = vadd.f32 %v7383_v58, %v4355_v21  ;;  %v5541_v5 = vpop.f32.mrb[234].mxu0 }
 0x445   : > { %4593 = vst.msk [vmem:[%s7031_s13 + $0x2f0] sm:$0xff] %vm4498_vm2, %v4364_v28  ;;  %v4367_v25 = vadd.f32 %v7383_v58, %v5541_v5  ;;  %v4358_v47 = vpop.f32.mrb[235].mxu0 }
 0x446   : > { %4591 = vst.msk [vmem:[%s7031_s13 + $0x2e0] sm:$0xff] %vm4498_vm2, %v4356_v34  ;;  %v4359_v9 = vadd.f32 %v7383_v58, %v4358_v47 }
 0x447   : > { %4594 = vst.msk [vmem:[%s7031_s13 + $0x2f8] sm:$0xff] %vm4498_vm2, %v4367_v25 }
 0x448   : > { %4592 = vst.msk [vmem:[%s7031_s13 + $0x2e8] sm:$0xff] %vm4498_vm2, %v4359_v9 }
 0x452   : > { %v5544_v51 = vpop.f32.mrb[236].mxu0 }
 0x453   : > { %v4380_v48 = vadd.f32 %v7383_v58, %v5544_v51  ;;  %v4371_v44 = vpop.f32.mrb[237].mxu0 }
 0x454   : > { %v4372_v17 = vadd.f32 %v7383_v58, %v4371_v44  ;;  %v5545_v54 = vpop.f32.mrb[238].mxu0 }
 0x455   : > { %4597 = vst.msk [vmem:[%s7031_s13 + $0x310] sm:$0xff] %vm4498_vm2, %v4380_v48  ;;  %v4383_v1 = vadd.f32 %v7383_v58, %v5545_v54  ;;  %v4374_v52 = vpop.f32.mrb[239].mxu0 }
 0x456   : > { %4595 = vst.msk [vmem:[%s7031_s13 + $0x300] sm:$0xff] %vm4498_vm2, %v4372_v17  ;;  %v4375_v61 = vadd.f32 %v7383_v58, %v4374_v52 }
 0x457   : > { %4598 = vst.msk [vmem:[%s7031_s13 + $0x318] sm:$0xff] %vm4498_vm2, %v4383_v1 }
 0x458   : > { %4596 = vst.msk [vmem:[%s7031_s13 + $0x308] sm:$0xff] %vm4498_vm2, %v4375_v61 }
 0x462   : > { %v5548_v40 = vpop.f32.mrb[240].mxu0 }
 0x463   : > { %v4396_v16 = vadd.f32 %v7383_v58, %v5548_v40  ;;  %v4387_v19 = vpop.f32.mrb[241].mxu0 }
 0x464   : > { %v4388_v10 = vadd.f32 %v7383_v58, %v4387_v19  ;;  %v5549_v8 = vpop.f32.mrb[242].mxu0 }
 0x465   : > { %4601 = vst.msk [vmem:[%s7031_s13 + $0x330] sm:$0xff] %vm4498_vm2, %v4396_v16  ;;  %v4399_v63 = vadd.f32 %v7383_v58, %v5549_v8  ;;  %v4390_v23 = vpop.f32.mrb[243].mxu0 }
 0x466   : > { %4599 = vst.msk [vmem:[%s7031_s13 + $0x320] sm:$0xff] %vm4498_vm2, %v4388_v10  ;;  %v4391_v2 = vadd.f32 %v7383_v58, %v4390_v23 }
 0x467   : > { %4602 = vst.msk [vmem:[%s7031_s13 + $0x338] sm:$0xff] %vm4498_vm2, %v4399_v63 }
 0x468   : > { %4600 = vst.msk [vmem:[%s7031_s13 + $0x328] sm:$0xff] %vm4498_vm2, %v4391_v2 }
 0x472   : > { %v5552_v14 = vpop.f32.mrb[244].mxu0 }
 0x473   : > { %v4412_v12 = vadd.f32 %v7383_v58, %v5552_v14  ;;  %v4403_v42 = vpop.f32.mrb[245].mxu0 }
 0x474   : > { %v4404_v15 = vadd.f32 %v7383_v58, %v4403_v42  ;;  %v5553_v43 = vpop.f32.mrb[246].mxu0 }
 0x475   : > { %4605 = vst.msk [vmem:[%s7031_s13 + $0x350] sm:$0xff] %vm4498_vm2, %v4412_v12  ;;  %v4415_v50 = vadd.f32 %v7383_v58, %v5553_v43  ;;  %v4406_v53 = vpop.f32.mrb[247].mxu0 }
 0x476   : > { %4603 = vst.msk [vmem:[%s7031_s13 + $0x340] sm:$0xff] %vm4498_vm2, %v4404_v15  ;;  %v4407_v0 = vadd.f32 %v7383_v58, %v4406_v53 }
 0x477   : > { %4606 = vst.msk [vmem:[%s7031_s13 + $0x358] sm:$0xff] %vm4498_vm2, %v4415_v50 }
 0x478   : > { %4604 = vst.msk [vmem:[%s7031_s13 + $0x348] sm:$0xff] %vm4498_vm2, %v4407_v0 }
 0x482   : > { %v5556_v4 = vpop.f32.mrb[248].mxu0 }
 0x483   : > { %v4428_v26 = vadd.f32 %v7383_v58, %v5556_v4  ;;  %v4419_v20 = vpop.f32.mrb[249].mxu0 }
 0x484   : > { %v4420_v11 = vadd.f32 %v7383_v58, %v4419_v20  ;;  %v5557_v6 = vpop.f32.mrb[250].mxu0 }
 0x485   : > { %4609 = vst.msk [vmem:[%s7031_s13 + $0x370] sm:$0xff] %vm4498_vm2, %v4428_v26  ;;  %v4431_v27 = vadd.f32 %v7383_v58, %v5557_v6  ;;  %v4422_v31 = vpop.f32.mrb[251].mxu0 }
 0x486   : > { %4607 = vst.msk [vmem:[%s7031_s13 + $0x360] sm:$0xff] %vm4498_vm2, %v4420_v11  ;;  %v4423_v22 = vadd.f32 %v7383_v58, %v4422_v31 }
 0x487   : > { %4610 = vst.msk [vmem:[%s7031_s13 + $0x378] sm:$0xff] %vm4498_vm2, %v4431_v27 }
 0x488   : > { %4608 = vst.msk [vmem:[%s7031_s13 + $0x368] sm:$0xff] %vm4498_vm2, %v4423_v22 }
 0x492   : > { %v5560_v41 = vpop.f32.mrb[252].mxu0 }
 0x493   : > { %v4444_v57 = vadd.f32 %v7383_v58, %v5560_v41  ;;  %v4435_v35 = vpop.f32.mrb[253].mxu0 }
 0x494   : > { %v4436_v7 = vadd.f32 %v7383_v58, %v4435_v35  ;;  %v5561_v3 = vpop.f32.mrb[254].mxu0 }
 0x495   : > { %4613 = vst.msk [vmem:[%s7031_s13 + $0x390] sm:$0xff] %vm4498_vm2, %v4444_v57  ;;  %v4447_v46 = vadd.f32 %v7383_v58, %v5561_v3  ;;  %v4438_v45 = vpop.f32.mrb[255].mxu0 }
 0x496   : > { %4611 = vst.msk [vmem:[%s7031_s13 + $0x380] sm:$0xff] %vm4498_vm2, %v4436_v7  ;;  %v4439_v39 = vadd.f32 %v7383_v58, %v4438_v45 }
 0x497   : > { %4614 = vst.msk [vmem:[%s7031_s13 + $0x398] sm:$0xff] %vm4498_vm2, %v4447_v46 }
 0x498   : > { %4612 = vst.msk [vmem:[%s7031_s13 + $0x388] sm:$0xff] %vm4498_vm2, %v4439_v39 }
 0x4a2   : > { %v5564_v18 = vpop.f32.mrb[0].mxu0 }
 0x4a3   : > { %v4460_v13 = vadd.f32 %v7383_v58, %v5564_v18  ;;  %v4451_v59 = vpop.f32.mrb[1].mxu0 }
 0x4a4   : > { %v4452_v24 = vadd.f32 %v7383_v58, %v4451_v59  ;;  %v5565_v49 = vpop.f32.mrb[2].mxu0 }
 0x4a5   : > { %4617 = vst.msk [vmem:[%s7031_s13 + $0x3b0] sm:$0xff] %vm4498_vm2, %v4460_v13  ;;  %v4463_v38 = vadd.f32 %v7383_v58, %v5565_v49  ;;  %v4454_v55 = vpop.f32.mrb[3].mxu0 }
 0x4a6   : > { %4615 = vst.msk [vmem:[%s7031_s13 + $0x3a0] sm:$0xff] %vm4498_vm2, %v4452_v24  ;;  %v4455_v36 = vadd.f32 %v7383_v58, %v4454_v55 }
 0x4a7   : > { %4618 = vst.msk [vmem:[%s7031_s13 + $0x3b8] sm:$0xff] %vm4498_vm2, %v4463_v38 }
 0x4a8   : > { %4616 = vst.msk [vmem:[%s7031_s13 + $0x3a8] sm:$0xff] %vm4498_vm2, %v4455_v36 }
 0x4b2   : > { %v5568_v29 = vpop.f32.mrb[4].mxu0 }
 0x4b3   : > { %v4476_v56 = vadd.f32 %v7383_v58, %v5568_v29  ;;  %v4467_v32 = vpop.f32.mrb[5].mxu0 }
 0x4b4   : > { %v4468_v60 = vadd.f32 %v7383_v58, %v4467_v32  ;;  %v5569_v62 = vpop.f32.mrb[6].mxu0 }
 0x4b5   : > { %4621 = vst.msk [vmem:[%s7031_s13 + $0x3d0] sm:$0xff] %vm4498_vm2, %v4476_v56  ;;  %v4479_v30 = vadd.f32 %v7383_v58, %v5569_v62  ;;  %v4470_v33 = vpop.f32.mrb[7].mxu0 }
 0x4b6   : > { %4619 = vst.msk [vmem:[%s7031_s13 + $0x3c0] sm:$0xff] %vm4498_vm2, %v4468_v60  ;;  %v4471_v37 = vadd.f32 %v7383_v58, %v4470_v33 }
 0x4b7   : > { %4622 = vst.msk [vmem:[%s7031_s13 + $0x3d8] sm:$0xff] %vm4498_vm2, %v4479_v30 }
 0x4b8   : > { %4620 = vst.msk [vmem:[%s7031_s13 + $0x3c8] sm:$0xff] %vm4498_vm2, %v4471_v37 }
 0x4c2   : > { %v5572_v28 = vpop.f32.mrb[8].mxu0 }
 0x4c3   : > { %v4492_v21 = vadd.f32 %v7383_v58, %v5572_v28  ;;  %v4483_v34 = vpop.f32.mrb[9].mxu0 }
 0x4c4   : > { %v4484_v5 = vadd.f32 %v7383_v58, %v4483_v34  ;;  %v5573_v25 = vpop.f32.mrb[10].mxu0 }
 0x4c5   : > { %4625 = vst.msk [vmem:[%s7031_s13 + $0x3f0] sm:$0xff] %vm4498_vm2, %v4492_v21  ;;  %v4495_v47 = vadd.f32 %v7383_v58, %v5573_v25  ;;  %v4486_v9 = vpop.f32.mrb[11].mxu0 }
 0x4c6   : > { %4623 = vst.msk [vmem:[%s7031_s13 + $0x3e0] sm:$0xff] %vm4498_vm2, %v4484_v5  ;;  %v4487_v51 = vadd.f32 %v7383_v58, %v4486_v9 }
 0x4c7   : > { %4626 = vst.msk [vmem:[%s7031_s13 + $0x3f8] sm:$0xff] %vm4498_vm2, %v4495_v47 }
 0x4c8   : > { %4624 = vst.msk [vmem:[%s7031_s13 + $0x3e8] sm:$0xff] %vm4498_vm2, %v4487_v51 }
 0x4c9 PF: > { %s18_s29 = sadd.s32 1, %s5937_s29   ;;  %s7802_s27 = smov %s5933_s28 }
 0x4ca   : > { %p15_p5 = scmp.ge.s32.totalorder %s18_s29, 4   ;;  %s7803_s28 = smov %s7805_s30 }
 0x4cc   :  { %17 = sbr.rel (!%p15_p5) target bundleno = 2 (0x2), region = 85 }

</bundles_post_ra>
